<compile_context>
chip_gen: v7x
topology: tpu7x:2x2x1
jax: 0.10.0
libtpu: 0.0.40
codegen_flags: <defaults>
</compile_context>

<pallas_src>
import numpy as np
import jax
import jax.numpy as jnp
from jax.experimental import pallas as pl
from jax.experimental.pallas import tpu as pltpu

PAD_H = 8   # halo rows in depthwise scratch; needs (k-1)*dil - pad <= PAD (max 6: dwd conv)
PAD_W = 8   # halo cols (in W units) in depthwise scratch


def _leaky(v):
    return jnp.where(v >= 0, v, 0.01 * v)


def _make_kernel(H, W, C):
    WC = W * C

    def kernel(x_ref, n1_g_ref, n1_b_ref, n2_g_ref, n2_b_ref,
               avg_ref, dw_w_ref, dwd_w_ref, br_w_ref,
               lka_pw_ref, ffn_pw_ref, o_ref, pad_buf):
        # Zero the padded scratch ONCE per grid step: the interior is fully overwritten
        # by every depthwise pass, only the halo bands must stay zero.
        pad_buf[...] = jnp.zeros_like(pad_buf)

        x = x_ref[0].astype(jnp.float32)                      # (H, W*C) lane-dense
        avg = avg_ref[...]                                    # (W*C, W*C) block-diag 1/C

        def layernorm(v, g_ref, b_ref, eps=1e-6):
            # channels_first LayerNorm: per-pixel channel stats via block-diag matmul.
            u = jnp.dot(v, avg, preferred_element_type=jnp.float32)
            d = v - u
            s = jnp.dot(d * d, avg, preferred_element_type=jnp.float32)
            return d * jax.lax.rsqrt(s + eps) * g_ref[0] + b_ref[0]

        def dw_conv(v, w_ref, k, pad, dil):
            # Depthwise conv in packed layout: W-taps are lane shifts (multiples of C),
            # H-taps are sublane shifts; one partial accumulator per kernel row.
            pad_buf[PAD_H:PAD_H + H, PAD_W * C:(PAD_W + W) * C] = v
            wv = w_ref[...]                                   # (k, k, W*C) pre-tiled
            rows = []
            for ki in range(k):
                oi = PAD_H - pad + ki * dil
                acc = None
                for kj in range(k):
                    oj = PAD_W - pad + kj * dil
                    tap = pad_buf[oi:oi + H, oj * C:(oj + W) * C] * wv[ki, kj]
                    acc = tap if acc is None else acc + tap
                rows.append(acc)
            while len(rows) > 1:                              # tree-combine partials
                nxt = [rows[i] + rows[i + 1] for i in range(0, len(rows) - 1, 2)]
                if len(rows) % 2:
                    nxt.append(rows[-1])
                rows = nxt
            return rows[0]

        # ---- Block forward ----
        y1 = layernorm(x, n1_g_ref, n1_b_ref)
        # LargeKernelAttention: dw 5x5 -> dwd 5x5 (dil=3, pad=6) -> pw 1x1, then gate.
        a = dw_conv(y1, dw_w_ref, 5, 2, 1)
        a = dw_conv(a, dwd_w_ref, 5, 6, 3)
        a = jnp.dot(a, lka_pw_ref[...], preferred_element_type=jnp.float32)
        y2 = y1 * a
        y3 = layernorm(y2, n2_g_ref, n2_b_ref)
        # FFN: both depthwise branches fused into one 5x5 pass, then 1x1 conv + LeakyReLU.
        # (ChannelShuffle is instantiated in FFN but never used in forward -> omitted.)
        cat = dw_conv(y3, br_w_ref, 5, 2, 1)
        f = _leaky(jnp.dot(cat, ffn_pw_ref[...], preferred_element_type=jnp.float32))
        o_ref[0] = (f + x).astype(o_ref.dtype)                # residual with raw input

    return kernel


def block_pallas(x_nhwc, params):
    B, H, W, C = x_nhwc.shape
    WC = W * C
    half = C // 2

    x_packed = x_nhwc.reshape(B, H, WC).astype(jnp.float32)

    def tile_vec(v):                       # (C,) -> (1, W*C): channel pattern per W position
        return jnp.tile(v.astype(jnp.float32), W).reshape(1, WC)

    def tile_dw(w):                        # (k, k, C) -> (k, k, W*C)
        return jnp.tile(w.astype(jnp.float32), (1, 1, W))

    def blockdiag(m):                      # (C, C) -> (W*C, W*C) block-diagonal
        return jnp.kron(jnp.eye(W, dtype=jnp.float32), m.astype(jnp.float32))

    avg = blockdiag(jnp.full((C, C), 1.0 / C, jnp.float32))

    # Fuse FFN branch filters: branch1 5x5 on the first half channels; branch2 3x3
    # zero-padded to 5x5 (centered: pad=2 with zero border == pad=1 with 3x3) on the rest.
    b2p = jnp.zeros((5, 5, half), jnp.float32).at[1:4, 1:4, :].set(params['b2_w'])
    br_w = jnp.concatenate([params['b1_w'], b2p], axis=-1)

    inputs = (x_packed,
              tile_vec(params['n1_w']), tile_vec(params['n1_b']),
              tile_vec(params['n2_w']), tile_vec(params['n2_b']),
              avg,
              tile_dw(params['dw_w']), tile_dw(params['dwd_w']), tile_dw(br_w),
              blockdiag(params['lka_pw']), blockdiag(params['ffn_pw']))

    def full_spec(shape):
        return pl.BlockSpec(shape, lambda b, _n=len(shape): (0,) * _n)

    in_specs = [pl.BlockSpec((1, H, WC), lambda b: (b, 0, 0))]
    in_specs += [full_spec(p.shape) for p in inputs[1:]]

    out = pl.pallas_call(
        _make_kernel(H, W, C),
        out_shape=jax.ShapeDtypeStruct((B, H, WC), jnp.float32),
        grid_spec=pltpu.PrefetchScalarGridSpec(
            num_scalar_prefetch=0,
            grid=(B,),
            in_specs=in_specs,
            out_specs=pl.BlockSpec((1, H, WC), lambda b: (b, 0, 0)),
            scratch_shapes=[pltpu.VMEM((H + 2 * PAD_H, (W + 2 * PAD_W) * C),
                                       jnp.float32)]),
        compiler_params=pltpu.CompilerParams(dimension_semantics=("parallel",)),
    )(*inputs)

    return out.reshape(B, H, W, C)


# ---------------- pure-JAX reference (for correctness check), NHWC ----------------
def _layernorm_ref(v, w, b, eps=1e-6):
    u = jnp.mean(v, axis=-1, keepdims=True)
    s = jnp.mean((v - u) ** 2, axis=-1, keepdims=True)
    return (v - u) / jnp.sqrt(s + eps) * w + b


def _dwconv_ref(v, w, pad, dil):
    cc = w.shape[-1]
    return jax.lax.conv_general_dilated(
        v, w[:, :, None, :], (1, 1), [(pad, pad), (pad, pad)],
        rhs_dilation=(dil, dil),
        dimension_numbers=('NHWC', 'HWIO', 'NHWC'),
        feature_group_count=cc)


def block_ref(x, p):
    identity = x
    y1 = _layernorm_ref(x, p['n1_w'], p['n1_b'])
    a = _dwconv_ref(y1, p['dw_w'], 2, 1)
    a = _dwconv_ref(a, p['dwd_w'], 6, 3)
    a = jnp.einsum('bhwc,cd->bhwd', a, p['lka_pw'])
    y2 = y1 * a
    y3 = _layernorm_ref(y2, p['n2_w'], p['n2_b'])
    half = y3.shape[-1] // 2
    x1 = _dwconv_ref(y3[..., :half], p['b1_w'], 2, 1)   # branch1: k=5, pad=2
    x2 = _dwconv_ref(y3[..., half:], p['b2_w'], 1, 1)   # branch2: k=3, pad=1
    f = _leaky(jnp.einsum('bhwc,cd->bhwd',
                          jnp.concatenate([x1, x2], -1), p['ffn_pw']))
    return f + identity


if __name__ == "__main__":
    # Block(channels=8, kernel_size=13, dilation=3, kernel_size1=5, kernel_size2=3)
    B, C, H, W = 2, 8, 16, 16
    key = jax.random.PRNGKey(0)
    ks = jax.random.split(key, 12)
    params = dict(
        n1_w=0.1 + 0.05 * jax.random.normal(ks[0], (C,), jnp.float32),   # LayerNorm1 weight
        n1_b=0.05 * jax.random.normal(ks[1], (C,), jnp.float32),         # LayerNorm1 bias
        dw_w=jax.random.normal(ks[2], (5, 5, C), jnp.float32) * 0.1,     # LKA depthwise 5x5
        dwd_w=jax.random.normal(ks[3], (5, 5, C), jnp.float32) * 0.1,    # LKA depthwise 5x5, dil=3
        lka_pw=jax.random.normal(ks[4], (C, C), jnp.float32) * 0.2,      # LKA pointwise 1x1
        n2_w=0.1 + 0.05 * jax.random.normal(ks[5], (C,), jnp.float32),   # LayerNorm2 weight
        n2_b=0.05 * jax.random.normal(ks[6], (C,), jnp.float32),         # LayerNorm2 bias
        b1_w=jax.random.normal(ks[7], (5, 5, C // 2), jnp.float32) * 0.1,  # FFN branch1 (k=5)
        b2_w=jax.random.normal(ks[8], (3, 3, C // 2), jnp.float32) * 0.1,  # FFN branch2 (k=3)
        ffn_pw=jax.random.normal(ks[9], (C, C), jnp.float32) * 0.2,        # FFN 1x1 conv
    )
    x_nchw = jax.random.normal(ks[10], (B, C, H, W), jnp.float32)
    x = jnp.transpose(x_nchw, (0, 2, 3, 1))   # NHWC for the kernel / reference

    out = jax.block_until_ready(block_pallas(x, params))
    ref = jax.block_until_ready(block_ref(x, params))
    np.testing.assert_allclose(np.asarray(out), np.asarray(ref), rtol=1e-4, atol=1e-4)
    print("KERNEL_OK")
</pallas_src>

<mosaic_0001>
module attributes {stable_mosaic.version = 11 : i64} {
  func.func @kernel(%arg0: i32, %arg1: memref<1x16x128xf32, #tpu.memory_space<vmem>>, %arg2: memref<1x128xf32, #tpu.memory_space<vmem>>, %arg3: memref<1x128xf32, #tpu.memory_space<vmem>>, %arg4: memref<1x128xf32, #tpu.memory_space<vmem>>, %arg5: memref<1x128xf32, #tpu.memory_space<vmem>>, %arg6: memref<128x128xf32, #tpu.memory_space<vmem>>, %arg7: memref<5x5x128xf32, #tpu.memory_space<vmem>>, %arg8: memref<5x5x128xf32, #tpu.memory_space<vmem>>, %arg9: memref<5x5x128xf32, #tpu.memory_space<vmem>>, %arg10: memref<128x128xf32, #tpu.memory_space<vmem>>, %arg11: memref<128x128xf32, #tpu.memory_space<vmem>>, %arg12: memref<1x16x128xf32, #tpu.memory_space<vmem>>, %arg13: memref<32x256xf32, #tpu.memory_space<vmem>>) attributes {dimension_semantics = [#tpu.dimension_semantics<parallel>], iteration_bounds = array<i64: 2>, scalar_prefetch = 0 : i64, scratch_operands = 1 : i64, tpu.core_type = #tpu.core_type<tc>, window_params = [{transform_indices = @transform_0, window_bounds = array<i64: 1, 16, 128>}, {pipeline_mode = #tpu.pipeline_mode<synchronous>, transform_indices = @transform_1, window_bounds = array<i64: 1, 128>}, {pipeline_mode = #tpu.pipeline_mode<synchronous>, transform_indices = @transform_2, window_bounds = array<i64: 1, 128>}, {pipeline_mode = #tpu.pipeline_mode<synchronous>, transform_indices = @transform_3, window_bounds = array<i64: 1, 128>}, {pipeline_mode = #tpu.pipeline_mode<synchronous>, transform_indices = @transform_4, window_bounds = array<i64: 1, 128>}, {pipeline_mode = #tpu.pipeline_mode<synchronous>, transform_indices = @transform_5, window_bounds = array<i64: 128, 128>}, {pipeline_mode = #tpu.pipeline_mode<synchronous>, transform_indices = @transform_6, window_bounds = array<i64: 5, 5, 128>}, {pipeline_mode = #tpu.pipeline_mode<synchronous>, transform_indices = @transform_7, window_bounds = array<i64: 5, 5, 128>}, {pipeline_mode = #tpu.pipeline_mode<synchronous>, transform_indices = @transform_8, window_bounds = array<i64: 5, 5, 128>}, {pipeline_mode = #tpu.pipeline_mode<synchronous>, transform_indices = @transform_9, window_bounds = array<i64: 128, 128>}, {pipeline_mode = #tpu.pipeline_mode<synchronous>, transform_indices = @transform_10, window_bounds = array<i64: 128, 128>}, {transform_indices = @transform_11, window_bounds = array<i64: 1, 16, 128>}]} {
    %cst = arith.constant 0.000000e+00 : f32
    %0 = vector.broadcast %cst : f32 to vector<32x256xf32>
    %c0 = arith.constant 0 : index
    %c0_0 = arith.constant 0 : index
    %1 = vector.load %arg13[%c0, %c0_0] : memref<32x256xf32, #tpu.memory_space<vmem>>, vector<32x256xf32>
    tpu.vector_store %arg13[%c0, %c0_0], %0 {strides = array<i32>} : memref<32x256xf32, #tpu.memory_space<vmem>>, vector<32x256xf32>,
    %c0_1 = arith.constant 0 : index
    %c0_2 = arith.constant 0 : index
    %c0_3 = arith.constant 0 : index
    %2 = vector.load %arg1[%c0_1, %c0_2, %c0_3] : memref<1x16x128xf32, #tpu.memory_space<vmem>>, vector<1x16x128xf32>
    %3 = vector.shape_cast %2 : vector<1x16x128xf32> to vector<16x128xf32>
    %c0_4 = arith.constant 0 : index
    %c0_5 = arith.constant 0 : index
    %4 = vector.load %arg6[%c0_4, %c0_5] : memref<128x128xf32, #tpu.memory_space<vmem>>, vector<128x128xf32>
    %cst_6 = arith.constant dense<0.000000e+00> : vector<16x128xf32>
    %5 = tpu.matmul %3, %4, %cst_6 {dimension_numbers = #tpu.dot_dimension_numbers<[1], [0], [0], [1], [0, 0, 1, 1], [], []>} : vector<16x128xf32>, vector<128x128xf32>, vector<16x128xf32> -> vector<16x128xf32>
    %6 = arith.subf %3, %5 : vector<16x128xf32>
    %7 = arith.mulf %6, %6 : vector<16x128xf32>
    %cst_7 = arith.constant dense<0.000000e+00> : vector<16x128xf32>
    %8 = tpu.matmul %7, %4, %cst_7 {dimension_numbers = #tpu.dot_dimension_numbers<[1], [0], [0], [1], [0, 0, 1, 1], [], []>} : vector<16x128xf32>, vector<128x128xf32>, vector<16x128xf32> -> vector<16x128xf32>
    %cst_8 = arith.constant 9.99999997E-7 : f32
    %9 = vector.broadcast %cst_8 : f32 to vector<16x128xf32>
    %10 = arith.addf %8, %9 : vector<16x128xf32>
    %11 = math.rsqrt %10 : vector<16x128xf32>
    %12 = arith.mulf %6, %11 : vector<16x128xf32>
    %c0_9 = arith.constant 0 : index
    %c0_10 = arith.constant 0 : index
    %13 = vector.load %arg2[%c0_9, %c0_10] : memref<1x128xf32, #tpu.memory_space<vmem>>, vector<1x128xf32>
    %14 = vector.shape_cast %13 : vector<1x128xf32> to vector<128xf32>
    %15 = vector.shape_cast %14 : vector<128xf32> to vector<1x128xf32>
    %16 = vector.broadcast %15 : vector<1x128xf32> to vector<16x128xf32>
    %17 = arith.mulf %12, %16 : vector<16x128xf32>
    %c0_11 = arith.constant 0 : index
    %c0_12 = arith.constant 0 : index
    %18 = vector.load %arg3[%c0_11, %c0_12] : memref<1x128xf32, #tpu.memory_space<vmem>>, vector<1x128xf32>
    %19 = vector.shape_cast %18 : vector<1x128xf32> to vector<128xf32>
    %20 = vector.shape_cast %19 : vector<128xf32> to vector<1x128xf32>
    %21 = vector.broadcast %20 : vector<1x128xf32> to vector<16x128xf32>
    %22 = arith.addf %17, %21 : vector<16x128xf32>
    %c8 = arith.constant 8 : index
    %c64 = arith.constant 64 : index
    %23 = vector.load %arg13[%c8, %c64] : memref<32x256xf32, #tpu.memory_space<vmem>>, vector<16x128xf32>
    tpu.vector_store %arg13[%c8, %c64], %22 {strides = array<i32>} : memref<32x256xf32, #tpu.memory_space<vmem>>, vector<16x128xf32>,
    %c0_13 = arith.constant 0 : index
    %c0_14 = arith.constant 0 : index
    %c0_15 = arith.constant 0 : index
    %24 = vector.load %arg7[%c0_13, %c0_14, %c0_15] : memref<5x5x128xf32, #tpu.memory_space<vmem>>, vector<5x5x128xf32>
    %c6 = arith.constant 6 : index
    %c48 = arith.constant 48 : index
    %25 = vector.load %arg13[%c6, %c48] : memref<32x256xf32, #tpu.memory_space<vmem>>, vector<16x128xf32>
    %26 = vector.extract_strided_slice %24 {offsets = [0, 0, 0], sizes = [1, 1, 128], strides = [1, 1, 1]} : vector<5x5x128xf32> to vector<1x1x128xf32>
    %27 = vector.shape_cast %26 : vector<1x1x128xf32> to vector<128xf32>
    %28 = vector.shape_cast %27 : vector<128xf32> to vector<1x128xf32>
    %29 = vector.broadcast %28 : vector<1x128xf32> to vector<16x128xf32>
    %30 = arith.mulf %25, %29 : vector<16x128xf32>
    %c6_16 = arith.constant 6 : index
    %c56 = arith.constant 56 : index
    %31 = vector.load %arg13[%c6_16, %c56] : memref<32x256xf32, #tpu.memory_space<vmem>>, vector<16x128xf32>
    %32 = vector.extract_strided_slice %24 {offsets = [0, 1, 0], sizes = [1, 1, 128], strides = [1, 1, 1]} : vector<5x5x128xf32> to vector<1x1x128xf32>
    %33 = vector.shape_cast %32 : vector<1x1x128xf32> to vector<128xf32>
    %34 = vector.shape_cast %33 : vector<128xf32> to vector<1x128xf32>
    %35 = vector.broadcast %34 : vector<1x128xf32> to vector<16x128xf32>
    %36 = arith.mulf %31, %35 : vector<16x128xf32>
    %37 = arith.addf %30, %36 : vector<16x128xf32>
    %c6_17 = arith.constant 6 : index
    %c64_18 = arith.constant 64 : index
    %38 = vector.load %arg13[%c6_17, %c64_18] : memref<32x256xf32, #tpu.memory_space<vmem>>, vector<16x128xf32>
    %39 = vector.extract_strided_slice %24 {offsets = [0, 2, 0], sizes = [1, 1, 128], strides = [1, 1, 1]} : vector<5x5x128xf32> to vector<1x1x128xf32>
    %40 = vector.shape_cast %39 : vector<1x1x128xf32> to vector<128xf32>
    %41 = vector.shape_cast %40 : vector<128xf32> to vector<1x128xf32>
    %42 = vector.broadcast %41 : vector<1x128xf32> to vector<16x128xf32>
    %43 = arith.mulf %38, %42 : vector<16x128xf32>
    %44 = arith.addf %37, %43 : vector<16x128xf32>
    %c6_19 = arith.constant 6 : index
    %c72 = arith.constant 72 : index
    %45 = vector.load %arg13[%c6_19, %c72] : memref<32x256xf32, #tpu.memory_space<vmem>>, vector<16x128xf32>
    %46 = vector.extract_strided_slice %24 {offsets = [0, 3, 0], sizes = [1, 1, 128], strides = [1, 1, 1]} : vector<5x5x128xf32> to vector<1x1x128xf32>
    %47 = vector.shape_cast %46 : vector<1x1x128xf32> to vector<128xf32>
    %48 = vector.shape_cast %47 : vector<128xf32> to vector<1x128xf32>
    %49 = vector.broadcast %48 : vector<1x128xf32> to vector<16x128xf32>
    %50 = arith.mulf %45, %49 : vector<16x128xf32>
    %51 = arith.addf %44, %50 : vector<16x128xf32>
    %c6_20 = arith.constant 6 : index
    %c80 = arith.constant 80 : index
    %52 = vector.load %arg13[%c6_20, %c80] : memref<32x256xf32, #tpu.memory_space<vmem>>, vector<16x128xf32>
    %53 = vector.extract_strided_slice %24 {offsets = [0, 4, 0], sizes = [1, 1, 128], strides = [1, 1, 1]} : vector<5x5x128xf32> to vector<1x1x128xf32>
    %54 = vector.shape_cast %53 : vector<1x1x128xf32> to vector<128xf32>
    %55 = vector.shape_cast %54 : vector<128xf32> to vector<1x128xf32>
    %56 = vector.broadcast %55 : vector<1x128xf32> to vector<16x128xf32>
    %57 = arith.mulf %52, %56 : vector<16x128xf32>
    %58 = arith.addf %51, %57 : vector<16x128xf32>
    %c7 = arith.constant 7 : index
    %c48_21 = arith.constant 48 : index
    %59 = vector.load %arg13[%c7, %c48_21] : memref<32x256xf32, #tpu.memory_space<vmem>>, vector<16x128xf32>
    %60 = vector.extract_strided_slice %24 {offsets = [1, 0, 0], sizes = [1, 1, 128], strides = [1, 1, 1]} : vector<5x5x128xf32> to vector<1x1x128xf32>
    %61 = vector.shape_cast %60 : vector<1x1x128xf32> to vector<128xf32>
    %62 = vector.shape_cast %61 : vector<128xf32> to vector<1x128xf32>
    %63 = vector.broadcast %62 : vector<1x128xf32> to vector<16x128xf32>
    %64 = arith.mulf %59, %63 : vector<16x128xf32>
    %c7_22 = arith.constant 7 : index
    %c56_23 = arith.constant 56 : index
    %65 = vector.load %arg13[%c7_22, %c56_23] : memref<32x256xf32, #tpu.memory_space<vmem>>, vector<16x128xf32>
    %66 = vector.extract_strided_slice %24 {offsets = [1, 1, 0], sizes = [1, 1, 128], strides = [1, 1, 1]} : vector<5x5x128xf32> to vector<1x1x128xf32>
    %67 = vector.shape_cast %66 : vector<1x1x128xf32> to vector<128xf32>
    %68 = vector.shape_cast %67 : vector<128xf32> to vector<1x128xf32>
    %69 = vector.broadcast %68 : vector<1x128xf32> to vector<16x128xf32>
    %70 = arith.mulf %65, %69 : vector<16x128xf32>
    %71 = arith.addf %64, %70 : vector<16x128xf32>
    %c7_24 = arith.constant 7 : index
    %c64_25 = arith.constant 64 : index
    %72 = vector.load %arg13[%c7_24, %c64_25] : memref<32x256xf32, #tpu.memory_space<vmem>>, vector<16x128xf32>
    %73 = vector.extract_strided_slice %24 {offsets = [1, 2, 0], sizes = [1, 1, 128], strides = [1, 1, 1]} : vector<5x5x128xf32> to vector<1x1x128xf32>
    %74 = vector.shape_cast %73 : vector<1x1x128xf32> to vector<128xf32>
    %75 = vector.shape_cast %74 : vector<128xf32> to vector<1x128xf32>
    %76 = vector.broadcast %75 : vector<1x128xf32> to vector<16x128xf32>
    %77 = arith.mulf %72, %76 : vector<16x128xf32>
    %78 = arith.addf %71, %77 : vector<16x128xf32>
    %c7_26 = arith.constant 7 : index
    %c72_27 = arith.constant 72 : index
    %79 = vector.load %arg13[%c7_26, %c72_27] : memref<32x256xf32, #tpu.memory_space<vmem>>, vector<16x128xf32>
    %80 = vector.extract_strided_slice %24 {offsets = [1, 3, 0], sizes = [1, 1, 128], strides = [1, 1, 1]} : vector<5x5x128xf32> to vector<1x1x128xf32>
    %81 = vector.shape_cast %80 : vector<1x1x128xf32> to vector<128xf32>
    %82 = vector.shape_cast %81 : vector<128xf32> to vector<1x128xf32>
    %83 = vector.broadcast %82 : vector<1x128xf32> to vector<16x128xf32>
    %84 = arith.mulf %79, %83 : vector<16x128xf32>
    %85 = arith.addf %78, %84 : vector<16x128xf32>
    %c7_28 = arith.constant 7 : index
    %c80_29 = arith.constant 80 : index
    %86 = vector.load %arg13[%c7_28, %c80_29] : memref<32x256xf32, #tpu.memory_space<vmem>>, vector<16x128xf32>
    %87 = vector.extract_strided_slice %24 {offsets = [1, 4, 0], sizes = [1, 1, 128], strides = [1, 1, 1]} : vector<5x5x128xf32> to vector<1x1x128xf32>
    %88 = vector.shape_cast %87 : vector<1x1x128xf32> to vector<128xf32>
    %89 = vector.shape_cast %88 : vector<128xf32> to vector<1x128xf32>
    %90 = vector.broadcast %89 : vector<1x128xf32> to vector<16x128xf32>
    %91 = arith.mulf %86, %90 : vector<16x128xf32>
    %92 = arith.addf %85, %91 : vector<16x128xf32>
    %c8_30 = arith.constant 8 : index
    %c48_31 = arith.constant 48 : index
    %93 = vector.load %arg13[%c8_30, %c48_31] : memref<32x256xf32, #tpu.memory_space<vmem>>, vector<16x128xf32>
    %94 = vector.extract_strided_slice %24 {offsets = [2, 0, 0], sizes = [1, 1, 128], strides = [1, 1, 1]} : vector<5x5x128xf32> to vector<1x1x128xf32>
    %95 = vector.shape_cast %94 : vector<1x1x128xf32> to vector<128xf32>
    %96 = vector.shape_cast %95 : vector<128xf32> to vector<1x128xf32>
    %97 = vector.broadcast %96 : vector<1x128xf32> to vector<16x128xf32>
    %98 = arith.mulf %93, %97 : vector<16x128xf32>
    %c8_32 = arith.constant 8 : index
    %c56_33 = arith.constant 56 : index
    %99 = vector.load %arg13[%c8_32, %c56_33] : memref<32x256xf32, #tpu.memory_space<vmem>>, vector<16x128xf32>
    %100 = vector.extract_strided_slice %24 {offsets = [2, 1, 0], sizes = [1, 1, 128], strides = [1, 1, 1]} : vector<5x5x128xf32> to vector<1x1x128xf32>
    %101 = vector.shape_cast %100 : vector<1x1x128xf32> to vector<128xf32>
    %102 = vector.shape_cast %101 : vector<128xf32> to vector<1x128xf32>
    %103 = vector.broadcast %102 : vector<1x128xf32> to vector<16x128xf32>
    %104 = arith.mulf %99, %103 : vector<16x128xf32>
    %105 = arith.addf %98, %104 : vector<16x128xf32>
    %c8_34 = arith.constant 8 : index
    %c64_35 = arith.constant 64 : index
    %106 = vector.load %arg13[%c8_34, %c64_35] : memref<32x256xf32, #tpu.memory_space<vmem>>, vector<16x128xf32>
    %107 = vector.extract_strided_slice %24 {offsets = [2, 2, 0], sizes = [1, 1, 128], strides = [1, 1, 1]} : vector<5x5x128xf32> to vector<1x1x128xf32>
    %108 = vector.shape_cast %107 : vector<1x1x128xf32> to vector<128xf32>
    %109 = vector.shape_cast %108 : vector<128xf32> to vector<1x128xf32>
    %110 = vector.broadcast %109 : vector<1x128xf32> to vector<16x128xf32>
    %111 = arith.mulf %106, %110 : vector<16x128xf32>
    %112 = arith.addf %105, %111 : vector<16x128xf32>
    %c8_36 = arith.constant 8 : index
    %c72_37 = arith.constant 72 : index
    %113 = vector.load %arg13[%c8_36, %c72_37] : memref<32x256xf32, #tpu.memory_space<vmem>>, vector<16x128xf32>
    %114 = vector.extract_strided_slice %24 {offsets = [2, 3, 0], sizes = [1, 1, 128], strides = [1, 1, 1]} : vector<5x5x128xf32> to vector<1x1x128xf32>
    %115 = vector.shape_cast %114 : vector<1x1x128xf32> to vector<128xf32>
    %116 = vector.shape_cast %115 : vector<128xf32> to vector<1x128xf32>
    %117 = vector.broadcast %116 : vector<1x128xf32> to vector<16x128xf32>
    %118 = arith.mulf %113, %117 : vector<16x128xf32>
    %119 = arith.addf %112, %118 : vector<16x128xf32>
    %c8_38 = arith.constant 8 : index
    %c80_39 = arith.constant 80 : index
    %120 = vector.load %arg13[%c8_38, %c80_39] : memref<32x256xf32, #tpu.memory_space<vmem>>, vector<16x128xf32>
    %121 = vector.extract_strided_slice %24 {offsets = [2, 4, 0], sizes = [1, 1, 128], strides = [1, 1, 1]} : vector<5x5x128xf32> to vector<1x1x128xf32>
    %122 = vector.shape_cast %121 : vector<1x1x128xf32> to vector<128xf32>
    %123 = vector.shape_cast %122 : vector<128xf32> to vector<1x128xf32>
    %124 = vector.broadcast %123 : vector<1x128xf32> to vector<16x128xf32>
    %125 = arith.mulf %120, %124 : vector<16x128xf32>
    %126 = arith.addf %119, %125 : vector<16x128xf32>
    %c9 = arith.constant 9 : index
    %c48_40 = arith.constant 48 : index
    %127 = vector.load %arg13[%c9, %c48_40] : memref<32x256xf32, #tpu.memory_space<vmem>>, vector<16x128xf32>
    %128 = vector.extract_strided_slice %24 {offsets = [3, 0, 0], sizes = [1, 1, 128], strides = [1, 1, 1]} : vector<5x5x128xf32> to vector<1x1x128xf32>
    %129 = vector.shape_cast %128 : vector<1x1x128xf32> to vector<128xf32>
    %130 = vector.shape_cast %129 : vector<128xf32> to vector<1x128xf32>
    %131 = vector.broadcast %130 : vector<1x128xf32> to vector<16x128xf32>
    %132 = arith.mulf %127, %131 : vector<16x128xf32>
    %c9_41 = arith.constant 9 : index
    %c56_42 = arith.constant 56 : index
    %133 = vector.load %arg13[%c9_41, %c56_42] : memref<32x256xf32, #tpu.memory_space<vmem>>, vector<16x128xf32>
    %134 = vector.extract_strided_slice %24 {offsets = [3, 1, 0], sizes = [1, 1, 128], strides = [1, 1, 1]} : vector<5x5x128xf32> to vector<1x1x128xf32>
    %135 = vector.shape_cast %134 : vector<1x1x128xf32> to vector<128xf32>
    %136 = vector.shape_cast %135 : vector<128xf32> to vector<1x128xf32>
    %137 = vector.broadcast %136 : vector<1x128xf32> to vector<16x128xf32>
    %138 = arith.mulf %133, %137 : vector<16x128xf32>
    %139 = arith.addf %132, %138 : vector<16x128xf32>
    %c9_43 = arith.constant 9 : index
    %c64_44 = arith.constant 64 : index
    %140 = vector.load %arg13[%c9_43, %c64_44] : memref<32x256xf32, #tpu.memory_space<vmem>>, vector<16x128xf32>
    %141 = vector.extract_strided_slice %24 {offsets = [3, 2, 0], sizes = [1, 1, 128], strides = [1, 1, 1]} : vector<5x5x128xf32> to vector<1x1x128xf32>
    %142 = vector.shape_cast %141 : vector<1x1x128xf32> to vector<128xf32>
    %143 = vector.shape_cast %142 : vector<128xf32> to vector<1x128xf32>
    %144 = vector.broadcast %143 : vector<1x128xf32> to vector<16x128xf32>
    %145 = arith.mulf %140, %144 : vector<16x128xf32>
    %146 = arith.addf %139, %145 : vector<16x128xf32>
    %c9_45 = arith.constant 9 : index
    %c72_46 = arith.constant 72 : index
    %147 = vector.load %arg13[%c9_45, %c72_46] : memref<32x256xf32, #tpu.memory_space<vmem>>, vector<16x128xf32>
    %148 = vector.extract_strided_slice %24 {offsets = [3, 3, 0], sizes = [1, 1, 128], strides = [1, 1, 1]} : vector<5x5x128xf32> to vector<1x1x128xf32>
    %149 = vector.shape_cast %148 : vector<1x1x128xf32> to vector<128xf32>
    %150 = vector.shape_cast %149 : vector<128xf32> to vector<1x128xf32>
    %151 = vector.broadcast %150 : vector<1x128xf32> to vector<16x128xf32>
    %152 = arith.mulf %147, %151 : vector<16x128xf32>
    %153 = arith.addf %146, %152 : vector<16x128xf32>
    %c9_47 = arith.constant 9 : index
    %c80_48 = arith.constant 80 : index
    %154 = vector.load %arg13[%c9_47, %c80_48] : memref<32x256xf32, #tpu.memory_space<vmem>>, vector<16x128xf32>
    %155 = vector.extract_strided_slice %24 {offsets = [3, 4, 0], sizes = [1, 1, 128], strides = [1, 1, 1]} : vector<5x5x128xf32> to vector<1x1x128xf32>
    %156 = vector.shape_cast %155 : vector<1x1x128xf32> to vector<128xf32>
    %157 = vector.shape_cast %156 : vector<128xf32> to vector<1x128xf32>
    %158 = vector.broadcast %157 : vector<1x128xf32> to vector<16x128xf32>
    %159 = arith.mulf %154, %158 : vector<16x128xf32>
    %160 = arith.addf %153, %159 : vector<16x128xf32>
    %c10 = arith.constant 10 : index
    %c48_49 = arith.constant 48 : index
    %161 = vector.load %arg13[%c10, %c48_49] : memref<32x256xf32, #tpu.memory_space<vmem>>, vector<16x128xf32>
    %162 = vector.extract_strided_slice %24 {offsets = [4, 0, 0], sizes = [1, 1, 128], strides = [1, 1, 1]} : vector<5x5x128xf32> to vector<1x1x128xf32>
    %163 = vector.shape_cast %162 : vector<1x1x128xf32> to vector<128xf32>
    %164 = vector.shape_cast %163 : vector<128xf32> to vector<1x128xf32>
    %165 = vector.broadcast %164 : vector<1x128xf32> to vector<16x128xf32>
    %166 = arith.mulf %161, %165 : vector<16x128xf32>
    %c10_50 = arith.constant 10 : index
    %c56_51 = arith.constant 56 : index
    %167 = vector.load %arg13[%c10_50, %c56_51] : memref<32x256xf32, #tpu.memory_space<vmem>>, vector<16x128xf32>
    %168 = vector.extract_strided_slice %24 {offsets = [4, 1, 0], sizes = [1, 1, 128], strides = [1, 1, 1]} : vector<5x5x128xf32> to vector<1x1x128xf32>
    %169 = vector.shape_cast %168 : vector<1x1x128xf32> to vector<128xf32>
    %170 = vector.shape_cast %169 : vector<128xf32> to vector<1x128xf32>
    %171 = vector.broadcast %170 : vector<1x128xf32> to vector<16x128xf32>
    %172 = arith.mulf %167, %171 : vector<16x128xf32>
    %173 = arith.addf %166, %172 : vector<16x128xf32>
    %c10_52 = arith.constant 10 : index
    %c64_53 = arith.constant 64 : index
    %174 = vector.load %arg13[%c10_52, %c64_53] : memref<32x256xf32, #tpu.memory_space<vmem>>, vector<16x128xf32>
    %175 = vector.extract_strided_slice %24 {offsets = [4, 2, 0], sizes = [1, 1, 128], strides = [1, 1, 1]} : vector<5x5x128xf32> to vector<1x1x128xf32>
    %176 = vector.shape_cast %175 : vector<1x1x128xf32> to vector<128xf32>
    %177 = vector.shape_cast %176 : vector<128xf32> to vector<1x128xf32>
    %178 = vector.broadcast %177 : vector<1x128xf32> to vector<16x128xf32>
    %179 = arith.mulf %174, %178 : vector<16x128xf32>
    %180 = arith.addf %173, %179 : vector<16x128xf32>
    %c10_54 = arith.constant 10 : index
    %c72_55 = arith.constant 72 : index
    %181 = vector.load %arg13[%c10_54, %c72_55] : memref<32x256xf32, #tpu.memory_space<vmem>>, vector<16x128xf32>
    %182 = vector.extract_strided_slice %24 {offsets = [4, 3, 0], sizes = [1, 1, 128], strides = [1, 1, 1]} : vector<5x5x128xf32> to vector<1x1x128xf32>
    %183 = vector.shape_cast %182 : vector<1x1x128xf32> to vector<128xf32>
    %184 = vector.shape_cast %183 : vector<128xf32> to vector<1x128xf32>
    %185 = vector.broadcast %184 : vector<1x128xf32> to vector<16x128xf32>
    %186 = arith.mulf %181, %185 : vector<16x128xf32>
    %187 = arith.addf %180, %186 : vector<16x128xf32>
    %c10_56 = arith.constant 10 : index
    %c80_57 = arith.constant 80 : index
    %188 = vector.load %arg13[%c10_56, %c80_57] : memref<32x256xf32, #tpu.memory_space<vmem>>, vector<16x128xf32>
    %189 = vector.extract_strided_slice %24 {offsets = [4, 4, 0], sizes = [1, 1, 128], strides = [1, 1, 1]} : vector<5x5x128xf32> to vector<1x1x128xf32>
    %190 = vector.shape_cast %189 : vector<1x1x128xf32> to vector<128xf32>
    %191 = vector.shape_cast %190 : vector<128xf32> to vector<1x128xf32>
    %192 = vector.broadcast %191 : vector<1x128xf32> to vector<16x128xf32>
    %193 = arith.mulf %188, %192 : vector<16x128xf32>
    %194 = arith.addf %187, %193 : vector<16x128xf32>
    %195 = arith.addf %58, %92 : vector<16x128xf32>
    %196 = arith.addf %126, %160 : vector<16x128xf32>
    %197 = arith.addf %195, %196 : vector<16x128xf32>
    %198 = arith.addf %197, %194 : vector<16x128xf32>
    %c8_58 = arith.constant 8 : index
    %c64_59 = arith.constant 64 : index
    %199 = vector.load %arg13[%c8_58, %c64_59] : memref<32x256xf32, #tpu.memory_space<vmem>>, vector<16x128xf32>
    tpu.vector_store %arg13[%c8_58, %c64_59], %198 {strides = array<i32>} : memref<32x256xf32, #tpu.memory_space<vmem>>, vector<16x128xf32>,
    %c0_60 = arith.constant 0 : index
    %c0_61 = arith.constant 0 : index
    %c0_62 = arith.constant 0 : index
    %200 = vector.load %arg8[%c0_60, %c0_61, %c0_62] : memref<5x5x128xf32, #tpu.memory_space<vmem>>, vector<5x5x128xf32>
    %c2 = arith.constant 2 : index
    %c16 = arith.constant 16 : index
    %201 = vector.load %arg13[%c2, %c16] : memref<32x256xf32, #tpu.memory_space<vmem>>, vector<16x128xf32>
    %202 = vector.extract_strided_slice %200 {offsets = [0, 0, 0], sizes = [1, 1, 128], strides = [1, 1, 1]} : vector<5x5x128xf32> to vector<1x1x128xf32>
    %203 = vector.shape_cast %202 : vector<1x1x128xf32> to vector<128xf32>
    %204 = vector.shape_cast %203 : vector<128xf32> to vector<1x128xf32>
    %205 = vector.broadcast %204 : vector<1x128xf32> to vector<16x128xf32>
    %206 = arith.mulf %201, %205 : vector<16x128xf32>
    %c2_63 = arith.constant 2 : index
    %c40 = arith.constant 40 : index
    %207 = vector.load %arg13[%c2_63, %c40] : memref<32x256xf32, #tpu.memory_space<vmem>>, vector<16x128xf32>
    %208 = vector.extract_strided_slice %200 {offsets = [0, 1, 0], sizes = [1, 1, 128], strides = [1, 1, 1]} : vector<5x5x128xf32> to vector<1x1x128xf32>
    %209 = vector.shape_cast %208 : vector<1x1x128xf32> to vector<128xf32>
    %210 = vector.shape_cast %209 : vector<128xf32> to vector<1x128xf32>
    %211 = vector.broadcast %210 : vector<1x128xf32> to vector<16x128xf32>
    %212 = arith.mulf %207, %211 : vector<16x128xf32>
    %213 = arith.addf %206, %212 : vector<16x128xf32>
    %c2_64 = arith.constant 2 : index
    %c64_65 = arith.constant 64 : index
    %214 = vector.load %arg13[%c2_64, %c64_65] : memref<32x256xf32, #tpu.memory_space<vmem>>, vector<16x128xf32>
    %215 = vector.extract_strided_slice %200 {offsets = [0, 2, 0], sizes = [1, 1, 128], strides = [1, 1, 1]} : vector<5x5x128xf32> to vector<1x1x128xf32>
    %216 = vector.shape_cast %215 : vector<1x1x128xf32> to vector<128xf32>
    %217 = vector.shape_cast %216 : vector<128xf32> to vector<1x128xf32>
    %218 = vector.broadcast %217 : vector<1x128xf32> to vector<16x128xf32>
    %219 = arith.mulf %214, %218 : vector<16x128xf32>
    %220 = arith.addf %213, %219 : vector<16x128xf32>
    %c2_66 = arith.constant 2 : index
    %c88 = arith.constant 88 : index
    %221 = vector.load %arg13[%c2_66, %c88] : memref<32x256xf32, #tpu.memory_space<vmem>>, vector<16x128xf32>
    %222 = vector.extract_strided_slice %200 {offsets = [0, 3, 0], sizes = [1, 1, 128], strides = [1, 1, 1]} : vector<5x5x128xf32> to vector<1x1x128xf32>
    %223 = vector.shape_cast %222 : vector<1x1x128xf32> to vector<128xf32>
    %224 = vector.shape_cast %223 : vector<128xf32> to vector<1x128xf32>
    %225 = vector.broadcast %224 : vector<1x128xf32> to vector<16x128xf32>
    %226 = arith.mulf %221, %225 : vector<16x128xf32>
    %227 = arith.addf %220, %226 : vector<16x128xf32>
    %c2_67 = arith.constant 2 : index
    %c112 = arith.constant 112 : index
    %228 = vector.load %arg13[%c2_67, %c112] : memref<32x256xf32, #tpu.memory_space<vmem>>, vector<16x128xf32>
    %229 = vector.extract_strided_slice %200 {offsets = [0, 4, 0], sizes = [1, 1, 128], strides = [1, 1, 1]} : vector<5x5x128xf32> to vector<1x1x128xf32>
    %230 = vector.shape_cast %229 : vector<1x1x128xf32> to vector<128xf32>
    %231 = vector.shape_cast %230 : vector<128xf32> to vector<1x128xf32>
    %232 = vector.broadcast %231 : vector<1x128xf32> to vector<16x128xf32>
    %233 = arith.mulf %228, %232 : vector<16x128xf32>
    %234 = arith.addf %227, %233 : vector<16x128xf32>
    %c5 = arith.constant 5 : index
    %c16_68 = arith.constant 16 : index
    %235 = vector.load %arg13[%c5, %c16_68] : memref<32x256xf32, #tpu.memory_space<vmem>>, vector<16x128xf32>
    %236 = vector.extract_strided_slice %200 {offsets = [1, 0, 0], sizes = [1, 1, 128], strides = [1, 1, 1]} : vector<5x5x128xf32> to vector<1x1x128xf32>
    %237 = vector.shape_cast %236 : vector<1x1x128xf32> to vector<128xf32>
    %238 = vector.shape_cast %237 : vector<128xf32> to vector<1x128xf32>
    %239 = vector.broadcast %238 : vector<1x128xf32> to vector<16x128xf32>
    %240 = arith.mulf %235, %239 : vector<16x128xf32>
    %c5_69 = arith.constant 5 : index
    %c40_70 = arith.constant 40 : index
    %241 = vector.load %arg13[%c5_69, %c40_70] : memref<32x256xf32, #tpu.memory_space<vmem>>, vector<16x128xf32>
    %242 = vector.extract_strided_slice %200 {offsets = [1, 1, 0], sizes = [1, 1, 128], strides = [1, 1, 1]} : vector<5x5x128xf32> to vector<1x1x128xf32>
    %243 = vector.shape_cast %242 : vector<1x1x128xf32> to vector<128xf32>
    %244 = vector.shape_cast %243 : vector<128xf32> to vector<1x128xf32>
    %245 = vector.broadcast %244 : vector<1x128xf32> to vector<16x128xf32>
    %246 = arith.mulf %241, %245 : vector<16x128xf32>
    %247 = arith.addf %240, %246 : vector<16x128xf32>
    %c5_71 = arith.constant 5 : index
    %c64_72 = arith.constant 64 : index
    %248 = vector.load %arg13[%c5_71, %c64_72] : memref<32x256xf32, #tpu.memory_space<vmem>>, vector<16x128xf32>
    %249 = vector.extract_strided_slice %200 {offsets = [1, 2, 0], sizes = [1, 1, 128], strides = [1, 1, 1]} : vector<5x5x128xf32> to vector<1x1x128xf32>
    %250 = vector.shape_cast %249 : vector<1x1x128xf32> to vector<128xf32>
    %251 = vector.shape_cast %250 : vector<128xf32> to vector<1x128xf32>
    %252 = vector.broadcast %251 : vector<1x128xf32> to vector<16x128xf32>
    %253 = arith.mulf %248, %252 : vector<16x128xf32>
    %254 = arith.addf %247, %253 : vector<16x128xf32>
    %c5_73 = arith.constant 5 : index
    %c88_74 = arith.constant 88 : index
    %255 = vector.load %arg13[%c5_73, %c88_74] : memref<32x256xf32, #tpu.memory_space<vmem>>, vector<16x128xf32>
    %256 = vector.extract_strided_slice %200 {offsets = [1, 3, 0], sizes = [1, 1, 128], strides = [1, 1, 1]} : vector<5x5x128xf32> to vector<1x1x128xf32>
    %257 = vector.shape_cast %256 : vector<1x1x128xf32> to vector<128xf32>
    %258 = vector.shape_cast %257 : vector<128xf32> to vector<1x128xf32>
    %259 = vector.broadcast %258 : vector<1x128xf32> to vector<16x128xf32>
    %260 = arith.mulf %255, %259 : vector<16x128xf32>
    %261 = arith.addf %254, %260 : vector<16x128xf32>
    %c5_75 = arith.constant 5 : index
    %c112_76 = arith.constant 112 : index
    %262 = vector.load %arg13[%c5_75, %c112_76] : memref<32x256xf32, #tpu.memory_space<vmem>>, vector<16x128xf32>
    %263 = vector.extract_strided_slice %200 {offsets = [1, 4, 0], sizes = [1, 1, 128], strides = [1, 1, 1]} : vector<5x5x128xf32> to vector<1x1x128xf32>
    %264 = vector.shape_cast %263 : vector<1x1x128xf32> to vector<128xf32>
    %265 = vector.shape_cast %264 : vector<128xf32> to vector<1x128xf32>
    %266 = vector.broadcast %265 : vector<1x128xf32> to vector<16x128xf32>
    %267 = arith.mulf %262, %266 : vector<16x128xf32>
    %268 = arith.addf %261, %267 : vector<16x128xf32>
    %c8_77 = arith.constant 8 : index
    %c16_78 = arith.constant 16 : index
    %269 = vector.load %arg13[%c8_77, %c16_78] : memref<32x256xf32, #tpu.memory_space<vmem>>, vector<16x128xf32>
    %270 = vector.extract_strided_slice %200 {offsets = [2, 0, 0], sizes = [1, 1, 128], strides = [1, 1, 1]} : vector<5x5x128xf32> to vector<1x1x128xf32>
    %271 = vector.shape_cast %270 : vector<1x1x128xf32> to vector<128xf32>
    %272 = vector.shape_cast %271 : vector<128xf32> to vector<1x128xf32>
    %273 = vector.broadcast %272 : vector<1x128xf32> to vector<16x128xf32>
    %274 = arith.mulf %269, %273 : vector<16x128xf32>
    %c8_79 = arith.constant 8 : index
    %c40_80 = arith.constant 40 : index
    %275 = vector.load %arg13[%c8_79, %c40_80] : memref<32x256xf32, #tpu.memory_space<vmem>>, vector<16x128xf32>
    %276 = vector.extract_strided_slice %200 {offsets = [2, 1, 0], sizes = [1, 1, 128], strides = [1, 1, 1]} : vector<5x5x128xf32> to vector<1x1x128xf32>
    %277 = vector.shape_cast %276 : vector<1x1x128xf32> to vector<128xf32>
    %278 = vector.shape_cast %277 : vector<128xf32> to vector<1x128xf32>
    %279 = vector.broadcast %278 : vector<1x128xf32> to vector<16x128xf32>
    %280 = arith.mulf %275, %279 : vector<16x128xf32>
    %281 = arith.addf %274, %280 : vector<16x128xf32>
    %c8_81 = arith.constant 8 : index
    %c64_82 = arith.constant 64 : index
    %282 = vector.load %arg13[%c8_81, %c64_82] : memref<32x256xf32, #tpu.memory_space<vmem>>, vector<16x128xf32>
    %283 = vector.extract_strided_slice %200 {offsets = [2, 2, 0], sizes = [1, 1, 128], strides = [1, 1, 1]} : vector<5x5x128xf32> to vector<1x1x128xf32>
    %284 = vector.shape_cast %283 : vector<1x1x128xf32> to vector<128xf32>
    %285 = vector.shape_cast %284 : vector<128xf32> to vector<1x128xf32>
    %286 = vector.broadcast %285 : vector<1x128xf32> to vector<16x128xf32>
    %287 = arith.mulf %282, %286 : vector<16x128xf32>
    %288 = arith.addf %281, %287 : vector<16x128xf32>
    %c8_83 = arith.constant 8 : index
    %c88_84 = arith.constant 88 : index
    %289 = vector.load %arg13[%c8_83, %c88_84] : memref<32x256xf32, #tpu.memory_space<vmem>>, vector<16x128xf32>
    %290 = vector.extract_strided_slice %200 {offsets = [2, 3, 0], sizes = [1, 1, 128], strides = [1, 1, 1]} : vector<5x5x128xf32> to vector<1x1x128xf32>
    %291 = vector.shape_cast %290 : vector<1x1x128xf32> to vector<128xf32>
    %292 = vector.shape_cast %291 : vector<128xf32> to vector<1x128xf32>
    %293 = vector.broadcast %292 : vector<1x128xf32> to vector<16x128xf32>
    %294 = arith.mulf %289, %293 : vector<16x128xf32>
    %295 = arith.addf %288, %294 : vector<16x128xf32>
    %c8_85 = arith.constant 8 : index
    %c112_86 = arith.constant 112 : index
    %296 = vector.load %arg13[%c8_85, %c112_86] : memref<32x256xf32, #tpu.memory_space<vmem>>, vector<16x128xf32>
    %297 = vector.extract_strided_slice %200 {offsets = [2, 4, 0], sizes = [1, 1, 128], strides = [1, 1, 1]} : vector<5x5x128xf32> to vector<1x1x128xf32>
    %298 = vector.shape_cast %297 : vector<1x1x128xf32> to vector<128xf32>
    %299 = vector.shape_cast %298 : vector<128xf32> to vector<1x128xf32>
    %300 = vector.broadcast %299 : vector<1x128xf32> to vector<16x128xf32>
    %301 = arith.mulf %296, %300 : vector<16x128xf32>
    %302 = arith.addf %295, %301 : vector<16x128xf32>
    %c11 = arith.constant 11 : index
    %c16_87 = arith.constant 16 : index
    %303 = vector.load %arg13[%c11, %c16_87] : memref<32x256xf32, #tpu.memory_space<vmem>>, vector<16x128xf32>
    %304 = vector.extract_strided_slice %200 {offsets = [3, 0, 0], sizes = [1, 1, 128], strides = [1, 1, 1]} : vector<5x5x128xf32> to vector<1x1x128xf32>
    %305 = vector.shape_cast %304 : vector<1x1x128xf32> to vector<128xf32>
    %306 = vector.shape_cast %305 : vector<128xf32> to vector<1x128xf32>
    %307 = vector.broadcast %306 : vector<1x128xf32> to vector<16x128xf32>
    %308 = arith.mulf %303, %307 : vector<16x128xf32>
    %c11_88 = arith.constant 11 : index
    %c40_89 = arith.constant 40 : index
    %309 = vector.load %arg13[%c11_88, %c40_89] : memref<32x256xf32, #tpu.memory_space<vmem>>, vector<16x128xf32>
    %310 = vector.extract_strided_slice %200 {offsets = [3, 1, 0], sizes = [1, 1, 128], strides = [1, 1, 1]} : vector<5x5x128xf32> to vector<1x1x128xf32>
    %311 = vector.shape_cast %310 : vector<1x1x128xf32> to vector<128xf32>
    %312 = vector.shape_cast %311 : vector<128xf32> to vector<1x128xf32>
    %313 = vector.broadcast %312 : vector<1x128xf32> to vector<16x128xf32>
    %314 = arith.mulf %309, %313 : vector<16x128xf32>
    %315 = arith.addf %308, %314 : vector<16x128xf32>
    %c11_90 = arith.constant 11 : index
    %c64_91 = arith.constant 64 : index
    %316 = vector.load %arg13[%c11_90, %c64_91] : memref<32x256xf32, #tpu.memory_space<vmem>>, vector<16x128xf32>
    %317 = vector.extract_strided_slice %200 {offsets = [3, 2, 0], sizes = [1, 1, 128], strides = [1, 1, 1]} : vector<5x5x128xf32> to vector<1x1x128xf32>
    %318 = vector.shape_cast %317 : vector<1x1x128xf32> to vector<128xf32>
    %319 = vector.shape_cast %318 : vector<128xf32> to vector<1x128xf32>
    %320 = vector.broadcast %319 : vector<1x128xf32> to vector<16x128xf32>
    %321 = arith.mulf %316, %320 : vector<16x128xf32>
    %322 = arith.addf %315, %321 : vector<16x128xf32>
    %c11_92 = arith.constant 11 : index
    %c88_93 = arith.constant 88 : index
    %323 = vector.load %arg13[%c11_92, %c88_93] : memref<32x256xf32, #tpu.memory_space<vmem>>, vector<16x128xf32>
    %324 = vector.extract_strided_slice %200 {offsets = [3, 3, 0], sizes = [1, 1, 128], strides = [1, 1, 1]} : vector<5x5x128xf32> to vector<1x1x128xf32>
    %325 = vector.shape_cast %324 : vector<1x1x128xf32> to vector<128xf32>
    %326 = vector.shape_cast %325 : vector<128xf32> to vector<1x128xf32>
    %327 = vector.broadcast %326 : vector<1x128xf32> to vector<16x128xf32>
    %328 = arith.mulf %323, %327 : vector<16x128xf32>
    %329 = arith.addf %322, %328 : vector<16x128xf32>
    %c11_94 = arith.constant 11 : index
    %c112_95 = arith.constant 112 : index
    %330 = vector.load %arg13[%c11_94, %c112_95] : memref<32x256xf32, #tpu.memory_space<vmem>>, vector<16x128xf32>
    %331 = vector.extract_strided_slice %200 {offsets = [3, 4, 0], sizes = [1, 1, 128], strides = [1, 1, 1]} : vector<5x5x128xf32> to vector<1x1x128xf32>
    %332 = vector.shape_cast %331 : vector<1x1x128xf32> to vector<128xf32>
    %333 = vector.shape_cast %332 : vector<128xf32> to vector<1x128xf32>
    %334 = vector.broadcast %333 : vector<1x128xf32> to vector<16x128xf32>
    %335 = arith.mulf %330, %334 : vector<16x128xf32>
    %336 = arith.addf %329, %335 : vector<16x128xf32>
    %c14 = arith.constant 14 : index
    %c16_96 = arith.constant 16 : index
    %337 = vector.load %arg13[%c14, %c16_96] : memref<32x256xf32, #tpu.memory_space<vmem>>, vector<16x128xf32>
    %338 = vector.extract_strided_slice %200 {offsets = [4, 0, 0], sizes = [1, 1, 128], strides = [1, 1, 1]} : vector<5x5x128xf32> to vector<1x1x128xf32>
    %339 = vector.shape_cast %338 : vector<1x1x128xf32> to vector<128xf32>
    %340 = vector.shape_cast %339 : vector<128xf32> to vector<1x128xf32>
    %341 = vector.broadcast %340 : vector<1x128xf32> to vector<16x128xf32>
    %342 = arith.mulf %337, %341 : vector<16x128xf32>
    %c14_97 = arith.constant 14 : index
    %c40_98 = arith.constant 40 : index
    %343 = vector.load %arg13[%c14_97, %c40_98] : memref<32x256xf32, #tpu.memory_space<vmem>>, vector<16x128xf32>
    %344 = vector.extract_strided_slice %200 {offsets = [4, 1, 0], sizes = [1, 1, 128], strides = [1, 1, 1]} : vector<5x5x128xf32> to vector<1x1x128xf32>
    %345 = vector.shape_cast %344 : vector<1x1x128xf32> to vector<128xf32>
    %346 = vector.shape_cast %345 : vector<128xf32> to vector<1x128xf32>
    %347 = vector.broadcast %346 : vector<1x128xf32> to vector<16x128xf32>
    %348 = arith.mulf %343, %347 : vector<16x128xf32>
    %349 = arith.addf %342, %348 : vector<16x128xf32>
    %c14_99 = arith.constant 14 : index
    %c64_100 = arith.constant 64 : index
    %350 = vector.load %arg13[%c14_99, %c64_100] : memref<32x256xf32, #tpu.memory_space<vmem>>, vector<16x128xf32>
    %351 = vector.extract_strided_slice %200 {offsets = [4, 2, 0], sizes = [1, 1, 128], strides = [1, 1, 1]} : vector<5x5x128xf32> to vector<1x1x128xf32>
    %352 = vector.shape_cast %351 : vector<1x1x128xf32> to vector<128xf32>
    %353 = vector.shape_cast %352 : vector<128xf32> to vector<1x128xf32>
    %354 = vector.broadcast %353 : vector<1x128xf32> to vector<16x128xf32>
    %355 = arith.mulf %350, %354 : vector<16x128xf32>
    %356 = arith.addf %349, %355 : vector<16x128xf32>
    %c14_101 = arith.constant 14 : index
    %c88_102 = arith.constant 88 : index
    %357 = vector.load %arg13[%c14_101, %c88_102] : memref<32x256xf32, #tpu.memory_space<vmem>>, vector<16x128xf32>
    %358 = vector.extract_strided_slice %200 {offsets = [4, 3, 0], sizes = [1, 1, 128], strides = [1, 1, 1]} : vector<5x5x128xf32> to vector<1x1x128xf32>
    %359 = vector.shape_cast %358 : vector<1x1x128xf32> to vector<128xf32>
    %360 = vector.shape_cast %359 : vector<128xf32> to vector<1x128xf32>
    %361 = vector.broadcast %360 : vector<1x128xf32> to vector<16x128xf32>
    %362 = arith.mulf %357, %361 : vector<16x128xf32>
    %363 = arith.addf %356, %362 : vector<16x128xf32>
    %c14_103 = arith.constant 14 : index
    %c112_104 = arith.constant 112 : index
    %364 = vector.load %arg13[%c14_103, %c112_104] : memref<32x256xf32, #tpu.memory_space<vmem>>, vector<16x128xf32>
    %365 = vector.extract_strided_slice %200 {offsets = [4, 4, 0], sizes = [1, 1, 128], strides = [1, 1, 1]} : vector<5x5x128xf32> to vector<1x1x128xf32>
    %366 = vector.shape_cast %365 : vector<1x1x128xf32> to vector<128xf32>
    %367 = vector.shape_cast %366 : vector<128xf32> to vector<1x128xf32>
    %368 = vector.broadcast %367 : vector<1x128xf32> to vector<16x128xf32>
    %369 = arith.mulf %364, %368 : vector<16x128xf32>
    %370 = arith.addf %363, %369 : vector<16x128xf32>
    %371 = arith.addf %234, %268 : vector<16x128xf32>
    %372 = arith.addf %302, %336 : vector<16x128xf32>
    %373 = arith.addf %371, %372 : vector<16x128xf32>
    %374 = arith.addf %373, %370 : vector<16x128xf32>
    %c0_105 = arith.constant 0 : index
    %c0_106 = arith.constant 0 : index
    %375 = vector.load %arg10[%c0_105, %c0_106] : memref<128x128xf32, #tpu.memory_space<vmem>>, vector<128x128xf32>
    %cst_107 = arith.constant dense<0.000000e+00> : vector<16x128xf32>
    %376 = tpu.matmul %374, %375, %cst_107 {dimension_numbers = #tpu.dot_dimension_numbers<[1], [0], [0], [1], [0, 0, 1, 1], [], []>} : vector<16x128xf32>, vector<128x128xf32>, vector<16x128xf32> -> vector<16x128xf32>
    %377 = arith.mulf %22, %376 : vector<16x128xf32>
    %cst_108 = arith.constant dense<0.000000e+00> : vector<16x128xf32>
    %378 = tpu.matmul %377, %4, %cst_108 {dimension_numbers = #tpu.dot_dimension_numbers<[1], [0], [0], [1], [0, 0, 1, 1], [], []>} : vector<16x128xf32>, vector<128x128xf32>, vector<16x128xf32> -> vector<16x128xf32>
    %379 = arith.subf %377, %378 : vector<16x128xf32>
    %380 = arith.mulf %379, %379 : vector<16x128xf32>
    %cst_109 = arith.constant dense<0.000000e+00> : vector<16x128xf32>
    %381 = tpu.matmul %380, %4, %cst_109 {dimension_numbers = #tpu.dot_dimension_numbers<[1], [0], [0], [1], [0, 0, 1, 1], [], []>} : vector<16x128xf32>, vector<128x128xf32>, vector<16x128xf32> -> vector<16x128xf32>
    %cst_110 = arith.constant 9.99999997E-7 : f32
    %382 = vector.broadcast %cst_110 : f32 to vector<16x128xf32>
    %383 = arith.addf %381, %382 : vector<16x128xf32>
    %384 = math.rsqrt %383 : vector<16x128xf32>
    %385 = arith.mulf %379, %384 : vector<16x128xf32>
    %c0_111 = arith.constant 0 : index
    %c0_112 = arith.constant 0 : index
    %386 = vector.load %arg4[%c0_111, %c0_112] : memref<1x128xf32, #tpu.memory_space<vmem>>, vector<1x128xf32>
    %387 = vector.shape_cast %386 : vector<1x128xf32> to vector<128xf32>
    %388 = vector.shape_cast %387 : vector<128xf32> to vector<1x128xf32>
    %389 = vector.broadcast %388 : vector<1x128xf32> to vector<16x128xf32>
    %390 = arith.mulf %385, %389 : vector<16x128xf32>
    %c0_113 = arith.constant 0 : index
    %c0_114 = arith.constant 0 : index
    %391 = vector.load %arg5[%c0_113, %c0_114] : memref<1x128xf32, #tpu.memory_space<vmem>>, vector<1x128xf32>
    %392 = vector.shape_cast %391 : vector<1x128xf32> to vector<128xf32>
    %393 = vector.shape_cast %392 : vector<128xf32> to vector<1x128xf32>
    %394 = vector.broadcast %393 : vector<1x128xf32> to vector<16x128xf32>
    %395 = arith.addf %390, %394 : vector<16x128xf32>
    %c8_115 = arith.constant 8 : index
    %c64_116 = arith.constant 64 : index
    %396 = vector.load %arg13[%c8_115, %c64_116] : memref<32x256xf32, #tpu.memory_space<vmem>>, vector<16x128xf32>
    tpu.vector_store %arg13[%c8_115, %c64_116], %395 {strides = array<i32>} : memref<32x256xf32, #tpu.memory_space<vmem>>, vector<16x128xf32>,
    %c0_117 = arith.constant 0 : index
    %c0_118 = arith.constant 0 : index
    %c0_119 = arith.constant 0 : index
    %397 = vector.load %arg9[%c0_117, %c0_118, %c0_119] : memref<5x5x128xf32, #tpu.memory_space<vmem>>, vector<5x5x128xf32>
    %c6_120 = arith.constant 6 : index
    %c48_121 = arith.constant 48 : index
    %398 = vector.load %arg13[%c6_120, %c48_121] : memref<32x256xf32, #tpu.memory_space<vmem>>, vector<16x128xf32>
    %399 = vector.extract_strided_slice %397 {offsets = [0, 0, 0], sizes = [1, 1, 128], strides = [1, 1, 1]} : vector<5x5x128xf32> to vector<1x1x128xf32>
    %400 = vector.shape_cast %399 : vector<1x1x128xf32> to vector<128xf32>
    %401 = vector.shape_cast %400 : vector<128xf32> to vector<1x128xf32>
    %402 = vector.broadcast %401 : vector<1x128xf32> to vector<16x128xf32>
    %403 = arith.mulf %398, %402 : vector<16x128xf32>
    %c6_122 = arith.constant 6 : index
    %c56_123 = arith.constant 56 : index
    %404 = vector.load %arg13[%c6_122, %c56_123] : memref<32x256xf32, #tpu.memory_space<vmem>>, vector<16x128xf32>
    %405 = vector.extract_strided_slice %397 {offsets = [0, 1, 0], sizes = [1, 1, 128], strides = [1, 1, 1]} : vector<5x5x128xf32> to vector<1x1x128xf32>
    %406 = vector.shape_cast %405 : vector<1x1x128xf32> to vector<128xf32>
    %407 = vector.shape_cast %406 : vector<128xf32> to vector<1x128xf32>
    %408 = vector.broadcast %407 : vector<1x128xf32> to vector<16x128xf32>
    %409 = arith.mulf %404, %408 : vector<16x128xf32>
    %410 = arith.addf %403, %409 : vector<16x128xf32>
    %c6_124 = arith.constant 6 : index
    %c64_125 = arith.constant 64 : index
    %411 = vector.load %arg13[%c6_124, %c64_125] : memref<32x256xf32, #tpu.memory_space<vmem>>, vector<16x128xf32>
    %412 = vector.extract_strided_slice %397 {offsets = [0, 2, 0], sizes = [1, 1, 128], strides = [1, 1, 1]} : vector<5x5x128xf32> to vector<1x1x128xf32>
    %413 = vector.shape_cast %412 : vector<1x1x128xf32> to vector<128xf32>
    %414 = vector.shape_cast %413 : vector<128xf32> to vector<1x128xf32>
    %415 = vector.broadcast %414 : vector<1x128xf32> to vector<16x128xf32>
    %416 = arith.mulf %411, %415 : vector<16x128xf32>
    %417 = arith.addf %410, %416 : vector<16x128xf32>
    %c6_126 = arith.constant 6 : index
    %c72_127 = arith.constant 72 : index
    %418 = vector.load %arg13[%c6_126, %c72_127] : memref<32x256xf32, #tpu.memory_space<vmem>>, vector<16x128xf32>
    %419 = vector.extract_strided_slice %397 {offsets = [0, 3, 0], sizes = [1, 1, 128], strides = [1, 1, 1]} : vector<5x5x128xf32> to vector<1x1x128xf32>
    %420 = vector.shape_cast %419 : vector<1x1x128xf32> to vector<128xf32>
    %421 = vector.shape_cast %420 : vector<128xf32> to vector<1x128xf32>
    %422 = vector.broadcast %421 : vector<1x128xf32> to vector<16x128xf32>
    %423 = arith.mulf %418, %422 : vector<16x128xf32>
    %424 = arith.addf %417, %423 : vector<16x128xf32>
    %c6_128 = arith.constant 6 : index
    %c80_129 = arith.constant 80 : index
    %425 = vector.load %arg13[%c6_128, %c80_129] : memref<32x256xf32, #tpu.memory_space<vmem>>, vector<16x128xf32>
    %426 = vector.extract_strided_slice %397 {offsets = [0, 4, 0], sizes = [1, 1, 128], strides = [1, 1, 1]} : vector<5x5x128xf32> to vector<1x1x128xf32>
    %427 = vector.shape_cast %426 : vector<1x1x128xf32> to vector<128xf32>
    %428 = vector.shape_cast %427 : vector<128xf32> to vector<1x128xf32>
    %429 = vector.broadcast %428 : vector<1x128xf32> to vector<16x128xf32>
    %430 = arith.mulf %425, %429 : vector<16x128xf32>
    %431 = arith.addf %424, %430 : vector<16x128xf32>
    %c7_130 = arith.constant 7 : index
    %c48_131 = arith.constant 48 : index
    %432 = vector.load %arg13[%c7_130, %c48_131] : memref<32x256xf32, #tpu.memory_space<vmem>>, vector<16x128xf32>
    %433 = vector.extract_strided_slice %397 {offsets = [1, 0, 0], sizes = [1, 1, 128], strides = [1, 1, 1]} : vector<5x5x128xf32> to vector<1x1x128xf32>
    %434 = vector.shape_cast %433 : vector<1x1x128xf32> to vector<128xf32>
    %435 = vector.shape_cast %434 : vector<128xf32> to vector<1x128xf32>
    %436 = vector.broadcast %435 : vector<1x128xf32> to vector<16x128xf32>
    %437 = arith.mulf %432, %436 : vector<16x128xf32>
    %c7_132 = arith.constant 7 : index
    %c56_133 = arith.constant 56 : index
    %438 = vector.load %arg13[%c7_132, %c56_133] : memref<32x256xf32, #tpu.memory_space<vmem>>, vector<16x128xf32>
    %439 = vector.extract_strided_slice %397 {offsets = [1, 1, 0], sizes = [1, 1, 128], strides = [1, 1, 1]} : vector<5x5x128xf32> to vector<1x1x128xf32>
    %440 = vector.shape_cast %439 : vector<1x1x128xf32> to vector<128xf32>
    %441 = vector.shape_cast %440 : vector<128xf32> to vector<1x128xf32>
    %442 = vector.broadcast %441 : vector<1x128xf32> to vector<16x128xf32>
    %443 = arith.mulf %438, %442 : vector<16x128xf32>
    %444 = arith.addf %437, %443 : vector<16x128xf32>
    %c7_134 = arith.constant 7 : index
    %c64_135 = arith.constant 64 : index
    %445 = vector.load %arg13[%c7_134, %c64_135] : memref<32x256xf32, #tpu.memory_space<vmem>>, vector<16x128xf32>
    %446 = vector.extract_strided_slice %397 {offsets = [1, 2, 0], sizes = [1, 1, 128], strides = [1, 1, 1]} : vector<5x5x128xf32> to vector<1x1x128xf32>
    %447 = vector.shape_cast %446 : vector<1x1x128xf32> to vector<128xf32>
    %448 = vector.shape_cast %447 : vector<128xf32> to vector<1x128xf32>
    %449 = vector.broadcast %448 : vector<1x128xf32> to vector<16x128xf32>
    %450 = arith.mulf %445, %449 : vector<16x128xf32>
    %451 = arith.addf %444, %450 : vector<16x128xf32>
    %c7_136 = arith.constant 7 : index
    %c72_137 = arith.constant 72 : index
    %452 = vector.load %arg13[%c7_136, %c72_137] : memref<32x256xf32, #tpu.memory_space<vmem>>, vector<16x128xf32>
    %453 = vector.extract_strided_slice %397 {offsets = [1, 3, 0], sizes = [1, 1, 128], strides = [1, 1, 1]} : vector<5x5x128xf32> to vector<1x1x128xf32>
    %454 = vector.shape_cast %453 : vector<1x1x128xf32> to vector<128xf32>
    %455 = vector.shape_cast %454 : vector<128xf32> to vector<1x128xf32>
    %456 = vector.broadcast %455 : vector<1x128xf32> to vector<16x128xf32>
    %457 = arith.mulf %452, %456 : vector<16x128xf32>
    %458 = arith.addf %451, %457 : vector<16x128xf32>
    %c7_138 = arith.constant 7 : index
    %c80_139 = arith.constant 80 : index
    %459 = vector.load %arg13[%c7_138, %c80_139] : memref<32x256xf32, #tpu.memory_space<vmem>>, vector<16x128xf32>
    %460 = vector.extract_strided_slice %397 {offsets = [1, 4, 0], sizes = [1, 1, 128], strides = [1, 1, 1]} : vector<5x5x128xf32> to vector<1x1x128xf32>
    %461 = vector.shape_cast %460 : vector<1x1x128xf32> to vector<128xf32>
    %462 = vector.shape_cast %461 : vector<128xf32> to vector<1x128xf32>
    %463 = vector.broadcast %462 : vector<1x128xf32> to vector<16x128xf32>
    %464 = arith.mulf %459, %463 : vector<16x128xf32>
    %465 = arith.addf %458, %464 : vector<16x128xf32>
    %c8_140 = arith.constant 8 : index
    %c48_141 = arith.constant 48 : index
    %466 = vector.load %arg13[%c8_140, %c48_141] : memref<32x256xf32, #tpu.memory_space<vmem>>, vector<16x128xf32>
    %467 = vector.extract_strided_slice %397 {offsets = [2, 0, 0], sizes = [1, 1, 128], strides = [1, 1, 1]} : vector<5x5x128xf32> to vector<1x1x128xf32>
    %468 = vector.shape_cast %467 : vector<1x1x128xf32> to vector<128xf32>
    %469 = vector.shape_cast %468 : vector<128xf32> to vector<1x128xf32>
    %470 = vector.broadcast %469 : vector<1x128xf32> to vector<16x128xf32>
    %471 = arith.mulf %466, %470 : vector<16x128xf32>
    %c8_142 = arith.constant 8 : index
    %c56_143 = arith.constant 56 : index
    %472 = vector.load %arg13[%c8_142, %c56_143] : memref<32x256xf32, #tpu.memory_space<vmem>>, vector<16x128xf32>
    %473 = vector.extract_strided_slice %397 {offsets = [2, 1, 0], sizes = [1, 1, 128], strides = [1, 1, 1]} : vector<5x5x128xf32> to vector<1x1x128xf32>
    %474 = vector.shape_cast %473 : vector<1x1x128xf32> to vector<128xf32>
    %475 = vector.shape_cast %474 : vector<128xf32> to vector<1x128xf32>
    %476 = vector.broadcast %475 : vector<1x128xf32> to vector<16x128xf32>
    %477 = arith.mulf %472, %476 : vector<16x128xf32>
    %478 = arith.addf %471, %477 : vector<16x128xf32>
    %c8_144 = arith.constant 8 : index
    %c64_145 = arith.constant 64 : index
    %479 = vector.load %arg13[%c8_144, %c64_145] : memref<32x256xf32, #tpu.memory_space<vmem>>, vector<16x128xf32>
    %480 = vector.extract_strided_slice %397 {offsets = [2, 2, 0], sizes = [1, 1, 128], strides = [1, 1, 1]} : vector<5x5x128xf32> to vector<1x1x128xf32>
    %481 = vector.shape_cast %480 : vector<1x1x128xf32> to vector<128xf32>
    %482 = vector.shape_cast %481 : vector<128xf32> to vector<1x128xf32>
    %483 = vector.broadcast %482 : vector<1x128xf32> to vector<16x128xf32>
    %484 = arith.mulf %479, %483 : vector<16x128xf32>
    %485 = arith.addf %478, %484 : vector<16x128xf32>
    %c8_146 = arith.constant 8 : index
    %c72_147 = arith.constant 72 : index
    %486 = vector.load %arg13[%c8_146, %c72_147] : memref<32x256xf32, #tpu.memory_space<vmem>>, vector<16x128xf32>
    %487 = vector.extract_strided_slice %397 {offsets = [2, 3, 0], sizes = [1, 1, 128], strides = [1, 1, 1]} : vector<5x5x128xf32> to vector<1x1x128xf32>
    %488 = vector.shape_cast %487 : vector<1x1x128xf32> to vector<128xf32>
    %489 = vector.shape_cast %488 : vector<128xf32> to vector<1x128xf32>
    %490 = vector.broadcast %489 : vector<1x128xf32> to vector<16x128xf32>
    %491 = arith.mulf %486, %490 : vector<16x128xf32>
    %492 = arith.addf %485, %491 : vector<16x128xf32>
    %c8_148 = arith.constant 8 : index
    %c80_149 = arith.constant 80 : index
    %493 = vector.load %arg13[%c8_148, %c80_149] : memref<32x256xf32, #tpu.memory_space<vmem>>, vector<16x128xf32>
    %494 = vector.extract_strided_slice %397 {offsets = [2, 4, 0], sizes = [1, 1, 128], strides = [1, 1, 1]} : vector<5x5x128xf32> to vector<1x1x128xf32>
    %495 = vector.shape_cast %494 : vector<1x1x128xf32> to vector<128xf32>
    %496 = vector.shape_cast %495 : vector<128xf32> to vector<1x128xf32>
    %497 = vector.broadcast %496 : vector<1x128xf32> to vector<16x128xf32>
    %498 = arith.mulf %493, %497 : vector<16x128xf32>
    %499 = arith.addf %492, %498 : vector<16x128xf32>
    %c9_150 = arith.constant 9 : index
    %c48_151 = arith.constant 48 : index
    %500 = vector.load %arg13[%c9_150, %c48_151] : memref<32x256xf32, #tpu.memory_space<vmem>>, vector<16x128xf32>
    %501 = vector.extract_strided_slice %397 {offsets = [3, 0, 0], sizes = [1, 1, 128], strides = [1, 1, 1]} : vector<5x5x128xf32> to vector<1x1x128xf32>
    %502 = vector.shape_cast %501 : vector<1x1x128xf32> to vector<128xf32>
    %503 = vector.shape_cast %502 : vector<128xf32> to vector<1x128xf32>
    %504 = vector.broadcast %503 : vector<1x128xf32> to vector<16x128xf32>
    %505 = arith.mulf %500, %504 : vector<16x128xf32>
    %c9_152 = arith.constant 9 : index
    %c56_153 = arith.constant 56 : index
    %506 = vector.load %arg13[%c9_152, %c56_153] : memref<32x256xf32, #tpu.memory_space<vmem>>, vector<16x128xf32>
    %507 = vector.extract_strided_slice %397 {offsets = [3, 1, 0], sizes = [1, 1, 128], strides = [1, 1, 1]} : vector<5x5x128xf32> to vector<1x1x128xf32>
    %508 = vector.shape_cast %507 : vector<1x1x128xf32> to vector<128xf32>
    %509 = vector.shape_cast %508 : vector<128xf32> to vector<1x128xf32>
    %510 = vector.broadcast %509 : vector<1x128xf32> to vector<16x128xf32>
    %511 = arith.mulf %506, %510 : vector<16x128xf32>
    %512 = arith.addf %505, %511 : vector<16x128xf32>
    %c9_154 = arith.constant 9 : index
    %c64_155 = arith.constant 64 : index
    %513 = vector.load %arg13[%c9_154, %c64_155] : memref<32x256xf32, #tpu.memory_space<vmem>>, vector<16x128xf32>
    %514 = vector.extract_strided_slice %397 {offsets = [3, 2, 0], sizes = [1, 1, 128], strides = [1, 1, 1]} : vector<5x5x128xf32> to vector<1x1x128xf32>
    %515 = vector.shape_cast %514 : vector<1x1x128xf32> to vector<128xf32>
    %516 = vector.shape_cast %515 : vector<128xf32> to vector<1x128xf32>
    %517 = vector.broadcast %516 : vector<1x128xf32> to vector<16x128xf32>
    %518 = arith.mulf %513, %517 : vector<16x128xf32>
    %519 = arith.addf %512, %518 : vector<16x128xf32>
    %c9_156 = arith.constant 9 : index
    %c72_157 = arith.constant 72 : index
    %520 = vector.load %arg13[%c9_156, %c72_157] : memref<32x256xf32, #tpu.memory_space<vmem>>, vector<16x128xf32>
    %521 = vector.extract_strided_slice %397 {offsets = [3, 3, 0], sizes = [1, 1, 128], strides = [1, 1, 1]} : vector<5x5x128xf32> to vector<1x1x128xf32>
    %522 = vector.shape_cast %521 : vector<1x1x128xf32> to vector<128xf32>
    %523 = vector.shape_cast %522 : vector<128xf32> to vector<1x128xf32>
    %524 = vector.broadcast %523 : vector<1x128xf32> to vector<16x128xf32>
    %525 = arith.mulf %520, %524 : vector<16x128xf32>
    %526 = arith.addf %519, %525 : vector<16x128xf32>
    %c9_158 = arith.constant 9 : index
    %c80_159 = arith.constant 80 : index
    %527 = vector.load %arg13[%c9_158, %c80_159] : memref<32x256xf32, #tpu.memory_space<vmem>>, vector<16x128xf32>
    %528 = vector.extract_strided_slice %397 {offsets = [3, 4, 0], sizes = [1, 1, 128], strides = [1, 1, 1]} : vector<5x5x128xf32> to vector<1x1x128xf32>
    %529 = vector.shape_cast %528 : vector<1x1x128xf32> to vector<128xf32>
    %530 = vector.shape_cast %529 : vector<128xf32> to vector<1x128xf32>
    %531 = vector.broadcast %530 : vector<1x128xf32> to vector<16x128xf32>
    %532 = arith.mulf %527, %531 : vector<16x128xf32>
    %533 = arith.addf %526, %532 : vector<16x128xf32>
    %c10_160 = arith.constant 10 : index
    %c48_161 = arith.constant 48 : index
    %534 = vector.load %arg13[%c10_160, %c48_161] : memref<32x256xf32, #tpu.memory_space<vmem>>, vector<16x128xf32>
    %535 = vector.extract_strided_slice %397 {offsets = [4, 0, 0], sizes = [1, 1, 128], strides = [1, 1, 1]} : vector<5x5x128xf32> to vector<1x1x128xf32>
    %536 = vector.shape_cast %535 : vector<1x1x128xf32> to vector<128xf32>
    %537 = vector.shape_cast %536 : vector<128xf32> to vector<1x128xf32>
    %538 = vector.broadcast %537 : vector<1x128xf32> to vector<16x128xf32>
    %539 = arith.mulf %534, %538 : vector<16x128xf32>
    %c10_162 = arith.constant 10 : index
    %c56_163 = arith.constant 56 : index
    %540 = vector.load %arg13[%c10_162, %c56_163] : memref<32x256xf32, #tpu.memory_space<vmem>>, vector<16x128xf32>
    %541 = vector.extract_strided_slice %397 {offsets = [4, 1, 0], sizes = [1, 1, 128], strides = [1, 1, 1]} : vector<5x5x128xf32> to vector<1x1x128xf32>
    %542 = vector.shape_cast %541 : vector<1x1x128xf32> to vector<128xf32>
    %543 = vector.shape_cast %542 : vector<128xf32> to vector<1x128xf32>
    %544 = vector.broadcast %543 : vector<1x128xf32> to vector<16x128xf32>
    %545 = arith.mulf %540, %544 : vector<16x128xf32>
    %546 = arith.addf %539, %545 : vector<16x128xf32>
    %c10_164 = arith.constant 10 : index
    %c64_165 = arith.constant 64 : index
    %547 = vector.load %arg13[%c10_164, %c64_165] : memref<32x256xf32, #tpu.memory_space<vmem>>, vector<16x128xf32>
    %548 = vector.extract_strided_slice %397 {offsets = [4, 2, 0], sizes = [1, 1, 128], strides = [1, 1, 1]} : vector<5x5x128xf32> to vector<1x1x128xf32>
    %549 = vector.shape_cast %548 : vector<1x1x128xf32> to vector<128xf32>
    %550 = vector.shape_cast %549 : vector<128xf32> to vector<1x128xf32>
    %551 = vector.broadcast %550 : vector<1x128xf32> to vector<16x128xf32>
    %552 = arith.mulf %547, %551 : vector<16x128xf32>
    %553 = arith.addf %546, %552 : vector<16x128xf32>
    %c10_166 = arith.constant 10 : index
    %c72_167 = arith.constant 72 : index
    %554 = vector.load %arg13[%c10_166, %c72_167] : memref<32x256xf32, #tpu.memory_space<vmem>>, vector<16x128xf32>
    %555 = vector.extract_strided_slice %397 {offsets = [4, 3, 0], sizes = [1, 1, 128], strides = [1, 1, 1]} : vector<5x5x128xf32> to vector<1x1x128xf32>
    %556 = vector.shape_cast %555 : vector<1x1x128xf32> to vector<128xf32>
    %557 = vector.shape_cast %556 : vector<128xf32> to vector<1x128xf32>
    %558 = vector.broadcast %557 : vector<1x128xf32> to vector<16x128xf32>
    %559 = arith.mulf %554, %558 : vector<16x128xf32>
    %560 = arith.addf %553, %559 : vector<16x128xf32>
    %c10_168 = arith.constant 10 : index
    %c80_169 = arith.constant 80 : index
    %561 = vector.load %arg13[%c10_168, %c80_169] : memref<32x256xf32, #tpu.memory_space<vmem>>, vector<16x128xf32>
    %562 = vector.extract_strided_slice %397 {offsets = [4, 4, 0], sizes = [1, 1, 128], strides = [1, 1, 1]} : vector<5x5x128xf32> to vector<1x1x128xf32>
    %563 = vector.shape_cast %562 : vector<1x1x128xf32> to vector<128xf32>
    %564 = vector.shape_cast %563 : vector<128xf32> to vector<1x128xf32>
    %565 = vector.broadcast %564 : vector<1x128xf32> to vector<16x128xf32>
    %566 = arith.mulf %561, %565 : vector<16x128xf32>
    %567 = arith.addf %560, %566 : vector<16x128xf32>
    %568 = arith.addf %431, %465 : vector<16x128xf32>
    %569 = arith.addf %499, %533 : vector<16x128xf32>
    %570 = arith.addf %568, %569 : vector<16x128xf32>
    %571 = arith.addf %570, %567 : vector<16x128xf32>
    %c0_170 = arith.constant 0 : index
    %c0_171 = arith.constant 0 : index
    %572 = vector.load %arg11[%c0_170, %c0_171] : memref<128x128xf32, #tpu.memory_space<vmem>>, vector<128x128xf32>
    %cst_172 = arith.constant dense<0.000000e+00> : vector<16x128xf32>
    %573 = tpu.matmul %571, %572, %cst_172 {dimension_numbers = #tpu.dot_dimension_numbers<[1], [0], [0], [1], [0, 0, 1, 1], [], []>} : vector<16x128xf32>, vector<128x128xf32>, vector<16x128xf32> -> vector<16x128xf32>
    %cst_173 = arith.constant 0.000000e+00 : f32
    %574 = vector.broadcast %cst_173 : f32 to vector<16x128xf32>
    %575 = arith.cmpf oge, %573, %574 : vector<16x128xf32>
    %cst_174 = arith.constant 0.00999999977 : f32
    %576 = vector.broadcast %cst_174 : f32 to vector<16x128xf32>
    %577 = arith.mulf %576, %573 : vector<16x128xf32>
    %578 = arith.select %575, %573, %577 : vector<16x128xi1>, vector<16x128xf32>
    %579 = arith.addf %578, %3 : vector<16x128xf32>
    %c0_175 = arith.constant 0 : index
    %c0_176 = arith.constant 0 : index
    %c0_177 = arith.constant 0 : index
    %580 = vector.load %arg12[%c0_175, %c0_176, %c0_177] : memref<1x16x128xf32, #tpu.memory_space<vmem>>, vector<1x16x128xf32>
    %581 = vector.shape_cast %580 : vector<1x16x128xf32> to vector<16x128xf32>
    %582 = vector.shape_cast %579 : vector<16x128xf32> to vector<1x16x128xf32>
    tpu.vector_store %arg12[%c0_175, %c0_176, %c0_177], %582 {strides = array<i32>} : memref<1x16x128xf32, #tpu.memory_space<vmem>>, vector<1x16x128xf32>,
    return
  }
  func.func @transform_0(%arg0: i32) -> (i32, i32, i32) {
    %c0_i32 = arith.constant 0 : i32
    %c0_i32_0 = arith.constant 0 : i32
    %c0_i32_1 = arith.constant 0 : i32
    return %arg0, %c0_i32, %c0_i32_0 : i32, i32, i32
  }
  func.func @transform_1(%arg0: i32) -> (i32, i32) {
    %c0_i32 = arith.constant 0 : i32
    %c0_i32_0 = arith.constant 0 : i32
    %c0_i32_1 = arith.constant 0 : i32
    return %c0_i32, %c0_i32_0 : i32, i32
  }
  func.func @transform_2(%arg0: i32) -> (i32, i32) {
    %c0_i32 = arith.constant 0 : i32
    %c0_i32_0 = arith.constant 0 : i32
    %c0_i32_1 = arith.constant 0 : i32
    return %c0_i32, %c0_i32_0 : i32, i32
  }
  func.func @transform_3(%arg0: i32) -> (i32, i32) {
    %c0_i32 = arith.constant 0 : i32
    %c0_i32_0 = arith.constant 0 : i32
    %c0_i32_1 = arith.constant 0 : i32
    return %c0_i32, %c0_i32_0 : i32, i32
  }
  func.func @transform_4(%arg0: i32) -> (i32, i32) {
    %c0_i32 = arith.constant 0 : i32
    %c0_i32_0 = arith.constant 0 : i32
    %c0_i32_1 = arith.constant 0 : i32
    return %c0_i32, %c0_i32_0 : i32, i32
  }
  func.func @transform_5(%arg0: i32) -> (i32, i32) {
    %c0_i32 = arith.constant 0 : i32
    %c0_i32_0 = arith.constant 0 : i32
    %c0_i32_1 = arith.constant 0 : i32
    return %c0_i32, %c0_i32_0 : i32, i32
  }
  func.func @transform_6(%arg0: i32) -> (i32, i32, i32) {
    %c0_i32 = arith.constant 0 : i32
    %c0_i32_0 = arith.constant 0 : i32
    %c0_i32_1 = arith.constant 0 : i32
    %c0_i32_2 = arith.constant 0 : i32
    return %c0_i32, %c0_i32_0, %c0_i32_1 : i32, i32, i32
  }
  func.func @transform_7(%arg0: i32) -> (i32, i32, i32) {
    %c0_i32 = arith.constant 0 : i32
    %c0_i32_0 = arith.constant 0 : i32
    %c0_i32_1 = arith.constant 0 : i32
    %c0_i32_2 = arith.constant 0 : i32
    return %c0_i32, %c0_i32_0, %c0_i32_1 : i32, i32, i32
  }
  func.func @transform_8(%arg0: i32) -> (i32, i32, i32) {
    %c0_i32 = arith.constant 0 : i32
    %c0_i32_0 = arith.constant 0 : i32
    %c0_i32_1 = arith.constant 0 : i32
    %c0_i32_2 = arith.constant 0 : i32
    return %c0_i32, %c0_i32_0, %c0_i32_1 : i32, i32, i32
  }
  func.func @transform_9(%arg0: i32) -> (i32, i32) {
    %c0_i32 = arith.constant 0 : i32
    %c0_i32_0 = arith.constant 0 : i32
    %c0_i32_1 = arith.constant 0 : i32
    return %c0_i32, %c0_i32_0 : i32, i32
  }
  func.func @transform_10(%arg0: i32) -> (i32, i32) {
    %c0_i32 = arith.constant 0 : i32
    %c0_i32_0 = arith.constant 0 : i32
    %c0_i32_1 = arith.constant 0 : i32
    return %c0_i32, %c0_i32_0 : i32, i32
  }
  func.func @transform_11(%arg0: i32) -> (i32, i32, i32) {
    %c0_i32 = arith.constant 0 : i32
    %c0_i32_0 = arith.constant 0 : i32
    %c0_i32_1 = arith.constant 0 : i32
    return %arg0, %c0_i32, %c0_i32_0 : i32, i32, i32
  }
}

</mosaic_0001>

<bundles_post_ra>
// kernel: tpu_custom_call.1
= control target key start
LH: loop header
LB: loop body
LE: loop exit
PB: predicated region body
PF: predicated region fallthrough
CT: control target
= control target key end

     0   :  { %s8950_s0 = inlined_call_operand.hbm [shape: f32[2,16,128], index: 0, kind: input, shape index: {}]   ;;  %s8951_s1 = inlined_call_operand.vmem [shape: f32[1,128], index: 1, kind: input, shape index: {}]   ;;  %s8952_s2 = inlined_call_operand.vmem [shape: f32[1,128], index: 2, kind: input, shape index: {}]   ;;  %s8953_s3 = inlined_call_operand.vmem [shape: f32[1,128], index: 3, kind: input, shape index: {}]   ;;  %s8954_s4 = inlined_call_operand.vmem [shape: f32[1,128], index: 4, kind: input, shape index: {}]   ;;  %s8955_s5 = inlined_call_operand.hbm [shape: f32[128,128], index: 5, kind: input, shape index: {}]   ;;  %s8956_s6 = inlined_call_operand.hbm [shape: f32[5,5,128], index: 6, kind: input, shape index: {}]   ;;  %s8957_s7 = inlined_call_operand.hbm [shape: f32[5,5,128], index: 7, kind: input, shape index: {}]   ;;  %s8958_s8 = inlined_call_operand.hbm [shape: f32[5,5,128], index: 8, kind: input, shape index: {}]   ;;  %s8959_s9 = inlined_call_operand.hbm [shape: f32[128,128], index: 9, kind: input, shape index: {}]   ;;  %s8960_s10 = inlined_call_operand.hbm [shape: f32[128,128], index: 10, kind: input, shape index: {}]   ;;  %s8961_s11 = inlined_call_operand.hbm [shape: f32[2,16,128], index: 11, kind: output, shape index: {}]  }
   0x1   :  { %9096 = sst [smem:[#allocation112_spill]] %s8953_s3 }
   0x2   :  { %9097 = sst [smem:[#allocation113_spill]] %s8954_s4 }
   0x3   :  { %9098 = sst [smem:[#allocation114_spill]] %s8955_s5 }
   0x4   :  { %9099 = sst [smem:[#allocation115_spill]] %s8961_s11 }
   0x5   :  { %16 = vsyncpa [#allocation4], 0 }
   0x6   :  { %18 = vsyncpa [#allocation4 + $0x1], 0 }
   0x7   :  { %19 = vsyncpa [#allocation7], 0 }
   0x8   :  { %20 = vsyncpa [#allocation10], 0 }
   0x9   :  { %21 = vsyncpa [#allocation13], 0 }
   0xa   :  { %22 = vsyncpa [#allocation5], 0 }
   0xb   :  { %24 = vsyncpa [#allocation5 + $0x1], 0  ;;  %s5669_s17 = smov 0   ;;  %s5671_s18 = smov 0  }
   0xc   :  { %s5673_s19 = smov 0   ;;  %s5675_s20 = smov 0  }
   0xd LB: > { %s5583_s21 = smov [#allocation6]   ;;  %s5690_s23 = sadd.s32 4294967295, %s5581_s20   ;;  %s5581_s20 = sphi %s5675_s20, %s9425_s20   ;;  %s5577_s19 = sphi %s5673_s19, %s9424_s19   ;;  %s5573_s18 = sphi %s5671_s18, %s9423_s18   ;;  %s5569_s17 = sphi %s5669_s17, %s9422_s17  }
   0xe   : > { %s321_s22 = sshll.u32 %s5583_s21, 4  ;;  %p4593_p0 = scmp.ge.s32.totalorder %s5581_s20, 1  ;;  %s5695_s22 = int_to_ptr.vmem [resolvable:$true] %s321_s22 }
   0xf   : > { %p8963_p1 = scmp.eq.s32.totalorder %s5690_s23, 0  ;;  %p297_p2 = scmp.lt.s32.totalorder %s5581_s20, 3 }
  0x10   : > { %s5584_s25 = smov [#allocation9]   ;;  %s5585_s28 = smov [#allocation12]  }
  0x11   : > { %p5697_p3 = pnand %p4593_p0, %p297_p2  ;;  %s347_s26 = sshll.u32 %s5584_s25, 4  ;;  %s5710_s26 = int_to_ptr.vmem [resolvable:$true] %s347_s26 }
  0x12   : > { %s373_s29 = sshll.u32 %s5585_s28, 4  ;;  %s9102_s5 = sld [smem:[#allocation114_spill]]  ;;  %s5712_s29 = int_to_ptr.vmem [resolvable:$true] %s373_s29 }
  0x13   : > { %s9100_s24 = scalar_select %p5697_p3, 1, 0 }
  0x14   : > { %p5162_p5 = pneg %p5697_p3 }
  0x16   : > { %p5706_p6 = pnand %p5162_p5, %p8963_p1 }
  0x18   : > { %s5305_s13 = scalar_lea.hbm %s9102_s5, 2048  ;;  %p5722_p8 = pneg %p5706_p6 }
  0x19   : > { %p5306_p7 = scmp.ne.s32.totalorder %s9102_s5, %s5305_s13  ;;  %p5312_p11 = scmp.lt.u32.totalorder %s5305_s13, %s9102_s5 }
  0x1b   : > { %p5308_p9 = pnand %p5722_p8, %p5306_p7 }
  0x1d   : > { %p5309_p10 = pneg %p5308_p9 }
  0x1f   : > { %p5314_p12 = pnand %p5312_p11, %p5309_p10 }
  0x21   : > { %5317 = shalt.err (!%p5314_p12)
}
  0x22   : > { %s5318_s28 = scalar_lea.vmem %s5695_s22, 2048  ;;  %p5326_p5 = scmp.lt.s32.totalorder %s5695_s22, %s5695_s22 }
  0x23   : > { %p5319_p13 = scmp.ne.s32.totalorder %s5695_s22, %s5318_s28  ;;  %p5327_p4 = scmp.lt.s32.totalorder %s5318_s28, %s5318_s28 }
  0x25   : > { %p5321_p0 = pnand %p5319_p13, %p5722_p8  ;;  %p5328_p7 = por %p5327_p4, %p5326_p5 }
  0x27   : > { %p5322_p2 = pneg %p5321_p0 }
  0x29   : > { %p5329_p9 = pnand %p5328_p7, %p5322_p2 }
  0x2b   : > { %5332 = shalt.err (!%p5329_p9)
}
  0x2c   : > { %s8965_s30 = smov 128   ;;  %s5587_s12 = smov 8  }
  0x2d   : > { %5165 = dma.hbm_to_vmem [thread:$0]  (!%p5706_p6), %s9102_s5, 2048, %s5695_s22, [#allocation7], %s8965_s30, %s8965_s30, %s5587_s12  }
  0x2e   : > { %s5333_s25 = scalar_lea.hbm %s8957_s7, 640 }
  0x2f   : > { %p5334_p4 = scmp.ne.s32.totalorder %s8957_s7, %s5333_s25  ;;  %p5340_p12 = scmp.lt.u32.totalorder %s5333_s25, %s8957_s7 }
  0x31   : > { %p5336_p10 = pnand %p5334_p4, %p5722_p8 }
  0x33   : > { %p5337_p11 = pneg %p5336_p10 }
  0x35   : > { %p5342_p13 = pnand %p5340_p12, %p5337_p11 }
  0x37   : > { %5345 = shalt.err (!%p5342_p13)
}
  0x38   : > { %s5346_s22 = scalar_lea.vmem %s5710_s26, 640  ;;  %p5354_p7 = scmp.lt.s32.totalorder %s5710_s26, %s5710_s26 }
  0x39   : > { %p5347_p0 = scmp.ne.s32.totalorder %s5710_s26, %s5346_s22  ;;  %p5355_p9 = scmp.lt.s32.totalorder %s5346_s22, %s5346_s22 }
  0x3b   : > { %p5349_p2 = pnand %p5347_p0, %p5722_p8  ;;  %p5356_p4 = por %p5355_p9, %p5354_p7 }
  0x3d   : > { %p5350_p5 = pneg %p5349_p2 }
  0x3f   : > { %p5357_p10 = pnand %p5356_p4, %p5350_p5 }
  0x41   : > { %5360 = shalt.err (!%p5357_p10)
}
  0x42   : > { %5171 = dma.hbm_to_vmem [thread:$0]  (!%p5706_p6), %s8957_s7, 640, %s5710_s26, [#allocation10], %s8965_s30, %s8965_s30, %s5587_s12  }
  0x43   : > { %s5361_s14 = scalar_lea.hbm %s8959_s9, 2048 }
  0x44   : > { %p5362_p11 = scmp.ne.s32.totalorder %s8959_s9, %s5361_s14  ;;  %p5368_p0 = scmp.lt.u32.totalorder %s5361_s14, %s8959_s9 }
  0x46   : > { %p5364_p12 = pnand %p5362_p11, %p5722_p8 }
  0x48   : > { %p5365_p13 = pneg %p5364_p12 }
  0x4a   : > { %p5370_p2 = pnand %p5368_p0, %p5365_p13 }
  0x4c   : > { %5373 = shalt.err (!%p5370_p2)
}
  0x4d   : > { %s5374_s26 = scalar_lea.vmem %s5712_s29, 2048  ;;  %p5382_p4 = scmp.lt.s32.totalorder %s5712_s29, %s5712_s29 }
  0x4e   : > { %p5375_p5 = scmp.ne.s32.totalorder %s5712_s29, %s5374_s26  ;;  %p5383_p10 = scmp.lt.s32.totalorder %s5374_s26, %s5374_s26 }
  0x50   : > { %p5377_p7 = pnand %p5375_p5, %p5722_p8  ;;  %p5384_p11 = por %p5383_p10, %p5382_p4 }
  0x52   : > { %p5378_p9 = pneg %p5377_p7 }
  0x54   : > { %p5385_p12 = pnand %p5384_p11, %p5378_p9 }
  0x56   : > { %5388 = shalt.err (!%p5385_p12)
}
  0x57   : > { %5177 = dma.hbm_to_vmem [thread:$0]  (!%p5706_p6), %s8959_s9, 2048, %s5712_s29, [#allocation13], %s8965_s30, %s8965_s30, %s5587_s12  }
  0x58   : > { %s5588_s4 = smov [#allocation8]   ;;  %s5589_s13 = smov [#allocation11]  }
  0x59   : > { %s334_s11 = sshll.u32 %s5588_s4, 4  ;;  %s360_s14 = sshll.u32 %s5589_s13, 4  ;;  %s335_s11 = int_to_ptr.vmem [resolvable:$true] %s334_s11  ;;  %s361_s14 = int_to_ptr.vmem [resolvable:$true] %s360_s14 }
  0x5a   : > { %s5389_s25 = scalar_lea.hbm %s8956_s6, 640 }
  0x5b   : > { %p5390_p13 = scmp.ne.s32.totalorder %s8956_s6, %s5389_s25  ;;  %p5396_p5 = scmp.lt.u32.totalorder %s5389_s25, %s8956_s6 }
  0x5d   : > { %p5392_p0 = pnand %p5390_p13, %p5722_p8 }
  0x5f   : > { %p5393_p2 = pneg %p5392_p0 }
  0x61   : > { %p5398_p7 = pnand %p5396_p5, %p5393_p2 }
  0x63   : > { %5401 = shalt.err (!%p5398_p7)
}
  0x64   : > { %s5402_s29 = scalar_lea.vmem %s335_s11, 640  ;;  %p5410_p11 = scmp.lt.s32.totalorder %s335_s11, %s335_s11 }
  0x65   : > { %p5403_p9 = scmp.ne.s32.totalorder %s335_s11, %s5402_s29  ;;  %p5411_p12 = scmp.lt.s32.totalorder %s5402_s29, %s5402_s29 }
  0x67   : > { %p5405_p4 = pnand %p5403_p9, %p5722_p8  ;;  %p5412_p1 = por %p5411_p12, %p5410_p11 }
  0x69   : > { %p5406_p10 = pneg %p5405_p4 }
  0x6b   : > { %p5413_p3 = pnand %p5412_p1, %p5406_p10 }
  0x6d   : > { %5416 = shalt.err (!%p5413_p3)
}
  0x6e   : > { %5168 = dma.hbm_to_vmem [thread:$0]  (!%p5706_p6), %s8956_s6, 640, %s335_s11, [#allocation7], %s8965_s30, %s8965_s30, %s5587_s12  }
  0x6f   : > { %s5417_s15 = scalar_lea.hbm %s8958_s8, 640 }
  0x70   : > { %p5418_p1 = scmp.ne.s32.totalorder %s8958_s8, %s5417_s15  ;;  %p5424_p0 = scmp.lt.u32.totalorder %s5417_s15, %s8958_s8 }
  0x72   : > { %p5420_p3 = pnand %p5418_p1, %p5722_p8 }
  0x74   : > { %p5421_p13 = pneg %p5420_p3 }
  0x76   : > { %p5426_p2 = pnand %p5424_p0, %p5421_p13 }
  0x78   : > { %5429 = shalt.err (!%p5426_p2)
}
  0x79   : > { %s5430_s22 = scalar_lea.vmem %s361_s14, 640  ;;  %p5438_p4 = scmp.lt.s32.totalorder %s361_s14, %s361_s14 }
  0x7a   : > { %p5431_p5 = scmp.ne.s32.totalorder %s361_s14, %s5430_s22  ;;  %p5439_p10 = scmp.lt.s32.totalorder %s5430_s22, %s5430_s22 }
  0x7c   : > { %p5433_p7 = pnand %p5431_p5, %p5722_p8  ;;  %p5440_p11 = por %p5439_p10, %p5438_p4 }
  0x7e   : > { %p5434_p9 = pneg %p5433_p7 }
  0x80   : > { %p5441_p12 = pnand %p5440_p11, %p5434_p9 }
  0x82   : > { %5444 = shalt.err (!%p5441_p12)
}
  0x83   : > { %5174 = dma.hbm_to_vmem [thread:$0]  (!%p5706_p6), %s8958_s8, 640, %s361_s14, [#allocation10], %s8965_s30, %s8965_s30, %s5587_s12  }
  0x84   : > { %s5590_s5 = smov [#allocation14]   ;;  %s5445_s15 = scalar_lea.hbm %s8960_s10, 2048 }
  0x85   : > { %s386_s3 = sshll.u32 %s5590_s5, 4  ;;  %p5446_p1 = scmp.ne.s32.totalorder %s8960_s10, %s5445_s15  ;;  %s387_s3 = int_to_ptr.vmem [resolvable:$true] %s386_s3 }
  0x86   : > { %p5452_p0 = scmp.lt.u32.totalorder %s5445_s15, %s8960_s10 }
  0x87   : > { %p5448_p3 = pnand %p5446_p1, %p5722_p8 }
  0x89   : > { %p5449_p13 = pneg %p5448_p3 }
  0x8b   : > { %p5454_p2 = pnand %p5452_p0, %p5449_p13 }
  0x8d   : > { %5457 = shalt.err (!%p5454_p2)
}
  0x8e   : > { %s5458_s14 = scalar_lea.vmem %s387_s3, 2048  ;;  %p5466_p4 = scmp.lt.s32.totalorder %s387_s3, %s387_s3 }
  0x8f   : > { %p5459_p5 = scmp.ne.s32.totalorder %s387_s3, %s5458_s14  ;;  %p5467_p10 = scmp.lt.s32.totalorder %s5458_s14, %s5458_s14 }
  0x91   : > { %p5461_p7 = pnand %p5459_p5, %p5722_p8  ;;  %p5468_p11 = por %p5467_p10, %p5466_p4 }
  0x93   : > { %p5462_p9 = pneg %p5461_p7 }
  0x95   : > { %p5469_p12 = pnand %p5468_p11, %p5462_p9 }
  0x97   : > { %5472 = shalt.err (!%p5469_p12)
}
  0x98   : > { %5180 = dma.hbm_to_vmem [thread:$0]  (!%p5706_p6), %s8960_s10, 2048, %s387_s3, [#allocation13], %s8965_s30, %s8965_s30, %s5587_s12  }
  0x99   : > { %s4592_s27 = sadd.s32 4294967294, %s5581_s20   ;;  %s5863_s16 = sadd.s32 1, %s5581_s20  }
  0x9a   : > { %s34_s29 = ssub.s32 %s5581_s20, %s5863_s16  ;;  %s37_s5 = sadd.s32 1, %s5577_s19 }
  0x9b   : > { %p35_p8 = scmp.eq.s32.totalorder %s34_s29, 0  ;;  %p44_p1 = scmp.ne.s32.totalorder %s5577_s19, %s5573_s18 }
  0x9c   : > { %p45_p3 = scmp.eq.s32.totalorder %s5581_s20, 0  ;;  %p50_p13 = scmp.ne.s32.totalorder %s5573_s18, %s5569_s17 }
  0x9d   : > { %s5874_s4 = scalar_select %p35_p8, %s5577_s19, %s37_s5  }
  0x9e   : > { %p5876_p0 = por %p45_p3, %p44_p1  ;;  %p9105_p2 = scmp.eq.s32.totalorder %s5690_s23, 0 }
  0x9f   : > { %p284_p5 = scmp.eq.s32.totalorder %s5690_s23, 1  ;;  %p290_p7 = scmp.eq.s32.totalorder %s4592_s27, 1 }
  0xa0   : > { %p5882_p6 = por %p9105_p2, %p50_p13  ;;  %p5195_p9 = scmp.lt.s32.totalorder %s5581_s20, 2 }
  0xa1   : > { %s400_s15 = sand.u32 1, %s5577_s19   ;;  %p5889_p4 = por %p284_p5, %p44_p1 }
  0xa2   : > { %p5893_p10 = por %p290_p7, %p50_p13  ;;  %s4601_s28 = sshll.u32 %s400_s15, 4 }
  0xa3   : > { %s9107_s21 = scalar_select %p5889_p4, 1, 0 }
  0xa4   : > { %s9108_s25 = scalar_select %p5893_p10, 1, 0 }
  0xa5   : > { %s4622_s26 = sshll.u32 %s5581_s20, 8  ;;  %s404_s27 = scalar_lea.vmem [#allocation3], %s4601_s28 }
  0xa6   : > { %s5901_s11 = scalar_lea.hbm %s8950_s0, %s4622_s26  ;;  %s411_s29 = sshll.u32 %s404_s27, 4  ;;  %s5903_s29 = int_to_ptr.vmem [resolvable:$true] %s411_s29 }
  0xa7   : > { %p5907_p11 = pnand %p5195_p9, %p5876_p0  ;;  %s5911_s30 = scalar_lea.sflag [#allocation4], %s400_s15 }
  0xa8   : > { %s5473_s14 = scalar_lea.hbm %s5901_s11, 256  ;;  %s5478_s13 = scalar_lea.hbm %s8950_s0, 512 }
  0xa9   : > { %p5474_p12 = scmp.ne.s32.totalorder %s5901_s11, %s5473_s14  ;;  %p5475_p8 = pneg %p5907_p11 }
  0xaa   : > { %p5479_p13 = scmp.lt.u32.totalorder %s5901_s11, %s8950_s0  ;;  %p5480_p0 = scmp.lt.u32.totalorder %s5478_s13, %s5473_s14 }
  0xab   : > { %p5476_p1 = pnand %p5475_p8, %p5474_p12  ;;  %p5482_p5 = scmp.lt.u32.totalorder %s5473_s14, %s5901_s11 }
  0xac   : > { %p5481_p2 = por %p5480_p0, %p5479_p13 }
  0xad   : > { %p5477_p3 = pneg %p5476_p1 }
  0xae   : > { %p5483_p7 = por %p5482_p5, %p5481_p2 }
  0xb0   : > { %p5484_p9 = pnand %p5483_p7, %p5477_p3 }
  0xb2   : > { %5487 = shalt.err (!%p5484_p9)
}
  0xb3   : > { %s5488_s15 = scalar_lea.vmem %s5903_s29, 256  ;;  %s5591_s28 = smov [#allocation3]  }
  0xb4   : > { %p5489_p12 = scmp.ne.s32.totalorder %s5903_s29, %s5488_s15  ;;  %s5493_s26 = sshll.u32 %s5591_s28, 4  ;;  %s5494_s26 = int_to_ptr.vmem [resolvable:$false] %s5493_s26 }
  0xb5   : > { %s5495_s22 = scalar_lea.vmem %s5494_s26, 512  ;;  %p5496_p4 = scmp.lt.s32.totalorder %s5903_s29, %s5494_s26 }
  0xb6   : > { %p5491_p1 = pnand %p5489_p12, %p5475_p8  ;;  %p5497_p13 = scmp.lt.s32.totalorder %s5495_s22, %s5488_s15 }
  0xb8   : > { %p5492_p10 = pneg %p5491_p1  ;;  %p5498_p0 = por %p5497_p13, %p5496_p4 }
  0xba   : > { %p5499_p2 = pnand %p5498_p0, %p5492_p10 }
  0xbc   : > { %5502 = shalt.err (!%p5499_p2)
}
  0xbd   : > { %s9110_s14 = smov 128   ;;  %p9111_p8 = scmp.ne.s32.totalorder %s9100_s24, 0 }
  0xbe   : > { %5184 = dma.hbm_to_vmem [thread:$0]  (!%p5907_p11), %s5901_s11, 256, %s5903_s29, %s5911_s30, %s9110_s14, %s9110_s14, %s5587_s12  }
  0xbf   : > { %423 = sbr.rel (%p9111_p8) target bundleno = 3068 (0xbfc), region = 64 }
  0xc6   : > { %s5945_s13 = sand.u32 1, %s5573_s18  }
  0xc7   : > { %s9024_s27 = sshll.u32 %s5945_s13, 4  ;;  %s426_s15 = scalar_lea.sflag [#allocation4], %s5945_s13 }
  0xc8   : > { %s5951_s5 = scalar_lea.vmem [#allocation3], %s9024_s27 }
  0xc9   : > { %5548 = dma.done.wait (%p5882_p6), %s426_s15, 256  }
  0xca   : > { %5550 = vsyncadd (%p5882_p6), %s426_s15, 4294967040  ;;  %p9112_p4 = scmp.eq.s32.totalorder %s5690_s23, 0 }
  0xcc   : > { %5552 = dma.done.wait (%p9112_p4), [#allocation7], 2688   ;;  %p9113_p10 = pmov %p9112_p4 }
  0xcd   : > { %p9114_p11 = pmov %p9112_p4 }
  0xce   : > { %5554 = vsyncadd (%p9113_p10), [#allocation7], 4294964608 }
  0xcf   : > { %5556 = dma.done.wait (%p9114_p11), [#allocation10], 1280   ;;  %p9115_p3 = pmov %p9112_p4 }
  0xd1   : > { %5558 = vsyncadd (%p9115_p3), [#allocation10], 4294966016  ;;  %p9116_p5 = pmov %p9115_p3 }
  0xd2   : > { %p9117_p7 = pmov %p9115_p3 }
  0xd3   : > { %5560 = dma.done.wait (%p9116_p5), [#allocation13], 4096  }
  0xd4   : > { %5562 = vsyncadd (%p9117_p7), [#allocation13], 4294963200  ;;  %v719_v0 = vlaneseq  ;;  %v5592_v1 = vmov 0.0   ;;  %v502_v3 = vld [vmem:[#allocation6] sm:$0xff]  ;;  %v503_v4 = vld [vmem:[#allocation6 + $0x8] sm:$0xff]  ;;  %s9029_s24 = smov 56  }
  0xd5   : > { %499 = vst [vmem:[#allocation2 + $0x38] sm:$0xff] %v5592_v1  ;;  %492 = vst [vmem:[#allocation2] sm:$0xff] %v5592_v1  ;;  %v504_v5 = vld [vmem:[#allocation6 + $0x10] sm:$0xff]  ;;  %v5971_v6 = vpack.c.bf16 %v503_v4, %v502_v3  ;;  %v505_v7 = vld [vmem:[#allocation6 + $0x18] sm:$0xff]  ;;  %s5594_s30 = smov 64   ;;  %s9027_s12 = smov 72  }
  0xd6   : > { %493 = vst [vmem:[#allocation2 + $0x8] sm:$0xff] %v5592_v1  ;;  %494 = vst [vmem:[#allocation2 + $0x10] sm:$0xff] %v5592_v1  ;;  %v5969_v2 = vshrl.u32 %v719_v0, 7  ;;  %v5973_v8 = vpack.c.bf16 %v505_v7, %v504_v5  ;;  %v506_v9 = vld [vmem:[#allocation6 + $0x20] sm:$0xff]  ;;  %v507_v10 = vld [vmem:[#allocation6 + $0x28] sm:$0xff]  ;;  %s5596_s3 = smov 80  }
  0xd7   : > { %495 = vst [vmem:[#allocation2 + $0x18] sm:$0xff] %v5592_v1  ;;  %496 = vst [vmem:[#allocation2 + $0x20] sm:$0xff] %v5592_v1  ;;  %4943 = vmatprep.subr.bf16.mxu0 %v5971_v6  ;;  %4975 = vmatprep.subr.bf16.mxu1 %v5971_v6  ;;  %v5983_v12 = vpack.c.bf16 %v507_v10, %v506_v9  ;;  %v508_v13 = vld [vmem:[#allocation6 + $0x30] sm:$0xff]  ;;  %v509_v16 = vld [vmem:[#allocation6 + $0x38] sm:$0xff]  ;;  %s9025_s11 = smov 48   ;;  %s5598_s29 = smov 40  }
  0xd8   : > { %497 = vst [vmem:[#allocation2 + $0x28] sm:$0xff] %v5592_v1  ;;  %498 = vst [vmem:[#allocation2 + $0x30] sm:$0xff] %v5592_v1  ;;  %v5977_v11 = vsub.s32 1, %v5969_v2  ;;  %4945 = vmatpush3.bf16.msra.mxu0 %v5971_v6  ;;  %4977 = vmatpush3.bf16.msra.mxu1 %v5971_v6  ;;  %v5986_v14 = vld [vmem:[%s5951_s5] sm:$0xff]  ;;  %v5989_v15 = vsub.s32 2, %v5969_v2  ;;  %v5998_v19 = vsub.s32 3, %v5969_v2  ;;  %v6006_v22 = vpack.c.bf16 %v509_v16, %v508_v13 }
  0xd9   : > { %9118 = vst [vmem:[#allocation21_spill] sm:$0xff] %v5971_v6  ;;  %9119 = vst [vmem:[#allocation22_spill] sm:$0xff] %v5973_v8  ;;  %4947 = vmatprep.subr.bf16.mxu0 %v5973_v8  ;;  %4979 = vmatprep.subr.bf16.mxu1 %v5973_v8  ;;  %v5993_v17 = vld [vmem:[#allocation8 + $0x18] sm:$0x1f]  ;;  %v5995_v18 = vld [vmem:[#allocation8 + $0x8] sm:$0x1f] }
  0xda   : > { %9120 = vst [vmem:[#allocation23_spill] sm:$0xff] %v5977_v11  ;;  %9121 = vst [vmem:[#allocation24_spill] sm:$0xff] %v5983_v12  ;;  %4764 = vmatprep.mubr.f32.mxu0 %v5986_v14  ;;  %v1304_v20 = vrot.slane %v5993_v17, %v5977_v11  ;;  %v946_v21 = vrot.slane %v5995_v18, %v5977_v11  ;;  %v1351_v23 = vrot.slane %v5993_v17, %v5989_v15  ;;  %v510_v24 = vld [vmem:[#allocation6 + $0x40] sm:$0xff]  ;;  %v511_v25 = vld [vmem:[#allocation6 + $0x48] sm:$0xff]  ;;  %s5599_s28 = smov 88   ;;  %s5600_s26 = smov 120  }
  0xdb   : > { %9122 = vst [vmem:[#allocation25_spill] sm:$0xff] %v5989_v15  ;;  %9123 = vst [vmem:[#allocation26_spill] sm:$0xff] %v5998_v19  ;;  %v6012_v26 = vld [vmem:[#allocation8 + $0x10] sm:$0x1f]  ;;  %v1398_v27 = vrot.slane %v5993_v17, %v5998_v19  ;;  %v6019_v28 = vpack.c.bf16 %v511_v25, %v510_v24  ;;  %v513_v31 = vld [vmem:[#allocation6 + $0x58] sm:$0xff]  ;;  %v6028_v33 = vsub.s32 4, %v5969_v2  ;;  %v993_v35 = vrot.slane %v5995_v18, %v5989_v15 }
  0xdc   : > { %4949 = vmatpush3.bf16.msra.mxu0 %v5973_v8  ;;  %9124 = vst [vmem:[#allocation27_spill] sm:$0xff] %v6006_v22  ;;  %1306 = vrot.lane.b32.xlu1 %v1304_v20, %s9029_s24  ;;  %v1148_v29 = vrot.slane %v6012_v26, %v5977_v11  ;;  %v512_v30 = vld [vmem:[#allocation6 + $0x50] sm:$0xff]  ;;  %v1182_v32 = vrot.slane %v6012_v26, %v5989_v15  ;;  %v514_v36 = vld [vmem:[#allocation6 + $0x60] sm:$0xff]  ;;  %v515_v37 = vld [vmem:[#allocation6 + $0x68] sm:$0xff]  ;;  %v6099_v56 = vsub.s32 0, %v5969_v2  ;;  %s5601_s22 = smov 112  }
  0xdd   : > { %4951 = vmatprep.subr.bf16.mxu0 %v5983_v12  ;;  %948 = vrot.lane.b32.xlu0 %v946_v21, %s9029_s24  ;;  %9125 = vst [vmem:[#allocation28_spill] sm:$0xff] %v6019_v28  ;;  %9126 = vst [vmem:[#allocation29_spill] sm:$0xff] %v6028_v33  ;;  %v6034_v34 = vpack.c.bf16 %v513_v31, %v512_v30  ;;  %v6040_v38 = vld [vmem:[#allocation8] sm:$0x1f]  ;;  %v1445_v39 = vrot.slane %v5993_v17, %v6028_v33  ;;  %v516_v42 = vld [vmem:[#allocation6 + $0x70] sm:$0xff]  ;;  %s5602_s14 = smov 104  }
  0xde   : > { %4981 = vmatpush3.bf16.msra.mxu1 %v5973_v8  ;;  %v6048_v40 = vpack.c.bf16 %v515_v37, %v514_v36  ;;  %v736_v41 = vrot.slane %v6040_v38, %v5977_v11  ;;  %v517_v43 = vld [vmem:[#allocation6 + $0x78] sm:$0xff]  ;;  %v1216_v44 = vrot.slane %v6012_v26, %v5998_v19  ;;  %v1040_v46 = vrot.slane %v5995_v18, %v5998_v19  ;;  %v712_v47 = vld [vmem:[#allocation8 + $0x20] sm:$0x1f]  ;;  %v6132_v5 = vld [vmem:[#allocation9 + $0x8] sm:$0x1f]  ;;  %s5603_s15 = smov 96  }
  0xdf   : > { %4983 = vmatprep.subr.bf16.mxu1 %v5983_v12  ;;  %9127 = vst [vmem:[#allocation30_spill] sm:$0xff] %v6034_v34  ;;  %v6060_v45 = vpack.c.bf16 %v517_v43, %v516_v42  ;;  %v784_v48 = vrot.slane %v6040_v38, %v5989_v15  ;;  %v1510_v49 = vrot.slane %v712_v47, %v5977_v11  ;;  %v6080_v51 = vld [vmem:[%s5951_s5 + $0x8] sm:$0xff]  ;;  %9130 = vst [vmem:[#allocation33_spill] sm:$0xff] %v6099_v56  ;;  %v6116_v63 = vld [vmem:[#allocation9 + $0x18] sm:$0x1f]  ;;  %vm702_vm0 = vcmask 1048064  }
  0xe0   : > { %4953 = vmatpush3.bf16.msra.mxu0 %v5983_v12  ;;  %1353 = vrot.lane.b32.xlu1 %v1351_v23, %s5594_s30  ;;  %9128 = vst [vmem:[#allocation31_spill] sm:$0xff] %v6048_v40  ;;  %v1250_v50 = vrot.slane %v6012_v26, %v6028_v33  ;;  %v1087_v52 = vrot.slane %v5995_v18, %v6028_v33  ;;  %v6124_v2 = vld [vmem:[#allocation9 + $0x10] sm:$0x1f]  ;;  %v1285_v16 = vld [vmem:[#allocation2 + $0x30] sm:$0x1]  ;;  %vm704_vm1 = vcmask 523264  }
  0xe1   : > { %4955 = vmatprep.subr.bf16.mxu0 %v6006_v22  ;;  %1400 = vrot.lane.b32.xlu0 %v1398_v27, %s9027_s12  ;;  %9129 = vst [vmem:[#allocation32_spill] sm:$0xff] %v6060_v45  ;;  %v832_v53 = vrot.slane %v6040_v38, %v5998_v19  ;;  %v1557_v54 = vrot.slane %v712_v47, %v5989_v15  ;;  %v1286_v13 = vld [vmem:[#allocation2 + $0x38] sm:$0x1]  ;;  %v926_v24 = vld [vmem:[#allocation2 + $0x8] sm:$0x80]  ;;  %vm765_vm2 = vcmask 982016  }
  0xe2   : > { %4985 = vmatpush3.bf16.msra.mxu1 %v5983_v12  ;;  %v880_v55 = vrot.slane %v6040_v38, %v6028_v33  ;;  %v1604_v57 = vrot.slane %v712_v47, %v5998_v19  ;;  %v1290_v58 = vrot.slane %v5993_v17, %v6099_v56  ;;  %v1651_v59 = vrot.slane %v712_v47, %v6028_v33  ;;  %v925_v25 = vld [vmem:[#allocation2] sm:$0x80]  ;;  %v714_v43 = vld [vmem:[#allocation2 + $0x8] sm:$0xc0]  ;;  %s9247_s27 = smov 56   ;;  %p9419_p9 = scmp.ne.s32.totalorder %s9107_s21, 0 }
  0xe3   : > { %4987 = vmatprep.subr.bf16.mxu1 %v6006_v22  ;;  %v1136_v60 = vrot.slane %v6012_v26, %v6099_v56  ;;  %v932_v61 = vrot.slane %v5995_v18, %v6099_v56  ;;  %v1496_v62 = vrot.slane %v712_v47, %v6099_v56  ;;  %v722_v0 = vrot.slane %v6040_v38, %v6099_v56 }
  0xe4   : > { %4957 = vmatpush3.bf16.msra.mxu0 %v6006_v22  ;;  %1150 = vrot.lane.b32.xlu1 %v1148_v29, %s9029_s24  ;;  %v2478_v1 = vrot.slane %v6116_v63, %v5989_v15  ;;  %v2431_v3 = vrot.slane %v6116_v63, %v5977_v11  ;;  %v2275_v4 = vrot.slane %v6124_v2, %v5977_v11  ;;  %vm813_vm3 = vcmask 916480  }
  0xe5   : > { %4959 = vmatprep.subr.bf16.mxu0 %v6019_v28  ;;  %1184 = vrot.lane.b32.xlu0 %v1182_v32, %s5594_s30  ;;  %v2073_v7 = vrot.slane %v6132_v5, %v5977_v11  ;;  %v2120_v9 = vrot.slane %v6132_v5, %v5989_v15  ;;  %v2525_v10 = vrot.slane %v6116_v63, %v5998_v19  ;;  %vm861_vm4 = vcmask 850944  }
  0xe6   : > { %4989 = vmatpush3.bf16.msra.mxu1 %v6006_v22  ;;  %vm909_vm5 = vcmask 785408   ;;  %vm1701_vm6 = vcmask 1046528   ;;  %vm1777_vm7 = vcmask 1043456   ;;  %vm1752_vm8 = vcmask 1045504  }
  0xe7   : > { %4991 = vmatprep.subr.bf16.mxu1 %v6019_v28  ;;  %vm1806_vm9 = vcmask 1041408   ;;  %vm1825_vm10 = vcmask 130048   ;;  %vm1940_vm11 = vcmask 654336   ;;  %vm1988_vm12 = vcmask 457728  }
  0xe8   : > { %4961 = vmatpush3.bf16.msra.mxu0 %v6019_v28  ;;  %995 = vrot.lane.b32.xlu1 %v993_v35, %s5594_s30  ;;  %vm2036_vm13 = vcmask 261120   ;;  %vm2828_vm14 = vcmask 1044480  }
  0xe9   : > { %4963 = vmatprep.subr.bf16.mxu0 %v6034_v34  ;;  %1447 = vrot.lane.b32.xlu0 %v1445_v39, %s5596_s3 }
  0xea   : > { %4993 = vmatpush3.bf16.msra.mxu1 %v6019_v28 }
  0xeb   : > { %4995 = vmatprep.subr.bf16.mxu1 %v6034_v34 }
  0xec   : > { %4965 = vmatpush3.bf16.msra.mxu0 %v6034_v34  ;;  %738 = vrot.lane.b32.xlu1 %v736_v41, %s9029_s24 }
  0xed   : > { %4967 = vmatprep.subr.bf16.mxu0 %v6048_v40  ;;  %1218 = vrot.lane.b32.xlu0 %v1216_v44, %s9027_s12  ;;  %v713_v44 = vld [vmem:[#allocation2] sm:$0xc0] }
  0xee   : > { %4997 = vmatpush3.bf16.msra.mxu1 %v6034_v34 }
  0xef   : > { %4999 = vmatprep.subr.bf16.mxu1 %v6048_v40 }
  0xf0   : > { %4969 = vmatpush3.bf16.msra.mxu0 %v6048_v40  ;;  %1042 = vrot.lane.b32.xlu1 %v1040_v46, %s9027_s12 }
  0xf1   : > { %4971 = vmatprep.subr.bf16.mxu0 %v6060_v45  ;;  %786 = vrot.lane.b32.xlu0 %v784_v48, %s5594_s30 }
  0xf2   : > { %5001 = vmatpush3.bf16.msra.mxu1 %v6048_v40 }
  0xf3   : > { %5003 = vmatprep.subr.bf16.mxu1 %v6060_v45 }
  0xf4   : > { %4973 = vmatpush3.bf16.msra.mxu0 %v6060_v45  ;;  %1512 = vrot.lane.b32.xlu1 %v1510_v49, %s9029_s24 }
  0xf5   : > { %1252 = vrot.lane.b32.xlu0 %v1250_v50, %s5596_s3 }
  0xf6   : > { %5005 = vmatpush3.bf16.msra.mxu1 %v6060_v45 }
  0xf7   : > { %4765 = vmatmul.mubr.f32.vlgmr.msra.gmra.mrb[0].mxu0 %v6080_v51  ;;  %5039 = vmatprep.subr.bf16.mxu1 %v5971_v6 }
  0xf8   : > { %1089 = vrot.lane.b32.xlu1 %v1087_v52, %s5596_s3 }
  0xf9   : > { %834 = vrot.lane.b32.xlu0 %v832_v53, %s9027_s12 }
  0xfc   : > { %1559 = vrot.lane.b32.xlu1 %v1557_v54, %s5594_s30 }
  0xfd   : > { %882 = vrot.lane.b32.xlu0 %v880_v55, %s5596_s3 }
 0x100   : > { %1606 = vrot.lane.b32.xlu1 %v1604_v57, %s9027_s12  ;;  %s9398_s12 = smov 48  }
 0x101   : > { %1292 = vrot.lane.b32.xlu0 %v1290_v58, %s9025_s11  ;;  %v6199_v58 = vld [vmem:[#allocation2 + $0x30] sm:$0x3] }
 0x104   : > { %1653 = vrot.lane.b32.xlu1 %v1651_v59, %s5596_s3  ;;  %v6201_v59 = vld [vmem:[#allocation2 + $0x38] sm:$0x3] }
 0x105   : > { %1138 = vrot.lane.b32.xlu0 %v1136_v60, %s9025_s11 }
 0x108   : > { %934 = vrot.lane.b32.xlu1 %v932_v61, %s9025_s11 }
 0x109   : > { %1498 = vrot.lane.b32.xlu0 %v1496_v62, %s9025_s11 }
 0x10c   : > { %724 = vrot.lane.b32.xlu1 %v722_v0, %s9025_s11  ;;  %s9418_s11 = sld [smem:[#allocation115_spill]] }
 0x10d   : > { %2480 = vrot.lane.b32.xlu0 %v2478_v1, %s5594_s30 }
 0x110   : > { %2433 = vrot.lane.b32.xlu1 %v2431_v3, %s5598_s29 }
 0x111   : > { %2277 = vrot.lane.b32.xlu0 %v2275_v4, %s5598_s29 }
 0x114   : > { %2075 = vrot.lane.b32.xlu1 %v2073_v7, %s5598_s29 }
 0x115   : > { %2122 = vrot.lane.b32.xlu0 %v2120_v9, %s5594_s30 }
 0x118   : > { %2527 = vrot.lane.b32.xlu1 %v2525_v10, %s5599_s28 }
 0x14e   : > { %v6145_v17 = vpop.permute.xlu1 %1306 }
 0x14f   : > { %v1314_v18 = vmul.f32 %v6145_v17, %v1286_v13  ;;  %v1313_v20 = vmul.f32 %v6145_v17, %v1285_v16  ;;  %v6149_v21 = vpop.permute.xlu0 %948 }
 0x150   : > { %v952_v29 = vmul.f32 %v6149_v21, %v926_v24  ;;  %v951_v30 = vmul.f32 %v6149_v21, %v925_v25 }
 0x151   : > { %1331 = vrot.lane.b32.xlu0 %v1314_v18, %s5600_s26  ;;  %1329 = vrot.lane.b32.xlu1 %v1313_v20, %s5600_s26 }
 0x152   : > { %v6153_v23 = vpop.permute.xlu1 %1353 }
 0x153   : > { %v1361_v26 = vmul.f32 %v6153_v23, %v1286_v13  ;;  %v1360_v27 = vmul.f32 %v6153_v23, %v1285_v16  ;;  %v6163_v32 = vpop.permute.xlu0 %1400 }
 0x154   : > { %v1408_v35 = vmul.f32 %v6163_v32, %v1286_v13  ;;  %v1407_v36 = vmul.f32 %v6163_v32, %v1285_v16 }
 0x155   : > { %1378 = vrot.lane.b32.xlu0 %v1361_v26, %s5601_s22  ;;  %1376 = vrot.lane.b32.xlu1 %v1360_v27, %s5601_s22 }
 0x156   : > { %v6161_v31 = vpop.permute.xlu1 %1150 }
 0x157   : > { %v6171_v38 = vpop.permute.xlu0 %1184 }
 0x159   : > { %965 = vrot.lane.b32.xlu0 %v952_v29, %s5600_s26  ;;  %963 = vrot.lane.b32.xlu1 %v951_v30, %s5600_s26 }
 0x15a   : > { %v6169_v37 = vpop.permute.xlu1 %995 }
 0x15b   : > { %v998_v39 = vmul.f32 %v6169_v37, %v925_v25  ;;  %v999_v41 = vmul.f32 %v6169_v37, %v926_v24  ;;  %v6183_v48 = vpop.permute.xlu0 %1447 }
 0x15c   : > { %v1455_v50 = vmul.f32 %v6183_v48, %v1286_v13  ;;  %v1454_v52 = vmul.f32 %v6183_v48, %v1285_v16 }
 0x15d   : > { %1425 = vrot.lane.b32.xlu0 %v1408_v35, %s5602_s14  ;;  %1423 = vrot.lane.b32.xlu1 %v1407_v36, %s5602_s14 }
 0x15e   : > { %v6177_v42 = vpop.permute.xlu1 %738 }
 0x15f   : > { %v742_v46 = vmul.f32 %v6177_v42, %v714_v43  ;;  %v741_v47 = vmul.f32 %v6177_v42, %v713_v44  ;;  %v6191_v53 = vpop.permute.xlu0 %1218 }
 0x161   : > { %1010 = vrot.lane.b32.xlu0 %v998_v39, %s5601_s22  ;;  %1012 = vrot.lane.b32.xlu1 %v999_v41, %s5601_s22 }
 0x162   : > { %v6185_v49 = vpop.permute.xlu1 %1042 }
 0x163   : > { %v1045_v54 = vmul.f32 %v6185_v49, %v925_v25  ;;  %v1046_v55 = vmul.f32 %v6185_v49, %v926_v24  ;;  %v6209_v62 = vpop.permute.xlu0 %786 }
 0x164   : > { %v789_v1 = vmul.f32 %v6209_v62, %v713_v44  ;;  %v790_v3 = vmul.f32 %v6209_v62, %v714_v43 }
 0x165   : > { %755 = vrot.lane.b32.xlu1 %v742_v46, %s5600_s26  ;;  %753 = vrot.lane.b32.xlu0 %v741_v47, %s5600_s26  ;;  %v6259_v46 = vld [vmem:[#allocation9] sm:$0x1f]  ;;  %v2572_v47 = vrot.slane %v6116_v63, %v6028_v33 }
 0x166   : > { %v6197_v57 = vpop.permute.xlu1 %1512 }
 0x167   : > { %v1519_v60 = vmul.f32 %v6197_v57, %v6199_v58  ;;  %v1520_v61 = vmul.f32 %v6197_v57, %v6201_v59  ;;  %v6217_v4 = vpop.permute.xlu0 %1252 }
 0x169   : > { %1472 = vrot.lane.b32.xlu1 %v1455_v50, %s5603_s15  ;;  %1470 = vrot.lane.b32.xlu0 %v1454_v52, %s5603_s15  ;;  %v2167_v50 = vrot.slane %v6132_v5, %v5998_v19  ;;  %v6273_v52 = vld [vmem:[#allocation9 + $0x20] sm:$0x1f] }
 0x16a   : > { %v6211_v0 = vpop.permute.xlu1 %1089 }
 0x16b   : > { %v1092_v7 = vmul.f32 %v6211_v0, %v925_v25  ;;  %v1093_v9 = vmul.f32 %v6211_v0, %v926_v24  ;;  %v6231_v18 = vpop.permute.xlu0 %834 }
 0x16c   : > { %v837_v20 = vmul.f32 %v6231_v18, %v713_v44  ;;  %v838_v24 = vmul.f32 %v6231_v18, %v714_v43 }
 0x16d   : > { %1057 = vrot.lane.b32.xlu1 %v1045_v54, %s5602_s14  ;;  %1059 = vrot.lane.b32.xlu0 %v1046_v55, %s5602_s14  ;;  %v2343_v54 = vrot.slane %v6124_v2, %v5998_v19  ;;  %v2637_v55 = vrot.slane %v6273_v52, %v5977_v11 }
 0x16e   : > { %v6223_v10 = vpop.permute.xlu1 %1559 }
 0x16f   : > { %v1566_v13 = vmul.f32 %v6223_v10, %v6199_v58  ;;  %v1567_v16 = vmul.f32 %v6223_v10, %v6201_v59  ;;  %v6245_v29 = vpop.permute.xlu0 %882 }
 0x170   : > { %v885_v30 = vmul.f32 %v6245_v29, %v713_v44  ;;  %v886_v35 = vmul.f32 %v6245_v29, %v714_v43  ;;  %v2309_v43 = vrot.slane %v6124_v2, %v5989_v15  ;;  %v1864_v44 = vrot.slane %v6259_v46, %v5977_v11 }
 0x171   : > { %1535 = vrot.lane.b32.xlu1 %v1519_v60, %s5600_s26  ;;  %1537 = vrot.lane.b32.xlu0 %v1520_v61, %s5600_s26  ;;  %v1911_v60 = vrot.slane %v6259_v46, %v5989_v15  ;;  %v2214_v61 = vrot.slane %v6132_v5, %v6028_v33 }
 0x172   : > { %v6237_v25 = vpop.permute.xlu1 %1606 }
 0x173   : > { %v1613_v26 = vmul.f32 %v6237_v25, %v6199_v58  ;;  %v1614_v27 = vmul.f32 %v6237_v25, %v6201_v59 }
 0x175   : > { %801 = vrot.lane.b32.xlu1 %v789_v1, %s5601_s22  ;;  %803 = vrot.lane.b32.xlu0 %v790_v3, %s5601_s22  ;;  %v2377_v3 = vrot.slane %v6124_v2, %v6028_v33 }
 0x176   : > { %v6251_v36 = vpop.permute.xlu1 %1653 }
 0x177   : > { %v1660_v39 = vmul.f32 %v6251_v36, %v6199_v58  ;;  %v1661_v41 = vmul.f32 %v6251_v36, %v6201_v59 }
 0x179   : > { %1104 = vrot.lane.b32.xlu1 %v1092_v7, %s5603_s15  ;;  %1106 = vrot.lane.b32.xlu0 %v1093_v9, %s5603_s15  ;;  %v2684_v7 = vrot.slane %v6273_v52, %v5989_v15  ;;  %v6295_v9 = vpop.permute.xlu0 %1292 }
 0x17a   : > { %v6287_v1 = vpop.permute.xlu1 %934 }
 0x17d   : > { %1582 = vrot.lane.b32.xlu1 %v1566_v13, %s5601_s22  ;;  %1584 = vrot.lane.b32.xlu0 %v1567_v16, %s5601_s22  ;;  %v1959_v13 = vrot.slane %v6259_v46, %v5998_v19  ;;  %v2731_v16 = vrot.slane %v6273_v52, %v5998_v19 }
 0x181   : > { %849 = vrot.lane.b32.xlu1 %v837_v20, %s5602_s14  ;;  %851 = vrot.lane.b32.xlu0 %v838_v24, %s5602_s14  ;;  %v6303_v20 = vpop.permute.xlu1 %724  ;;  %v6305_v24 = vpop.permute.xlu0 %1138 }
 0x185   : > { %1629 = vrot.lane.b32.xlu1 %v1613_v26, %s5602_s14  ;;  %1631 = vrot.lane.b32.xlu0 %v1614_v27, %s5602_s14  ;;  %v2007_v26 = vrot.slane %v6259_v46, %v6028_v33  ;;  %v2778_v27 = vrot.slane %v6273_v52, %v6028_v33 }
 0x189   : > { %897 = vrot.lane.b32.xlu1 %v885_v30, %s5603_s15  ;;  %899 = vrot.lane.b32.xlu0 %v886_v35, %s5603_s15  ;;  %v6313_v30 = vld [vmem:[#allocation2 + $0x30] sm:$0x7]  ;;  %v6315_v35 = vpop.permute.xlu1 %2433 }
 0x18a   : > { %9131 = vst [vmem:[#allocation34_spill] sm:$0xff] %v6315_v35 }
 0x18d   : > { %1676 = vrot.lane.b32.xlu1 %v1660_v39, %s5603_s15  ;;  %1678 = vrot.lane.b32.xlu0 %v1661_v41, %s5603_s15  ;;  %v2417_v39 = vrot.slane %v6116_v63, %v6099_v56  ;;  %v2440_v41 = vmul.f32 %v6315_v35, %v6313_v30  ;;  %v2059_v63 = vrot.slane %v6132_v5, %v6099_v56 }
 0x191   : > { %2311 = vrot.lane.b32.xlu1 %v2309_v43, %s5594_s30  ;;  %1866 = vrot.lane.b32.xlu0 %v1864_v44, %s5598_s29  ;;  %v6323_v43 = vpop.permute.xlu0 %1498  ;;  %v6325_v44 = vld [vmem:[#allocation2 + $0x38] sm:$0x7] }
 0x195   : > { %2574 = vrot.lane.b32.xlu1 %v2572_v47, %s5601_s22  ;;  %2169 = vrot.lane.b32.xlu0 %v2167_v50, %s5599_s28  ;;  %v2441_v47 = vmul.f32 %v6315_v35, %v6325_v44  ;;  %v6333_v50 = vpop.permute.xlu0 %2480 }
 0x196   : > { %9132 = vst [vmem:[#allocation35_spill] sm:$0xff] %v6333_v50  ;;  %v2488_v5 = vmul.f32 %v6333_v50, %v6325_v44 }
 0x199   : > { %2345 = vrot.lane.b32.xlu1 %v2343_v54, %s5599_s28  ;;  %2639 = vrot.lane.b32.xlu0 %v2637_v55, %s5598_s29  ;;  %s5604_s29 = smov 16   ;;  %v2263_v54 = vrot.slane %v6124_v2, %v6099_v56  ;;  %v2487_v55 = vmul.f32 %v6333_v50, %v6313_v30  ;;  %v6351_v2 = vld [vmem:[#allocation2 + $0x8] sm:$0xe0] }
 0x19d   : > { %1913 = vrot.lane.b32.xlu1 %v1911_v60, %s5594_s30  ;;  %2216 = vrot.lane.b32.xlu0 %v2214_v61, %s5601_s22  ;;  %v6341_v60 = vpop.permute.xlu1 %2075  ;;  %v6343_v61 = vld [vmem:[#allocation2] sm:$0xe0] }
 0x19e   : > { %9133 = vst [vmem:[#allocation36_spill] sm:$0xff] %v6341_v60 }
 0x1a1   : > { %2379 = vrot.lane.b32.xlu1 %v2377_v3, %s5601_s22  ;;  %2686 = vrot.lane.b32.xlu0 %v2684_v7, %s5594_s30  ;;  %v2078_v3 = vmul.f32 %v6341_v60, %v6343_v61  ;;  %v6353_v7 = vpop.permute.xlu0 %2277 }
 0x1a2   : > { %9134 = vst [vmem:[#allocation37_spill] sm:$0xff] %v6353_v7 }
 0x1a5   : > { %1961 = vrot.lane.b32.xlu1 %v1959_v13, %s5599_s28  ;;  %2733 = vrot.lane.b32.xlu0 %v2731_v16, %s5599_s28  ;;  %v6355_v13 = vpop.permute.xlu1 %2527  ;;  %v2079_v16 = vmul.f32 %v6341_v60, %v6351_v2  ;;  %s5605_s28 = smov 32  }
 0x1a6   : > { %9135 = vst [vmem:[#allocation38_spill] sm:$0xff] %v6355_v13 }
 0x1a9   : > { %2009 = vrot.lane.b32.xlu1 %v2007_v26, %s5601_s22  ;;  %2780 = vrot.lane.b32.xlu0 %v2778_v27, %s5601_s22  ;;  %v2534_v26 = vmul.f32 %v6355_v13, %v6313_v30  ;;  %v6363_v27 = vpop.permute.xlu0 %2122 }
 0x1aa   : > { %9136 = vst [vmem:[#allocation39_spill] sm:$0xff] %v6363_v27 }
 0x1ad   : > { %2419 = vrot.lane.b32.xlu1 %v2417_v39, %s5604_s29  ;;  %2456 = vrot.lane.b32.xlu0 %v2440_v41, %s5602_s14  ;;  %v2535_v39 = vmul.f32 %v6355_v13, %v6325_v44  ;;  %v1850_v41 = vrot.slane %v6259_v46, %v6099_v56 }
 0x1b1   : > { %2458 = vrot.lane.b32.xlu1 %v2441_v47, %s5602_s14  ;;  %2061 = vrot.lane.b32.xlu0 %v2059_v63, %s5604_s29  ;;  %v2125_v47 = vmul.f32 %v6363_v27, %v6343_v61  ;;  %v2126_v63 = vmul.f32 %v6363_v27, %v6351_v2 }
 0x1b5   : > { %2265 = vrot.lane.b32.xlu1 %v2263_v54, %s5604_s29  ;;  %2503 = vrot.lane.b32.xlu0 %v2487_v55, %s5596_s3 }
 0x1b9   : > { %2505 = vrot.lane.b32.xlu1 %v2488_v5, %s5596_s3  ;;  %2090 = vrot.lane.b32.xlu0 %v2078_v3, %s5602_s14 }
 0x1bd   : > { %2092 = vrot.lane.b32.xlu1 %v2079_v16, %s5602_s14  ;;  %2550 = vrot.lane.b32.xlu0 %v2534_v26, %s9029_s24 }
 0x1c1   : > { %2552 = vrot.lane.b32.xlu1 %v2535_v39, %s9029_s24  ;;  %1852 = vrot.lane.b32.xlu0 %v1850_v41, %s5604_s29 }
 0x1c3   : > { %v6377_v54 = vpop.permute.xlu0 %1331  ;;  %v6379_v55 = vpop.permute.xlu1 %1329 }
 0x1c5   : > { %2137 = vrot.lane.b32.xlu1 %v2125_v47, %s5596_s3  ;;  %2139 = vrot.lane.b32.xlu0 %v2126_v63, %s5596_s3 }
 0x1c7   : > { %v6383_v5 = vpop.permute.xlu0 %1378  ;;  %v6385_v46 = vpop.permute.xlu1 %1376 }
 0x1ca   : > { %v4766_v3 = vpop.f32.mrb[0].mxu0 }
 0x1cb   : > { %v6388_v16 = vsub.f32 %v6080_v51, %v4766_v3  ;;  %v584_v26 = vpop.f32.mrb[1].mxu0  ;;  %v6393_v41 = vpop.permute.xlu0 %965 }
 0x1cc   : > { %v6391_v39 = vsub.f32 %v5986_v14, %v584_v26  ;;  %v6395_v33 = vpop.permute.xlu1 %963 }
 0x1cd   : > { %9137 = vst [vmem:[#allocation40_spill] sm:$0xff] %v6395_v33  ;;  %v596_v63 = vmul.f32 %v6388_v16, %v6388_v16  ;;  %v5288_v33 = vld [vmem:[#allocation2 + $0x30] sm:$0x1] }
 0x1ce   : > { %v595_v47 = vmul.f32 %v6391_v39, %v6391_v39 }
 0x1cf   : > { %v6401_v19 = vpop.permute.xlu0 %1425 }
 0x1d0   : > { %4799 = vmatprep.mubr.f32.mxu1 %v595_v47  ;;  %v6403_v15 = vpop.permute.xlu1 %1423 }
 0x1d1   : > { %4800 = vmatmul.mubr.f32.vlgmr.msra.gmra.mrb[0].mxu1 %v596_v63 }
 0x1d2   : > { %5041 = vmatpush3.bf16.msra.mxu1 %v5971_v6 }
 0x1d3   : > { %5043 = vmatprep.subr.bf16.mxu1 %v5973_v8  ;;  %v6407_v14 = vpop.permute.xlu0 %1010 }
 0x1d4   : > { %9138 = vst [vmem:[#allocation41_spill] sm:$0xff] %v6407_v14  ;;  %v6409_v51 = vpop.permute.xlu1 %1012 }
 0x1d5   : > { %9139 = vst [vmem:[#allocation42_spill] sm:$0xff] %v6409_v51  ;;  %v2618_v51 = vld [vmem:[#allocation2 + $0x30] sm:$0x3f] }
 0x1d6   : > { %5045 = vmatpush3.bf16.msra.mxu1 %v5973_v8 }
 0x1d7   : > { %5047 = vmatprep.subr.bf16.mxu1 %v5983_v12  ;;  %v6415_v26 = vpop.permute.xlu0 %753 }
 0x1d8   : > { %v6413_v3 = vpop.permute.xlu1 %755  ;;  %9141 = vst [vmem:[#allocation44_spill] sm:$0xff] %v6415_v26 }
 0x1d9   : > { %9140 = vst [vmem:[#allocation43_spill] sm:$0xff] %v6413_v3 }
 0x1da   : > { %5049 = vmatpush3.bf16.msra.mxu1 %v5983_v12 }
 0x1db   : > { %5051 = vmatprep.subr.bf16.mxu1 %v6006_v22  ;;  %v6421_v63 = vpop.permute.xlu0 %1470 }
 0x1dc   : > { %v6419_v47 = vpop.permute.xlu1 %1472 }
 0x1de   : > { %5053 = vmatpush3.bf16.msra.mxu1 %v6006_v22 }
 0x1df   : > { %5055 = vmatprep.subr.bf16.mxu1 %v6019_v28  ;;  %v6427_v8 = vpop.permute.xlu0 %1059 }
 0x1e0   : > { %v6425_v11 = vpop.permute.xlu1 %1057  ;;  %9143 = vst [vmem:[#allocation46_spill] sm:$0xff] %v6427_v8 }
 0x1e1   : > { %9142 = vst [vmem:[#allocation45_spill] sm:$0xff] %v6425_v11  ;;  %v1842_v11 = vld [vmem:[#allocation2 + $0x8] sm:$0xfc] }
 0x1e2   : > { %5057 = vmatpush3.bf16.msra.mxu1 %v6019_v28 }
 0x1e3   : > { %5059 = vmatprep.subr.bf16.mxu1 %v6034_v34  ;;  %v6433_v12 = vpop.permute.xlu0 %1537 }
 0x1e4   : > { %v6431_v6 = vpop.permute.xlu1 %1535 }
 0x1e6   : > { %5061 = vmatpush3.bf16.msra.mxu1 %v6034_v34 }
 0x1e7   : > { %5063 = vmatprep.subr.bf16.mxu1 %v6048_v40  ;;  %v6439_v22 = vpop.permute.xlu0 %803 }
 0x1e8   : > { %v6437_v13 = vpop.permute.xlu1 %801  ;;  %9145 = vst [vmem:[#allocation48_spill] sm:$0xff] %v6439_v22 }
 0x1e9   : > { %9144 = vst [vmem:[#allocation47_spill] sm:$0xff] %v6437_v13 }
 0x1ea   : > { %5065 = vmatpush3.bf16.msra.mxu1 %v6048_v40 }
 0x1eb   : > { %5067 = vmatprep.subr.bf16.mxu1 %v6060_v45  ;;  %v6445_v28 = vpop.permute.xlu0 %1106 }
 0x1ec   : > { %v6443_v7 = vpop.permute.xlu1 %1104  ;;  %9147 = vst [vmem:[#allocation50_spill] sm:$0xff] %v6445_v28 }
 0x1ed   : > { %9146 = vst [vmem:[#allocation49_spill] sm:$0xff] %v6443_v7 }
 0x1ee   : > { %5069 = vmatpush3.bf16.msra.mxu1 %v6060_v45  ;;  %v1841_v45 = vld [vmem:[#allocation2] sm:$0xfc] }
 0x1ef   : > { %v6450_v50 = vpop.permute.xlu0 %1584 }
 0x1f0   : > { %v6448_v60 = vpop.permute.xlu1 %1582 }
 0x1f3   : > { %v6454_v27 = vpop.permute.xlu0 %851 }
 0x1f4   : > { %v6452_v34 = vpop.permute.xlu1 %849  ;;  %9149 = vst [vmem:[#allocation52_spill] sm:$0xff] %v6454_v27 }
 0x1f5   : > { %9148 = vst [vmem:[#allocation51_spill] sm:$0xff] %v6452_v34 }
 0x1f7   : > { %v6458_v13 = vpop.permute.xlu0 %1631 }
 0x1f8   : > { %v6456_v35 = vpop.permute.xlu1 %1629 }
 0x1fb   : > { %v6462_v22 = vpop.permute.xlu0 %899 }
 0x1fc   : > { %v6460_v40 = vpop.permute.xlu1 %897  ;;  %9151 = vst [vmem:[#allocation54_spill] sm:$0xff] %v6462_v22 }
 0x1fd   : > { %9150 = vst [vmem:[#allocation53_spill] sm:$0xff] %v6460_v40 }
 0x1ff   : > { %v6466_v28 = vpop.permute.xlu0 %1678 }
 0x200   : > { %v6464_v7 = vpop.permute.xlu1 %1676 }
 0x203   : > { %v6470_v26 = vpop.permute.xlu0 %1866 }
 0x204   : > { %v6468_v8 = vpop.permute.xlu1 %2311  ;;  %9153 = vst [vmem:[#allocation56_spill] sm:$0xff] %v6470_v26  ;;  %v1869_v34 = vmul.f32 %v6470_v26, %v1841_v45  ;;  %v1870_v27 = vmul.f32 %v6470_v26, %v1842_v11 }
 0x205   : > { %9152 = vst [vmem:[#allocation55_spill] sm:$0xff] %v6468_v8 }
 0x206   : > { %1881 = vrot.lane.b32.xlu1 %v1869_v34, %s5602_s14  ;;  %1883 = vrot.lane.b32.xlu0 %v1870_v27, %s5602_s14  ;;  %v2623_v34 = vrot.slane %v6273_v52, %v6099_v56 }
 0x207   : > { %v6478_v22 = vpop.permute.xlu0 %2169 }
 0x208   : > { %v6476_v40 = vpop.permute.xlu1 %2574  ;;  %9155 = vst [vmem:[#allocation58_spill] sm:$0xff] %v6478_v22  ;;  %v2172_v27 = vmul.f32 %v6478_v22, %v6343_v61 }
 0x209   : > { %9154 = vst [vmem:[#allocation57_spill] sm:$0xff] %v6476_v40  ;;  %v2581_v3 = vmul.f32 %v6476_v40, %v6313_v30  ;;  %v2582_v8 = vmul.f32 %v6476_v40, %v6325_v44  ;;  %v2173_v30 = vmul.f32 %v6478_v22, %v6351_v2  ;;  %v2619_v44 = vld [vmem:[#allocation2 + $0x38] sm:$0x3f] }
 0x20b   : > { %2597 = vrot.lane.b32.xlu1 %v2581_v3, %s5605_s28  ;;  %2599 = vrot.lane.b32.xlu0 %v2582_v8, %s5605_s28  ;;  %v6492_v14 = vpop.permute.xlu0 %2639 }
 0x20c   : > { %v6490_v26 = vpop.permute.xlu1 %2345  ;;  %9157 = vst [vmem:[#allocation60_spill] sm:$0xff] %v6492_v14  ;;  %v2646_v8 = vmul.f32 %v6492_v14, %v2618_v51  ;;  %v2647_v52 = vmul.f32 %v6492_v14, %v2619_v44 }
 0x20d   : > { %9156 = vst [vmem:[#allocation59_spill] sm:$0xff] %v6490_v26 }
 0x20f   : > { %2625 = vrot.lane.b32.xlu1 %v2623_v34, %s5604_s29  ;;  %2184 = vrot.lane.b32.xlu0 %v2172_v27, %s9029_s24  ;;  %v6505_v26 = vpop.permute.xlu0 %2216 }
 0x210   : > { %v6499_v3 = vpop.permute.xlu1 %1913  ;;  %9159 = vst [vmem:[#allocation62_spill] sm:$0xff] %v6505_v26  ;;  %v2219_v22 = vmul.f32 %v6505_v26, %v6343_v61 }
 0x211   : > { %9158 = vst [vmem:[#allocation61_spill] sm:$0xff] %v6499_v3  ;;  %v1916_v56 = vmul.f32 %v6499_v3, %v1841_v45  ;;  %v1917_v27 = vmul.f32 %v6499_v3, %v1842_v11 }
 0x213   : > { %2186 = vrot.lane.b32.xlu1 %v2173_v30, %s9029_s24  ;;  %2662 = vrot.lane.b32.xlu0 %v2646_v8, %s5602_s14  ;;  %v6514_v30 = vpop.permute.xlu0 %2686  ;;  %v2220_v8 = vmul.f32 %v6505_v26, %v6351_v2 }
 0x214   : > { %v6507_v34 = vpop.permute.xlu1 %2379  ;;  %9161 = vst [vmem:[#allocation64_spill] sm:$0xff] %v6514_v30 }
 0x215   : > { %9160 = vst [vmem:[#allocation63_spill] sm:$0xff] %v6507_v34  ;;  %v2693_v34 = vmul.f32 %v6514_v30, %v2618_v51 }
 0x217   : > { %2664 = vrot.lane.b32.xlu1 %v2647_v52, %s5602_s14  ;;  %1928 = vrot.lane.b32.xlu0 %v1916_v56, %s5596_s3  ;;  %v2694_v56 = vmul.f32 %v6514_v30, %v2619_v44  ;;  %v6527_v52 = vpop.permute.xlu0 %2733 }
 0x218   : > { %v6521_v14 = vpop.permute.xlu1 %1961  ;;  %9163 = vst [vmem:[#allocation66_spill] sm:$0xff] %v6527_v52 }
 0x219   : > { %9162 = vst [vmem:[#allocation65_spill] sm:$0xff] %v6521_v14  ;;  %v1964_v61 = vmul.f32 %v6521_v14, %v1841_v45  ;;  %v1965_v2 = vmul.f32 %v6521_v14, %v1842_v11 }
 0x21b   : > { %1930 = vrot.lane.b32.xlu1 %v1917_v27, %s5596_s3  ;;  %2231 = vrot.lane.b32.xlu0 %v2219_v22, %s5605_s28  ;;  %v2740_v22 = vmul.f32 %v6527_v52, %v2618_v51 }
 0x21c   : > { %v6533_v27 = vpop.permute.xlu1 %2009 }
 0x21d   : > { %9164 = vst [vmem:[#allocation67_spill] sm:$0xff] %v6533_v27 }
 0x21f   : > { %2233 = vrot.lane.b32.xlu1 %v2220_v8, %s5605_s28  ;;  %2709 = vrot.lane.b32.xlu0 %v2693_v34, %s5596_s3  ;;  %v2741_v8 = vmul.f32 %v6527_v52, %v2619_v44  ;;  %v2012_v34 = vmul.f32 %v6533_v27, %v1841_v45  ;;  %v4613_v44 = vld [vmem:[%s8951_s1] ss:$0 sm:$0xff] }
 0x223   : > { %2711 = vrot.lane.b32.xlu1 %v2694_v56, %s5596_s3  ;;  %1976 = vrot.lane.b32.xlu0 %v1964_v61, %s9029_s24  ;;  %v2013_v56 = vmul.f32 %v6533_v27, %v1842_v11  ;;  %v4614_v11 = vld [vmem:[%s8952_s2] ss:$0 sm:$0xff] }
 0x227   : > { %1978 = vrot.lane.b32.xlu1 %v1965_v2, %s9029_s24  ;;  %2756 = vrot.lane.b32.xlu0 %v2740_v22, %s9029_s24 }
 0x22b   : > { %2758 = vrot.lane.b32.xlu1 %v2741_v8, %s9029_s24  ;;  %2024 = vrot.lane.b32.xlu0 %v2012_v34, %s5605_s28  ;;  %s9395_s24 = smov 72  }
 0x22f   : > { %2026 = vrot.lane.b32.xlu1 %v2013_v56, %s5605_s28 }
 0x2a4   : > { %v4801_v61 = vpop.f32.mrb[0].mxu1 }
 0x2a5   : > { %v669_v51 = vadd.f32 1e-06, %v4801_v61  ;;  %v663_v14 = vpop.f32.mrb[1].mxu1  ;;  %v6559_v61 = vpop.permute.xlu0 %2780 }
 0x2a6   : > { %v664_v30 = vadd.f32 1e-06, %v663_v14  ;;  %9167 = vst [vmem:[#allocation70_spill] sm:$0xff] %v6559_v61 }
 0x2a7   : > { %5279 = vrsqrt.f32 %v669_v51 }
 0x2a8   : > { %5281 = vrsqrt.f32 %v664_v30 }
 0x2b1   : > { %v5280_v2 = vpop.eup %5279 }
 0x2b2   : > { %v5282_v45 = vpop.eup %5281  ;;  %v675_v22 = vmul.f32 %v5280_v2, %v6388_v16  ;;  %v6561_v16 = vpop.permute.xlu0 %2456 }
 0x2b3   : > { %v674_v8 = vmul.f32 %v5282_v45, %v6391_v39  ;;  %9168 = vst [vmem:[#allocation71_spill] sm:$0xff] %v6561_v16 }
 0x2b4   : > { %v684_v34 = vmul.f32 %v4613_v44, %v675_v22 }
 0x2b5   : > { %v683_v14 = vmul.f32 %v4613_v44, %v674_v8 }
 0x2b6   : > { %v6551_v56 = vadd.f32 %v4614_v11, %v684_v34  ;;  %v6563_v51 = vpop.permute.xlu0 %2061 }
 0x2b7   : > { %v6555_v30 = vadd.f32 %v4614_v11, %v683_v14  ;;  %9169 = vst [vmem:[#allocation72_spill] sm:$0xff] %v6563_v51 }
 0x2b8   : > { %9165 = vst [vmem:[#allocation68_spill] sm:$0xff] %v6551_v56  ;;  %698 = vrot.lane.b32.xlu0 %v6551_v56, %s5594_s30 }
 0x2b9   : > { %9166 = vst [vmem:[#allocation69_spill] sm:$0xff] %v6555_v30 }
 0x2ba   : > { %v6565_v2 = vpop.permute.xlu0 %2503 }
 0x2bb   : > { %9170 = vst [vmem:[#allocation73_spill] sm:$0xff] %v6565_v2 }
 0x2bc   : > { %696 = vrot.lane.b32.xlu0 %v6555_v30, %s5594_s30 }
 0x2be   : > { %v6567_v39 = vpop.permute.xlu0 %2090 }
 0x2bf   : > { %9171 = vst [vmem:[#allocation74_spill] sm:$0xff] %v6567_v39 }
 0x2c2   : > { %v6569_v45 = vpop.permute.xlu0 %2550 }
 0x2c3   : > { %9172 = vst [vmem:[#allocation75_spill] sm:$0xff] %v6569_v45 }
 0x2c6   : > { %v6571_v44 = vpop.permute.xlu0 %1852 }
 0x2c7   : > { %9173 = vst [vmem:[#allocation76_spill] sm:$0xff] %v6571_v44 }
 0x2ca   : > { %v6573_v22 = vpop.permute.xlu0 %2139 }
 0x2cb   : > { %9174 = vst [vmem:[#allocation77_spill] sm:$0xff] %v6573_v22 }
 0x2ce   : > { %v6575_v11 = vpop.permute.xlu0 %1883 }
 0x2cf   : > { %9175 = vst [vmem:[#allocation78_spill] sm:$0xff] %v6575_v11 }
 0x2d2   : > { %v6577_v8 = vpop.permute.xlu0 %2599 }
 0x2d3   : > { %9176 = vst [vmem:[#allocation79_spill] sm:$0xff] %v6577_v8 }
 0x2d6   : > { %v6579_v34 = vpop.permute.xlu0 %2184 }
 0x2d7   : > { %9177 = vst [vmem:[#allocation80_spill] sm:$0xff] %v6579_v34 }
 0x2da   : > { %v6581_v14 = vpop.permute.xlu0 %2662 }
 0x2db   : > { %9178 = vst [vmem:[#allocation81_spill] sm:$0xff] %v6581_v14 }
 0x2de   : > { %v6583_v56 = vpop.permute.xlu0 %1928 }
 0x2df   : > { %9179 = vst [vmem:[#allocation82_spill] sm:$0xff] %v6583_v56 }
 0x2e2   : > { %v6585_v30 = vpop.permute.xlu0 %2231 }
 0x2e3   : > { %9180 = vst [vmem:[#allocation83_spill] sm:$0xff] %v6585_v30 }
 0x2e6   : > { %v6587_v2 = vpop.permute.xlu0 %2709 }
 0x2e7   : > { %9181 = vst [vmem:[#allocation84_spill] sm:$0xff] %v6587_v2 }
 0x2ea   : > { %v6589_v39 = vpop.permute.xlu0 %1976 }
 0x2eb   : > { %9182 = vst [vmem:[#allocation85_spill] sm:$0xff] %v6589_v39 }
 0x2ee   : > { %v6591_v45 = vpop.permute.xlu0 %2756 }
 0x2ef   : > { %9183 = vst [vmem:[#allocation86_spill] sm:$0xff] %v6591_v45 }
 0x2f2   : > { %v6593_v44 = vpop.permute.xlu0 %2024 }
 0x2f3   : > { %9184 = vst [vmem:[#allocation87_spill] sm:$0xff] %v6593_v44 }
 0x32a   : > { %v699_v11 = vpop.permute.xlu0 %698 }
 0x32b   : > { %706 = vst.msk [vmem:[#allocation2 + $0x20] sm:$0xff] %vm702_vm0, %v699_v11 }
 0x32c   : > { %707 = vst.msk [vmem:[#allocation2 + $0x28] sm:$0xff] %vm704_vm1, %v699_v11 }
 0x32e   : > { %v697_v8 = vpop.permute.xlu0 %696 }
 0x32f   : > { %703 = vst.msk [vmem:[#allocation2 + $0x10] sm:$0xff] %vm702_vm0, %v697_v8 }
 0x330   : > { %705 = vst.msk [vmem:[#allocation2 + $0x18] sm:$0xff] %vm704_vm1, %v697_v8 }
 0x332   : > { %v6599_v30 = vld [vmem:[#allocation2 + $0x20] sm:$0xff] }
 0x333   : > { %v6601_v2 = vld [vmem:[#allocation2 + $0x28] sm:$0xff]  ;;  %v1311_v44 = vmul.f32 %v6145_v17, %v6599_v30  ;;  %v1358_v8 = vmul.f32 %v6153_v23, %v6599_v30  ;;  %v6615_v56 = vld [vmem:[#allocation2 + $0x20] sm:$0x7f]  ;;  %v1189_v51 = vmul.f32 %v6599_v30, %v6171_v38 }
 0x334   : > { %v1312_v45 = vmul.f32 %v6145_v17, %v6601_v2  ;;  %v1359_v11 = vmul.f32 %v6153_v23, %v6601_v2  ;;  %v6613_v39 = vld [vmem:[#allocation2 + $0x28] sm:$0x7f]  ;;  %v1156_v34 = vmul.f32 %v6601_v2, %v6161_v31 }
 0x335   : > { %1325 = vrot.lane.b32.xlu1 %v1311_v44, %s5600_s26  ;;  %v956_v14 = vmul.f32 %v6149_v21, %v6613_v39  ;;  %v6625_v44 = vpop.permute.xlu1 %2419  ;;  %v6653_v16 = vld [vmem:[#allocation2 + $0x28] sm:$0x3f] }
 0x336   : > { %1327 = vrot.lane.b32.xlu0 %v1312_v45, %s5600_s26  ;;  %v955_v45 = vmul.f32 %v6149_v21, %v6615_v56  ;;  %9185 = vst [vmem:[#allocation88_spill] sm:$0xff] %v6625_v44  ;;  %v1049_v44 = vmul.f32 %v6185_v49, %v6615_v56 }
 0x339   : > { %1372 = vrot.lane.b32.xlu1 %v1358_v8, %s5601_s22  ;;  %v1406_v8 = vmul.f32 %v6163_v32, %v6601_v2  ;;  %v6637_v22 = vpop.permute.xlu1 %2458 }
 0x33a   : > { %1374 = vrot.lane.b32.xlu0 %v1359_v11, %s5601_s22  ;;  %v1155_v11 = vmul.f32 %v6599_v30, %v6161_v31  ;;  %9186 = vst [vmem:[#allocation89_spill] sm:$0xff] %v6637_v22  ;;  %v1453_v22 = vmul.f32 %v6183_v48, %v6601_v2 }
 0x33d   : > { %971 = vrot.lane.b32.xlu1 %v955_v45, %s5600_s26  ;;  %v1002_v45 = vmul.f32 %v6169_v37, %v6615_v56 }
 0x33e   : > { %973 = vrot.lane.b32.xlu0 %v956_v14, %s5600_s26  ;;  %v1405_v14 = vmul.f32 %v6163_v32, %v6599_v30 }
 0x341   : > { %1165 = vrot.lane.b32.xlu1 %v1155_v11, %s5600_s26  ;;  %v6647_v11 = vpop.permute.xlu1 %2265 }
 0x342   : > { %1167 = vrot.lane.b32.xlu0 %v1156_v34, %s5600_s26  ;;  %v1003_v34 = vmul.f32 %v6169_v37, %v6613_v39  ;;  %9187 = vst [vmem:[#allocation90_spill] sm:$0xff] %v6647_v11 }
 0x345   : > { %1419 = vrot.lane.b32.xlu1 %v1405_v14, %s5602_s14  ;;  %v6655_v14 = vld [vmem:[#allocation2 + $0x20] sm:$0x3f]  ;;  %v6663_v11 = vpop.permute.xlu1 %2505 }
 0x346   : > { %1421 = vrot.lane.b32.xlu0 %v1406_v8, %s5602_s14  ;;  %v1190_v8 = vmul.f32 %v6601_v2, %v6171_v38  ;;  %9188 = vst [vmem:[#allocation91_spill] sm:$0xff] %v6663_v11 }
 0x349   : > { %1020 = vrot.lane.b32.xlu1 %v1003_v34, %s5601_s22  ;;  %v745_v34 = vmul.f32 %v6177_v42, %v6655_v14 }
 0x34a   : > { %1018 = vrot.lane.b32.xlu0 %v1002_v45, %s5601_s22  ;;  %v746_v45 = vmul.f32 %v6177_v42, %v6653_v16 }
 0x34d   : > { %1201 = vrot.lane.b32.xlu1 %v1190_v8, %s5601_s22  ;;  %v6673_v8 = vpop.permute.xlu1 %2092 }
 0x34e   : > { %1199 = vrot.lane.b32.xlu0 %v1189_v51, %s5601_s22  ;;  %v1452_v51 = vmul.f32 %v6183_v48, %v6599_v30  ;;  %9189 = vst [vmem:[#allocation92_spill] sm:$0xff] %v6673_v8  ;;  %v793_v8 = vmul.f32 %v6209_v62, %v6655_v14 }
 0x351   : > { %763 = vrot.lane.b32.xlu1 %v746_v45, %s5600_s26  ;;  %v1050_v45 = vmul.f32 %v6185_v49, %v6613_v39  ;;  %v6685_v11 = vpop.permute.xlu1 %2552 }
 0x352   : > { %761 = vrot.lane.b32.xlu0 %v745_v34, %s5600_s26  ;;  %v1223_v34 = vmul.f32 %v6599_v30, %v6191_v53  ;;  %9190 = vst [vmem:[#allocation93_spill] sm:$0xff] %v6685_v11 }
 0x355   : > { %1468 = vrot.lane.b32.xlu1 %v1453_v22, %s5603_s15  ;;  %v1224_v22 = vmul.f32 %v6601_v2, %v6191_v53 }
 0x356   : > { %1466 = vrot.lane.b32.xlu0 %v1452_v51, %s5603_s15  ;;  %v1517_v51 = vmul.f32 %v6197_v57, %v6599_v30 }
 0x359   : > { %1065 = vrot.lane.b32.xlu1 %v1049_v44, %s5602_s14  ;;  %v1518_v44 = vmul.f32 %v6197_v57, %v6601_v2 }
 0x35a   : > { %1067 = vrot.lane.b32.xlu0 %v1050_v45, %s5602_s14  ;;  %v6695_v45 = vpop.permute.xlu1 %2137 }
 0x35b   : > { %9191 = vst [vmem:[#allocation94_spill] sm:$0xff] %v6695_v45  ;;  %v1564_v45 = vmul.f32 %v6223_v10, %v6599_v30 }
 0x35d   : > { %1233 = vrot.lane.b32.xlu1 %v1223_v34, %s5602_s14  ;;  %v794_v34 = vmul.f32 %v6209_v62, %v6653_v16 }
 0x35e   : > { %1235 = vrot.lane.b32.xlu0 %v1224_v22, %s5602_s14  ;;  %v1096_v22 = vmul.f32 %v6211_v0, %v6615_v56  ;;  %v6707_v11 = vpop.permute.xlu1 %1881 }
 0x35f   : > { %9192 = vst [vmem:[#allocation95_spill] sm:$0xff] %v6707_v11 }
 0x361   : > { %1531 = vrot.lane.b32.xlu1 %v1517_v51, %s5600_s26  ;;  %v1097_v51 = vmul.f32 %v6211_v0, %v6613_v39 }
 0x362   : > { %1533 = vrot.lane.b32.xlu0 %v1518_v44, %s5600_s26  ;;  %v1257_v44 = vmul.f32 %v6599_v30, %v6217_v4 }
 0x365   : > { %809 = vrot.lane.b32.xlu1 %v793_v8, %s5601_s22  ;;  %v1258_v8 = vmul.f32 %v6601_v2, %v6217_v4 }
 0x366   : > { %811 = vrot.lane.b32.xlu0 %v794_v34, %s5601_s22  ;;  %v6717_v34 = vpop.permute.xlu1 %2597 }
 0x367   : > { %9193 = vst [vmem:[#allocation96_spill] sm:$0xff] %v6717_v34  ;;  %v889_v34 = vmul.f32 %v6245_v29, %v6655_v14 }
 0x369   : > { %1112 = vrot.lane.b32.xlu1 %v1096_v22, %s5603_s15  ;;  %v1565_v22 = vmul.f32 %v6223_v10, %v6601_v2 }
 0x36a   : > { %1114 = vrot.lane.b32.xlu0 %v1097_v51, %s5603_s15  ;;  %v841_v51 = vmul.f32 %v6231_v18, %v6655_v14  ;;  %v6729_v11 = vpop.permute.xlu1 %2625 }
 0x36b   : > { %9194 = vst [vmem:[#allocation97_spill] sm:$0xff] %v6729_v11  ;;  %v6751_v11 = vld [vmem:[#allocation2 + $0x18] sm:$0xfe] }
 0x36c   : > { %9196 = vst [vmem:[#allocation99_spill] sm:$0xff] %v6751_v11  ;;  %v1357_v27 = vmul.f32 %v6153_v23, %v6751_v11 }
 0x36d   : > { %1267 = vrot.lane.b32.xlu1 %v1257_v44, %s5603_s15  ;;  %v842_v44 = vmul.f32 %v6231_v18, %v6653_v16 }
 0x36e   : > { %1269 = vrot.lane.b32.xlu0 %v1258_v8, %s5603_s15  ;;  %v1611_v8 = vmul.f32 %v6237_v25, %v6599_v30 }
 0x371   : > { %1578 = vrot.lane.b32.xlu1 %v1564_v45, %s5601_s22  ;;  %v1612_v45 = vmul.f32 %v6237_v25, %v6601_v2 }
 0x372   : > { %1580 = vrot.lane.b32.xlu0 %v1565_v22, %s5601_s22  ;;  %v6739_v22 = vpop.permute.xlu1 %2186 }
 0x373   : > { %9195 = vst [vmem:[#allocation98_spill] sm:$0xff] %v6739_v22 }
 0x375   : > { %857 = vrot.lane.b32.xlu1 %v841_v51, %s5602_s14  ;;  %v890_v51 = vmul.f32 %v6245_v29, %v6653_v16 }
 0x376   : > { %859 = vrot.lane.b32.xlu0 %v842_v44, %s5602_s14  ;;  %v1658_v44 = vmul.f32 %v6251_v36, %v6599_v30  ;;  %v6755_v22 = vpop.permute.xlu1 %2664 }
 0x377   : > { %9198 = vst [vmem:[#allocation101_spill] sm:$0xff] %v6755_v22  ;;  %v6771_v22 = vld [vmem:[#allocation2 + $0x10] sm:$0xff] }
 0x378   : > { %9200 = vst [vmem:[#allocation103_spill] sm:$0xff] %v6771_v22 }
 0x379   : > { %1625 = vrot.lane.b32.xlu1 %v1611_v8, %s5602_s14  ;;  %v1659_v8 = vmul.f32 %v6251_v36, %v6601_v2 }
 0x37a   : > { %1627 = vrot.lane.b32.xlu0 %v1612_v45, %s5602_s14  ;;  %v6753_v45 = vld [vmem:[#allocation2 + $0x10] sm:$0xfe]  ;;  %v6765_v61 = vpop.permute.xlu1 %1930 }
 0x37b   : > { %9197 = vst [vmem:[#allocation100_spill] sm:$0xff] %v6753_v45  ;;  %9199 = vst [vmem:[#allocation102_spill] sm:$0xff] %v6765_v61 }
 0x37d   : > { %905 = vrot.lane.b32.xlu1 %v889_v34, %s5603_s15  ;;  %v1310_v34 = vmul.f32 %v6145_v17, %v6751_v11 }
 0x37e   : > { %907 = vrot.lane.b32.xlu0 %v890_v51, %s5603_s15  ;;  %v1309_v51 = vmul.f32 %v6145_v17, %v6753_v45 }
 0x381   : > { %1672 = vrot.lane.b32.xlu1 %v1658_v44, %s5603_s15  ;;  %v1356_v44 = vmul.f32 %v6153_v23, %v6753_v45 }
 0x382   : > { %1674 = vrot.lane.b32.xlu0 %v1659_v8, %s5603_s15  ;;  %v6773_v8 = vld [vmem:[#allocation2 + $0x18] sm:$0xff] }
 0x383   : > { %9201 = vst [vmem:[#allocation104_spill] sm:$0xff] %v6773_v8  ;;  %v954_v17 = vmul.f32 %v6149_v21, %v6773_v8  ;;  %v1154_v23 = vmul.f32 %v6161_v31, %v6773_v8 }
 0x385   : > { %1321 = vrot.lane.b32.xlu1 %v1309_v51, %s5600_s26  ;;  %v6781_v51 = vpop.permute.xlu1 %2233 }
 0x386   : > { %1323 = vrot.lane.b32.xlu0 %v1310_v34, %s5600_s26  ;;  %v953_v34 = vmul.f32 %v6149_v21, %v6771_v22  ;;  %9202 = vst [vmem:[#allocation105_spill] sm:$0xff] %v6781_v51  ;;  %v1404_v21 = vmul.f32 %v6163_v32, %v6751_v11 }
 0x389   : > { %1368 = vrot.lane.b32.xlu1 %v1356_v44, %s5601_s22  ;;  %v6789_v61 = vpop.permute.xlu1 %2711  ;;  %v1403_v44 = vmul.f32 %v6163_v32, %v6753_v45  ;;  %v1188_v32 = vmul.f32 %v6171_v38, %v6773_v8 }
 0x38a   : > { %1370 = vrot.lane.b32.xlu0 %v1357_v27, %s5601_s22  ;;  %v1153_v27 = vmul.f32 %v6161_v31, %v6771_v22  ;;  %9203 = vst [vmem:[#allocation106_spill] sm:$0xff] %v6789_v61  ;;  %v1000_v31 = vmul.f32 %v6169_v37, %v6771_v22 }
 0x38d   : > { %967 = vrot.lane.b32.xlu1 %v953_v34, %s5600_s26  ;;  %v1001_v34 = vmul.f32 %v6169_v37, %v6773_v8  ;;  %v743_v37 = vmul.f32 %v6177_v42, %v6771_v22 }
 0x38e   : > { %969 = vrot.lane.b32.xlu0 %v954_v17, %s5600_s26  ;;  %v6799_v17 = vpop.permute.xlu1 %1978 }
 0x38f   : > { %9204 = vst [vmem:[#allocation107_spill] sm:$0xff] %v6799_v17 }
 0x391   : > { %1161 = vrot.lane.b32.xlu1 %v1153_v27, %s5600_s26 }
 0x392   : > { %1163 = vrot.lane.b32.xlu0 %v1154_v23, %s5600_s26  ;;  %v1187_v23 = vmul.f32 %v6171_v38, %v6771_v22  ;;  %v6811_v27 = vpop.permute.xlu1 %2758  ;;  %v1451_v38 = vmul.f32 %v6183_v48, %v6751_v11  ;;  %v887_v11 = vmul.f32 %v6245_v29, %v6771_v22 }
 0x393   : > { %9205 = vst [vmem:[#allocation108_spill] sm:$0xff] %v6811_v27 }
 0x395   : > { %1415 = vrot.lane.b32.xlu1 %v1403_v44, %s5602_s14 }
 0x396   : > { %1417 = vrot.lane.b32.xlu0 %v1404_v21, %s5602_s14  ;;  %v744_v21 = vmul.f32 %v6177_v42, %v6773_v8  ;;  %v6821_v44 = vpop.permute.xlu1 %2026  ;;  %v1047_v42 = vmul.f32 %v6185_v49, %v6771_v22 }
 0x397   : > { %9206 = vst [vmem:[#allocation109_spill] sm:$0xff] %v6821_v44  ;;  %v6849_v44 = vld [vmem:[#allocation2 + $0x18] sm:$0xfc] }
 0x398   : > { %v1516_v27 = vmul.f32 %v6197_v57, %v6849_v44 }
 0x399   : > { %1016 = vrot.lane.b32.xlu1 %v1001_v34, %s5601_s22 }
 0x39a   : > { %1014 = vrot.lane.b32.xlu0 %v1000_v31, %s5601_s22  ;;  %v1450_v31 = vmul.f32 %v6183_v48, %v6753_v45  ;;  %v888_v45 = vmul.f32 %v6245_v29, %v6773_v8 }
 0x39d   : > { %1197 = vrot.lane.b32.xlu1 %v1188_v32, %s5601_s22  ;;  %v1048_v32 = vmul.f32 %v6185_v49, %v6773_v8 }
 0x39e   : > { %1195 = vrot.lane.b32.xlu0 %v1187_v23, %s5601_s22 }
 0x3a1   : > { %759 = vrot.lane.b32.xlu1 %v744_v21, %s5600_s26 }
 0x3a2   : > { %757 = vrot.lane.b32.xlu0 %v743_v37, %s5600_s26  ;;  %v1221_v37 = vmul.f32 %v6191_v53, %v6771_v22 }
 0x3a5   : > { %1464 = vrot.lane.b32.xlu1 %v1451_v38, %s5603_s15  ;;  %v1222_v38 = vmul.f32 %v6191_v53, %v6773_v8 }
 0x3a6   : > { %1462 = vrot.lane.b32.xlu0 %v1450_v31, %s5603_s15  ;;  %v6847_v31 = vld [vmem:[#allocation2 + $0x10] sm:$0xfc] }
 0x3a7   : > { %v6829_v34 = vpop.permute.xlu1 %1325  ;;  %v1656_v29 = vmul.f32 %v6251_v36, %v6847_v31 }
 0x3a8   : > { %v6831_v23 = vpop.permute.xlu0 %1327 }
 0x3a9   : > { %1061 = vrot.lane.b32.xlu1 %v1047_v42, %s5602_s14 }
 0x3aa   : > { %1063 = vrot.lane.b32.xlu0 %v1048_v32, %s5602_s14  ;;  %v1515_v32 = vmul.f32 %v6197_v57, %v6847_v31 }
 0x3ab   : > { %v6839_v21 = vpop.permute.xlu1 %1372 }
 0x3ac   : > { %v6841_v48 = vpop.permute.xlu0 %1374 }
 0x3ad   : > { %1229 = vrot.lane.b32.xlu1 %v1221_v37, %s5602_s14  ;;  %v791_v37 = vmul.f32 %v6209_v62, %v6771_v22 }
 0x3ae   : > { %1231 = vrot.lane.b32.xlu0 %v1222_v38, %s5602_s14  ;;  %v792_v38 = vmul.f32 %v6209_v62, %v6773_v8 }
 0x3af   : > { %v6853_v49 = vpop.permute.xlu1 %971 }
 0x3b0   : > { %v6855_v42 = vpop.permute.xlu0 %973 }
 0x3b1   : > { %1527 = vrot.lane.b32.xlu1 %v1515_v32, %s5600_s26  ;;  %v1095_v32 = vmul.f32 %v6211_v0, %v6773_v8 }
 0x3b2   : > { %1529 = vrot.lane.b32.xlu0 %v1516_v27, %s5600_s26  ;;  %v1094_v27 = vmul.f32 %v6211_v0, %v6771_v22 }
 0x3b3   : > { %v6863_v53 = vpop.permute.xlu1 %1165 }
 0x3b4   : > { %v6865_v17 = vpop.permute.xlu0 %1167 }
 0x3b5   : > { %805 = vrot.lane.b32.xlu1 %v791_v37, %s5601_s22  ;;  %v1255_v37 = vmul.f32 %v6217_v4, %v6771_v22 }
 0x3b6   : > { %807 = vrot.lane.b32.xlu0 %v792_v38, %s5601_s22  ;;  %v1256_v38 = vmul.f32 %v6217_v4, %v6773_v8 }
 0x3b7   : > { %v6873_v61 = vpop.permute.xlu1 %1419 }
 0x3b8   : > { %v6875_v57 = vpop.permute.xlu0 %1421 }
 0x3b9   : > { %1108 = vrot.lane.b32.xlu1 %v1094_v27, %s5603_s15  ;;  %v1562_v27 = vmul.f32 %v6223_v10, %v6847_v31 }
 0x3ba   : > { %1110 = vrot.lane.b32.xlu0 %v1095_v32, %s5603_s15  ;;  %v1563_v32 = vmul.f32 %v6223_v10, %v6849_v44 }
 0x3bb   : > { %v6883_v51 = vpop.permute.xlu1 %1020 }
 0x3bc   : > { %v6885_v62 = vpop.permute.xlu0 %1018 }
 0x3bd   : > { %1263 = vrot.lane.b32.xlu1 %v1255_v37, %s5603_s15  ;;  %v839_v37 = vmul.f32 %v6231_v18, %v6771_v22 }
 0x3be   : > { %1265 = vrot.lane.b32.xlu0 %v1256_v38, %s5603_s15  ;;  %v840_v38 = vmul.f32 %v6231_v18, %v6773_v8  ;;  %v5287_v18 = vld [vmem:[#allocation2 + $0x38] sm:$0x1] }
 0x3bf   : > { %v6893_v52 = vpop.permute.xlu1 %1201 }
 0x3c0   : > { %v6895_v0 = vpop.permute.xlu0 %1199 }
 0x3c1   : > { %1574 = vrot.lane.b32.xlu1 %v1562_v27, %s5601_s22  ;;  %v1609_v27 = vmul.f32 %v6237_v25, %v6847_v31 }
 0x3c2   : > { %1576 = vrot.lane.b32.xlu0 %v1563_v32, %s5601_s22  ;;  %v1610_v32 = vmul.f32 %v6237_v25, %v6849_v44  ;;  %v1299_v25 = vmul.f32 %v5288_v33, %v6295_v9  ;;  %v1657_v33 = vmul.f32 %v6251_v36, %v6849_v44  ;;  %v1506_v36 = vmul.f32 %v6323_v43, %v6201_v59 }
 0x3c3   : > { %v6903_v26 = vpop.permute.xlu1 %763 }
 0x3c4   : > { %v6905_v4 = vpop.permute.xlu0 %761  ;;  %v1553_v59 = vadd.f32 %v6433_v12, %v1506_v36  ;;  %v1298_v36 = vmul.f32 %v6295_v9, %v6601_v2 }
 0x3c5   : > { %853 = vrot.lane.b32.xlu1 %v839_v37, %s5602_s14  ;;  %v1300_v37 = vmul.f32 %v5287_v18, %v6295_v9 }
 0x3c6   : > { %855 = vrot.lane.b32.xlu0 %v840_v38, %s5602_s14 }
 0x3c7   : > { %v6913_v3 = vpop.permute.xlu1 %1468 }
 0x3c8   : > { %v6915_v10 = vpop.permute.xlu0 %1466 }
 0x3c9   : > { %1621 = vrot.lane.b32.xlu1 %v1609_v27, %s5602_s14  ;;  %v1335_v27 = vsel %vm765_vm2, %v6379_v55, %v6377_v54  ;;  %v1382_v55 = vsel %vm813_vm3, %v6385_v46, %v6383_v5  ;;  %v1505_v46 = vmul.f32 %v6323_v43, %v6199_v58  ;;  %v1588_v58 = vsel %vm813_vm3, %v6448_v60, %v6450_v50 }
 0x3ca   : > { %1623 = vrot.lane.b32.xlu0 %v1610_v32, %s5602_s14  ;;  %v1347_v32 = vadd.f32 %v6377_v54, %v1300_v37  ;;  %v1346_v8 = vadd.f32 %v1335_v27, %v1299_v25  ;;  %v1429_v25 = vsel %vm861_vm4, %v6403_v15, %v6401_v19  ;;  %v1476_v15 = vsel %vm909_vm5, %v6421_v63, %v6419_v47 }
 0x3cb   : > { %v6924_v40 = vpop.permute.xlu1 %1065  ;;  %v1334_v63 = vsel %vm765_vm2, %v6829_v34, %v6831_v23  ;;  %v1635_v60 = vsel %vm861_vm4, %v6456_v35, %v6458_v13 }
 0x3cc   : > { %v6926_v38 = vpop.permute.xlu0 %1067  ;;  %v1394_v54 = vadd.f32 %v6383_v5, %v1347_v32  ;;  %v1393_v37 = vadd.f32 %v1382_v55, %v1346_v8  ;;  %v1541_v5 = vsel %vm765_vm2, %v6431_v6, %v6433_v12  ;;  %v1600_v12 = vadd.f32 %v6450_v50, %v1553_v59 }
 0x3cd   : > { %901 = vrot.lane.b32.xlu1 %v887_v11, %s5603_s15  ;;  %v1381_v50 = vsel %vm813_vm3, %v6839_v21, %v6841_v48  ;;  %v941_v21 = vmul.f32 %v6287_v1, %v6615_v56  ;;  %v1144_v56 = vmul.f32 %v6601_v2, %v6305_v24 }
 0x3ce   : > { %903 = vrot.lane.b32.xlu0 %v888_v45, %s5603_s15  ;;  %v1441_v27 = vadd.f32 %v6401_v19, %v1394_v54 }
 0x3cf   : > { %v6939_v18 = vpop.permute.xlu1 %1233 }
 0x3d0   : > { %v6941_v22 = vpop.permute.xlu0 %1235  ;;  %v6980_v6 = vadd.f32 %v6419_v47, %v1441_v27  ;;  %v1297_v47 = vmul.f32 %v6295_v9, %v6599_v30  ;;  %v7005_v27 = vadd.f32 %v6458_v13, %v1600_v12  ;;  %v977_v12 = vsel %vm765_vm2, %v6853_v49, %v6855_v42 }
 0x3d1   : > { %1668 = vrot.lane.b32.xlu1 %v1656_v29, %s5603_s15  ;;  %v1440_v29 = vadd.f32 %v1429_v25, %v1393_v37 }
 0x3d2   : > { %1670 = vrot.lane.b32.xlu0 %v1657_v33, %s5603_s15  ;;  %v1552_v33 = vadd.f32 %v1541_v5, %v1505_v46  ;;  %v1738_v25 = vrot.slane %v6980_v6, 1  ;;  %v1344_v35 = vadd.f32 %v1334_v63, %v1297_v47  ;;  %v731_v47 = vmul.f32 %v6303_v20, %v6655_v14 }
 0x3d3   : > { %v6953_v11 = vpop.permute.xlu1 %1531  ;;  %v6986_v54 = vadd.f32 %v1476_v15, %v1440_v29  ;;  %v1345_v29 = vadd.f32 %v6831_v23, %v1298_v36  ;;  %v7013_v15 = vsel %vm909_vm5, %v6464_v7, %v6466_v28  ;;  %v942_v23 = vmul.f32 %v6287_v1, %v6613_v39 }
 0x3d4   : > { %v6955_v45 = vpop.permute.xlu0 %1533  ;;  %v1599_v37 = vadd.f32 %v1588_v58, %v1552_v33  ;;  %v1428_v33 = vsel %vm861_vm4, %v6873_v61, %v6875_v57  ;;  %v1391_v58 = vadd.f32 %v1381_v50, %v1344_v35  ;;  %v1143_v7 = vmul.f32 %v6599_v30, %v6305_v24 }
 0x3d5   : > { %v1736_v34 = vrot.slane %v6986_v54, 1  ;;  %v1392_v13 = vadd.f32 %v6841_v48, %v1345_v29  ;;  %v1475_v61 = vsel %vm909_vm5, %v6915_v10, %v6913_v3  ;;  %v1170_v39 = vsel %vm765_vm2, %v6863_v53, %v6865_v17 }
 0x3d6   : > { %v7008_v59 = vadd.f32 %v1635_v60, %v1599_v37  ;;  %v732_v37 = vmul.f32 %v6303_v20, %v6653_v16  ;;  %v1438_v49 = vadd.f32 %v1428_v33, %v1391_v58  ;;  %v988_v36 = vadd.f32 %v977_v12, %v941_v21 }
 0x3d7   : > { %v6968_v32 = vpop.permute.xlu1 %809  ;;  %v1439_v60 = vadd.f32 %v6875_v57, %v1392_v13  ;;  %v989_v50 = vadd.f32 %v6855_v42, %v942_v23  ;;  %v1178_v16 = vadd.f32 %v6865_v17, %v1144_v56  ;;  %v1024_v10 = vsel %vm813_vm3, %v6885_v62, %v6883_v51 }
 0x3d8   : > { %v6970_v8 = vpop.permute.xlu0 %811  ;;  %v1204_v35 = vsel %vm813_vm3, %v6895_v0, %v6893_v52  ;;  %v768_v53 = vsel %vm765_vm2, %v6905_v4, %v6903_v26  ;;  %v7055_v14 = vadd.f32 %v1475_v61, %v1438_v49  ;;  %v1177_v42 = vadd.f32 %v1170_v39, %v1143_v7 }
 0x3d9   : > { %v7053_v57 = vadd.f32 %v6913_v3, %v1439_v60  ;;  %v1503_v17 = vmul.f32 %v6323_v43, %v6599_v30  ;;  %v1504_v62 = vmul.f32 %v6323_v43, %v6601_v2  ;;  %v1036_v0 = vadd.f32 %v6883_v51, %v989_v50 }
 0x3da   : > { %v1035_v33 = vadd.f32 %v1024_v10, %v988_v36  ;;  %v1212_v4 = vadd.f32 %v6893_v52, %v1178_v16  ;;  %v1071_v3 = vsel %vm861_vm4, %v6924_v40, %v6926_v38  ;;  %v1211_v58 = vadd.f32 %v1204_v35, %v1177_v42 }
 0x3db   : > { %v6982_v19 = vpop.permute.xlu1 %1112  ;;  %v780_v13 = vadd.f32 %v6903_v26, %v732_v37  ;;  %v779_v23 = vadd.f32 %v768_v53, %v731_v47  ;;  %v1238_v30 = vsel %vm861_vm4, %v6939_v18, %v6941_v22  ;;  %v9076_v2 = vrot.slane %v7053_v57, 1 }
 0x3dc   : > { %v6984_v55 = vpop.permute.xlu0 %1114  ;;  %v9077_v12 = vrot.slane %v7055_v14, 1  ;;  %v1083_v51 = vadd.f32 %v6926_v38, %v1036_v0  ;;  %v816_v52 = vsel %vm813_vm3, %v6968_v32, %v6970_v8  ;;  %v1082_v7 = vadd.f32 %v1071_v3, %v1035_v33 }
 0x3dd   : > { %v1246_v40 = vadd.f32 %v6941_v22, %v1212_v4  ;;  %v1118_v26 = vsel %vm909_vm5, %v6982_v19, %v6984_v55  ;;  %v1245_v61 = vadd.f32 %v1238_v30, %v1211_v58  ;;  %v1540_v38 = vsel %vm765_vm2, %v6953_v11, %v6955_v45 }
 0x3de   : > { %v828_v39 = vadd.f32 %v6970_v8, %v780_v13  ;;  %v1551_v49 = vadd.f32 %v6955_v45, %v1504_v62  ;;  %v827_v22 = vadd.f32 %v816_v52, %v779_v23  ;;  %v7088_v60 = vadd.f32 %v6984_v55, %v1083_v51 }
 0x3df   : > { %v1268_v46 = vpop.permute.xlu1 %1267  ;;  %v7090_v47 = vadd.f32 %v1118_v26, %v1082_v7  ;;  %v1550_v16 = vadd.f32 %v1540_v38, %v1503_v17  ;;  %v1737_v11 = vsel %vm1701_vm6, %v9077_v12, %v1736_v34  ;;  %v1739_v45 = vsel %vm1701_vm6, %v9076_v2, %v1738_v25 }
 0x3e0   : > { %v1270_v5 = vpop.permute.xlu0 %1269  ;;  %v9075_v54 = vrot.slane %v7088_v60, 1  ;;  %v1694_v6 = vadd.f32 %v6466_v28, %v7005_v27 }
 0x3e1   : > { %v1272_v56 = vsel %vm909_vm5, %v1268_v46, %v1270_v5  ;;  %v1280_v19 = vadd.f32 %v1270_v5, %v1246_v40  ;;  %v9074_v25 = vrot.slane %v7090_v47, 1 }
 0x3e2   : > { %v1279_v46 = vadd.f32 %v1272_v56, %v1245_v61  ;;  %v1786_v23 = vrot.slane %v1694_v6, 4 }
 0x3e3   : > { %v1579_v48 = vpop.permute.xlu1 %1578  ;;  %v7106_v42 = vadd.f32 %v1739_v45, %v1280_v19 }
 0x3e4   : > { %v1581_v63 = vpop.permute.xlu0 %1580  ;;  %v7111_v62 = vadd.f32 %v1737_v11, %v1279_v46 }
 0x3e5   : > { %v1587_v36 = vsel %vm813_vm3, %v1579_v48, %v1581_v63  ;;  %v1598_v10 = vadd.f32 %v1581_v63, %v1551_v49  ;;  %v1693_v63 = vadd.f32 %v7013_v15, %v7008_v59  ;;  %v9073_v27 = vrot.slane %v7106_v42, 2 }
 0x3e6   : > { %v1597_v34 = vadd.f32 %v1587_v36, %v1550_v16  ;;  %v9072_v59 = vrot.slane %v7111_v62, 2 }
 0x3e7   : > { %v858_v29 = vpop.permute.xlu1 %857  ;;  %v1784_v30 = vrot.slane %v1693_v63, 4 }
 0x3e8   : > { %v860_v21 = vpop.permute.xlu0 %859 }
 0x3e9   : > { %v864_v32 = vsel %vm861_vm4, %v858_v29, %v860_v21  ;;  %v876_v50 = vadd.f32 %v860_v21, %v828_v39 }
 0x3ea   : > { %v875_v8 = vadd.f32 %v864_v32, %v827_v22 }
 0x3eb   : > { %v1626_v18 = vpop.permute.xlu1 %1625 }
 0x3ec   : > { %v1628_v37 = vpop.permute.xlu0 %1627 }
 0x3ed   : > { %v1634_v48 = vsel %vm861_vm4, %v1626_v18, %v1628_v37  ;;  %v1645_v29 = vadd.f32 %v1628_v37, %v1598_v10 }
 0x3ee   : > { %v1644_v21 = vadd.f32 %v1634_v48, %v1597_v34  ;;  %v5289_v48 = vld [vmem:[#allocation2 + $0x8] sm:$0x80] }
 0x3ef   : > { %v906_v55 = vpop.permute.xlu1 %905 }
 0x3f0   : > { %v908_v5 = vpop.permute.xlu0 %907 }
 0x3f1   : > { %v912_v35 = vsel %vm909_vm5, %v906_v55, %v908_v5  ;;  %v924_v53 = vadd.f32 %v908_v5, %v876_v50 }
 0x3f2   : > { %v923_v17 = vadd.f32 %v912_v35, %v875_v8  ;;  %v938_v35 = vmul.f32 %v5289_v48, %v6287_v1  ;;  %v9213_v48 = vld [vmem:[#allocation44_spill] sm:$0xff] }
 0x3f3   : > { %v1723_v0 = vadd.f32 %v9075_v54, %v924_v53  ;;  %v1673_v33 = vpop.permute.xlu1 %1672  ;;  %v5290_v53 = vld [vmem:[#allocation2] sm:$0x80]  ;;  %v9221_v54 = vld [vmem:[#allocation49_spill] sm:$0xff] }
 0x3f4   : > { %v1675_v4 = vpop.permute.xlu0 %1674  ;;  %v1722_v3 = vadd.f32 %v9074_v25, %v923_v17  ;;  %v937_v34 = vmul.f32 %v5290_v53, %v6287_v1  ;;  %v9209_v17 = vld [vmem:[#allocation40_spill] sm:$0xff] }
 0x3f5   : > { %v1681_v58 = vsel %vm909_vm5, %v1673_v33, %v1675_v4  ;;  %v7120_v28 = vadd.f32 %v1675_v4, %v1645_v29  ;;  %v1770_v51 = vadd.f32 %v9073_v27, %v1723_v0  ;;  %v975_v6 = vsel %vm765_vm2, %v9209_v17, %v6393_v41  ;;  %v9210_v33 = vld [vmem:[#allocation42_spill] sm:$0xff]  ;;  %v9211_v4 = vld [vmem:[#allocation41_spill] sm:$0xff] }
 0x3f6   : > { %v7123_v13 = vadd.f32 %v1681_v58, %v1644_v21  ;;  %v1769_v26 = vadd.f32 %v9072_v59, %v1722_v3  ;;  %v985_v21 = vadd.f32 %v6393_v41, %v938_v35  ;;  %v984_v0 = vadd.f32 %v975_v6, %v937_v34  ;;  %v5291_v58 = vld [vmem:[#allocation2 + $0x8] sm:$0xc0]  ;;  %v9214_v17 = vld [vmem:[#allocation46_spill] sm:$0xff]  ;;  %v9215_v6 = vld [vmem:[#allocation45_spill] sm:$0xff] }
 0x3f7   : > { %v9071_v15 = vrot.slane %v7120_v28, 4  ;;  %v7130_v7 = vpop.permute.xlu1 %1321  ;;  %v1022_v3 = vsel %vm813_vm3, %v9211_v4, %v9210_v33  ;;  %v1069_v4 = vsel %vm861_vm4, %v9215_v6, %v9214_v17  ;;  %v9216_v59 = vld [vmem:[#allocation104_spill] sm:$0xff] }
 0x3f8   : > { %v9070_v52 = vrot.slane %v7123_v13, 4  ;;  %v7132_v40 = vpop.permute.xlu0 %1323  ;;  %v1031_v41 = vadd.f32 %v1022_v3, %v984_v0  ;;  %v1032_v35 = vadd.f32 %v9210_v33, %v985_v21  ;;  %v9218_v0 = vld [vmem:[#allocation47_spill] sm:$0xff] }
 0x3f9   : > { %v1787_v56 = vsel %vm1777_vm7, %v9071_v15, %v1786_v23  ;;  %v728_v23 = vmul.f32 %v5291_v58, %v6303_v20  ;;  %v9219_v33 = vld [vmem:[#allocation103_spill] sm:$0xff] }
 0x3fa   : > { %v7139_v18 = vadd.f32 %v1787_v56, %v1770_v51  ;;  %v1785_v37 = vsel %vm1777_vm7, %v9070_v52, %v1784_v30  ;;  %v939_v3 = vmul.f32 %v6287_v1, %v9219_v33 }
 0x3fb   : > { %v7144_v61 = vadd.f32 %v1785_v37, %v1769_v26  ;;  %v7146_v38 = vpop.permute.xlu1 %1368  ;;  %v5292_v26 = vld [vmem:[#allocation2] sm:$0xc0]  ;;  %v9212_v37 = vld [vmem:[#allocation43_spill] sm:$0xff] }
 0x3fc   : > { %9207 = vst [vmem:[#allocation110_spill] sm:$0xff] %v7139_v18  ;;  %v7148_v39 = vpop.permute.xlu0 %1370  ;;  %v727_v56 = vmul.f32 %v5292_v26, %v6303_v20  ;;  %v766_v53 = vsel %vm765_vm2, %v9213_v48, %v9212_v37  ;;  %v776_v34 = vadd.f32 %v9212_v37, %v728_v23  ;;  %v940_v26 = vmul.f32 %v6287_v1, %v9216_v59  ;;  %v9217_v48 = vld [vmem:[#allocation48_spill] sm:$0xff] }
 0x3fd   : > { %9208 = vst [vmem:[#allocation111_spill] sm:$0xff] %v7144_v61  ;;  %v814_v21 = vsel %vm813_vm3, %v9218_v0, %v9217_v48  ;;  %v1078_v23 = vadd.f32 %v1069_v4, %v1031_v41  ;;  %v1079_v37 = vadd.f32 %v9214_v17, %v1032_v35  ;;  %v9222_v41 = vld [vmem:[#allocation52_spill] sm:$0xff]  ;;  %v9223_v35 = vld [vmem:[#allocation51_spill] sm:$0xff] }
 0x3fe   : > { %v775_v15 = vadd.f32 %v766_v53, %v727_v56  ;;  %v824_v56 = vadd.f32 %v9217_v48, %v776_v34  ;;  %v9220_v53 = vld [vmem:[#allocation50_spill] sm:$0xff] }
 0x3ff   : > { %v968_v32 = vpop.permute.xlu1 %967  ;;  %v1116_v2 = vsel %vm909_vm5, %v9221_v54, %v9220_v53  ;;  %v1126_v34 = vadd.f32 %v9220_v53, %v1079_v37 }
 0x400   : > { %v970_v49 = vpop.permute.xlu0 %969  ;;  %v823_v0 = vadd.f32 %v814_v21, %v775_v15  ;;  %v1125_v17 = vadd.f32 %v1116_v2, %v1078_v23  ;;  %v872_v54 = vadd.f32 %v9222_v41, %v824_v56  ;;  %v1333_v15 = vsel %vm765_vm2, %v7130_v7, %v7132_v40  ;;  %v9224_v21 = vld [vmem:[#allocation54_spill] sm:$0xff]  ;;  %v9226_v23 = vld [vmem:[#allocation100_spill] sm:$0xff] }
 0x401   : > { %v976_v27 = vsel %vm765_vm2, %v968_v32, %v970_v49  ;;  %v987_v6 = vadd.f32 %v970_v49, %v940_v26  ;;  %v862_v49 = vsel %vm861_vm4, %v9223_v35, %v9222_v41  ;;  %v1705_v53 = vrot.slane %v1126_v34, 1 }
 0x402   : > { %v986_v32 = vadd.f32 %v976_v27, %v939_v3  ;;  %v871_v3 = vadd.f32 %v862_v49, %v823_v0  ;;  %v1702_v56 = vrot.slane %v1125_v17, 1  ;;  %v1380_v7 = vsel %vm813_vm3, %v7146_v38, %v7148_v39 }
 0x403   : > { %v7150_v22 = vpop.permute.xlu1 %1161  ;;  %v920_v0 = vadd.f32 %v9224_v21, %v872_v54 }
 0x404   : > { %v7152_v19 = vpop.permute.xlu0 %1163 }
 0x407   : > { %v7154_v46 = vpop.permute.xlu1 %1415 }
 0x408   : > { %v7156_v36 = vpop.permute.xlu0 %1417 }
 0x409   : > { %v1427_v17 = vsel %vm861_vm4, %v7154_v46, %v7156_v36  ;;  %v1169_v46 = vsel %vm765_vm2, %v7150_v22, %v7152_v19 }
 0x40b   : > { %v1017_v50 = vpop.permute.xlu1 %1016 }
 0x40c   : > { %v1015_v16 = vpop.permute.xlu0 %1014  ;;  %v1034_v18 = vadd.f32 %v1017_v50, %v987_v6 }
 0x40d   : > { %v1023_v25 = vsel %vm813_vm3, %v1015_v16, %v1017_v50 }
 0x40e   : > { %v1033_v16 = vadd.f32 %v1023_v25, %v986_v32  ;;  %v9225_v25 = vld [vmem:[#allocation53_spill] sm:$0xff] }
 0x40f   : > { %v7158_v11 = vpop.permute.xlu1 %1197  ;;  %v910_v2 = vsel %vm909_vm5, %v9225_v25, %v9224_v21 }
 0x410   : > { %v7160_v45 = vpop.permute.xlu0 %1195 }
 0x411   : > { %v1203_v22 = vsel %vm813_vm3, %v7160_v45, %v7158_v11 }
 0x413   : > { %v7162_v8 = vpop.permute.xlu1 %759 }
 0x414   : > { %v7164_v55 = vpop.permute.xlu0 %757 }
 0x415   : > { %v767_v45 = vsel %vm765_vm2, %v7164_v55, %v7162_v8 }
 0x417   : > { %v7166_v5 = vpop.permute.xlu1 %1464 }
 0x418   : > { %v7168_v10 = vpop.permute.xlu0 %1462 }
 0x41b   : > { %v1062_v29 = vpop.permute.xlu1 %1061 }
 0x41c   : > { %v1064_v63 = vpop.permute.xlu0 %1063 }
 0x41d   : > { %v1070_v1 = vsel %vm861_vm4, %v1062_v29, %v1064_v63  ;;  %v1081_v4 = vadd.f32 %v1064_v63, %v1034_v18  ;;  %v1295_v18 = vmul.f32 %v6295_v9, %v9226_v23  ;;  %v9227_v63 = vld [vmem:[#allocation99_spill] sm:$0xff] }
 0x41e   : > { %v1080_v27 = vadd.f32 %v1070_v1, %v1033_v16  ;;  %v1296_v37 = vmul.f32 %v6295_v9, %v9227_v63  ;;  %v919_v9 = vadd.f32 %v910_v2, %v871_v3 }
 0x41f   : > { %v7180_v30 = vpop.permute.xlu1 %1229  ;;  %v1342_v1 = vadd.f32 %v1333_v15, %v1295_v18 }
 0x420   : > { %v7182_v51 = vpop.permute.xlu0 %1231  ;;  %v1343_v41 = vadd.f32 %v7132_v40, %v1296_v37 }
 0x421   : > { %v1389_v34 = vadd.f32 %v1380_v7, %v1342_v1 }
 0x423   : > { %v7193_v58 = vpop.permute.xlu1 %1527  ;;  %v1436_v3 = vadd.f32 %v1427_v17, %v1389_v34  ;;  %v9229_v34 = vrot.slane %v7053_v57, 1 }
 0x424   : > { %v7195_v52 = vpop.permute.xlu0 %1529 }
 0x427   : > { %v7211_v12 = vpop.permute.xlu1 %805 }
 0x428   : > { %v7213_v61 = vpop.permute.xlu0 %807 }
 0x42b   : > { %v1109_v26 = vpop.permute.xlu1 %1108 }
 0x42c   : > { %v1111_v48 = vpop.permute.xlu0 %1110 }
 0x42d   : > { %v1117_v50 = vsel %vm909_vm5, %v1109_v26, %v1111_v48  ;;  %v7225_v29 = vadd.f32 %v1111_v48, %v1081_v4  ;;  %v1390_v4 = vadd.f32 %v7148_v39, %v1343_v41  ;;  %v1474_v26 = vsel %vm909_vm5, %v7168_v10, %v7166_v5 }
 0x42e   : > { %v7234_v6 = vadd.f32 %v1117_v50, %v1080_v27  ;;  %v1142_v27 = vmul.f32 %v6305_v24, %v9216_v59  ;;  %v1141_v39 = vmul.f32 %v6305_v24, %v9219_v33  ;;  %v1483_v10 = vadd.f32 %v1474_v26, %v1436_v3 }
 0x42f   : > { %v1706_v32 = vrot.slane %v7225_v29, 1  ;;  %v1264_v49 = vpop.permute.xlu1 %1263  ;;  %v1437_v15 = vadd.f32 %v7156_v36, %v1390_v4  ;;  %v1237_v24 = vsel %vm861_vm4, %v7180_v30, %v7182_v51  ;;  %v9232_v29 = vrot.slane %v7106_v42, 2 }
 0x430   : > { %v1703_v35 = vrot.slane %v7234_v6, 1  ;;  %v1266_v16 = vpop.permute.xlu0 %1265  ;;  %v1176_v25 = vadd.f32 %v7152_v19, %v1142_v27  ;;  %v1175_v2 = vadd.f32 %v1169_v46, %v1141_v39  ;;  %v730_v19 = vmul.f32 %v6303_v20, %v9216_v59 }
 0x431   : > { %v1707_v38 = vsel %vm1701_vm6, %v1705_v53, %v1706_v32  ;;  %v1484_v23 = vadd.f32 %v7166_v5, %v1437_v15  ;;  %v1271_v5 = vsel %vm909_vm5, %v1264_v49, %v1266_v16  ;;  %v1730_v7 = vrot.slane %v1483_v10, 1 }
 0x432   : > { %v1704_v40 = vsel %vm1701_vm6, %v1702_v56, %v1703_v35  ;;  %v7253_v54 = vadd.f32 %v1707_v38, %v920_v0  ;;  %v1210_v18 = vadd.f32 %v7158_v11, %v1176_v25  ;;  %v1209_v63 = vadd.f32 %v1203_v22, %v1175_v2 }
 0x433   : > { %v7263_v48 = vadd.f32 %v1704_v40, %v919_v9  ;;  %v1575_v50 = vpop.permute.xlu1 %1574  ;;  %v729_v11 = vmul.f32 %v6303_v20, %v9219_v33  ;;  %v1733_v53 = vrot.slane %v1484_v23, 1  ;;  %v778_v0 = vadd.f32 %v7162_v8, %v730_v19 }
 0x434   : > { %v1577_v21 = vpop.permute.xlu0 %1576  ;;  %v1244_v56 = vadd.f32 %v7182_v51, %v1210_v18  ;;  %v1243_v30 = vadd.f32 %v1237_v24, %v1209_v63  ;;  %v815_v59 = vsel %vm813_vm3, %v7211_v12, %v7213_v61  ;;  %v1502_v51 = vmul.f32 %v6323_v43, %v6849_v44 }
 0x435   : > { %v777_v41 = vadd.f32 %v767_v45, %v729_v11  ;;  %v1539_v20 = vsel %vm765_vm2, %v7193_v58, %v7195_v52  ;;  %v826_v33 = vadd.f32 %v7213_v61, %v778_v0  ;;  %v1501_v49 = vmul.f32 %v6323_v43, %v6847_v31 }
 0x436   : > { %v1278_v1 = vadd.f32 %v1266_v16, %v1244_v56  ;;  %v1277_v9 = vadd.f32 %v1271_v5, %v1243_v30  ;;  %v9228_v16 = vrot.slane %v7055_v14, 1  ;;  %v1735_v44 = vsel %vm1701_vm6, %v1733_v53, %v9229_v34 }
 0x437   : > { %v854_v36 = vpop.permute.xlu1 %853  ;;  %v825_v12 = vadd.f32 %v815_v59, %v777_v41  ;;  %v1549_v4 = vadd.f32 %v7195_v52, %v1502_v51  ;;  %v1586_v58 = vsel %vm813_vm3, %v1575_v50, %v1577_v21  ;;  %v1548_v27 = vadd.f32 %v1539_v20, %v1501_v49  ;;  %v9236_v51 = vld [vmem:[#allocation110_spill] sm:$0xff] }
 0x438   : > { %v856_v37 = vpop.permute.xlu0 %855  ;;  %v1732_v38 = vsel %vm1701_vm6, %v1730_v7, %v9228_v16  ;;  %v1745_v40 = vadd.f32 %v1735_v44, %v1278_v1  ;;  %v9230_v52 = vrot.slane %v7088_v60, 1  ;;  %v9234_v30 = vrot.slane %v7120_v28, 4 }
 0x439   : > { %v863_v8 = vsel %vm861_vm4, %v854_v36, %v856_v37  ;;  %v874_v61 = vadd.f32 %v856_v37, %v826_v33  ;;  %v1744_v46 = vadd.f32 %v1732_v38, %v1277_v9  ;;  %v1596_v31 = vadd.f32 %v1577_v21, %v1549_v4  ;;  %v9237_v33 = vld [vmem:[#allocation111_spill] sm:$0xff] }
 0x43a   : > { %v873_v26 = vadd.f32 %v863_v8, %v825_v12  ;;  %v1595_v57 = vadd.f32 %v1586_v58, %v1548_v27  ;;  %v1754_v22 = vrot.slane %v1745_v40, 2  ;;  %v1711_v50 = vsel %vm1701_vm6, %v1706_v32, %v9230_v52  ;;  %v9238_v27 = vld [vmem:[#allocation34_spill] sm:$0xff] }
 0x43b   : > { %v1622_v55 = vpop.permute.xlu1 %1621  ;;  %v1753_v23 = vrot.slane %v1744_v46, 2  ;;  %v9231_v21 = vrot.slane %v7090_v47, 1  ;;  %v9233_v47 = vrot.slane %v7111_v62, 2  ;;  %v9235_v41 = vrot.slane %v7123_v13, 4 }
 0x43c   : > { %v1624_v17 = vpop.permute.xlu0 %1623  ;;  %v1758_v32 = vsel %vm1752_vm8, %v1754_v22, %v9232_v29  ;;  %v1766_v56 = vadd.f32 %v1754_v22, %v7253_v54  ;;  %v1813_v8 = vrot.slane %v9237_v33, 6 }
 0x43d   : > { %v1633_v14 = vsel %vm861_vm4, %v1622_v55, %v1624_v17  ;;  %v1643_v2 = vadd.f32 %v1624_v17, %v1596_v31  ;;  %v1709_v18 = vsel %vm1701_vm6, %v1703_v35, %v9231_v21  ;;  %v1756_v6 = vsel %vm1752_vm8, %v1753_v23, %v9233_v47 }
 0x43e   : > { %v1642_v10 = vadd.f32 %v1633_v14, %v1595_v57  ;;  %v1765_v11 = vadd.f32 %v1753_v23, %v7263_v48  ;;  %v1815_v48 = vrot.slane %v9236_v51, 6 }
 0x43f   : > { %v902_v39 = vpop.permute.xlu1 %901 }
 0x440   : > { %v904_v43 = vpop.permute.xlu0 %903 }
 0x441   : > { %v911_v3 = vsel %vm909_vm5, %v902_v39, %v904_v43  ;;  %v922_v15 = vadd.f32 %v904_v43, %v874_v61 }
 0x442   : > { %v921_v25 = vadd.f32 %v911_v3, %v873_v26  ;;  %v9239_v26 = vld [vmem:[#allocation39_spill] sm:$0xff] }
 0x443   : > { %v1721_v24 = vadd.f32 %v1711_v50, %v922_v15  ;;  %v1669_v63 = vpop.permute.xlu1 %1668  ;;  %v9240_v15 = vld [vmem:[#allocation35_spill] sm:$0xff]  ;;  %v9242_v50 = vld [vmem:[#allocation36_spill] sm:$0xff] }
 0x444   : > { %v1671_v36 = vpop.permute.xlu0 %1670  ;;  %v1720_v37 = vadd.f32 %v1709_v18, %v921_v25  ;;  %v9241_v25 = vld [vmem:[#allocation55_spill] sm:$0xff]  ;;  %v9244_v18 = vld [vmem:[#allocation57_spill] sm:$0xff] }
 0x445   : > { %v1680_v19 = vsel %vm909_vm5, %v1669_v63, %v1671_v36  ;;  %v1690_v60 = vadd.f32 %v1671_v36, %v1643_v2  ;;  %v1768_v35 = vadd.f32 %v1758_v32, %v1721_v24 }
 0x446   : > { %v1689_v45 = vadd.f32 %v1680_v19, %v1642_v10  ;;  %v1767_v7 = vadd.f32 %v1756_v6, %v1720_v37  ;;  %v9243_v10 = vld [vmem:[#allocation56_spill] sm:$0xff]  ;;  %v9245_v37 = vld [vmem:[#allocation37_spill] sm:$0xff] }
 0x447   : > { %v1779_v5 = vrot.slane %v1690_v60, 4 }
 0x448   : > { %v1778_v53 = vrot.slane %v1689_v45, 4 }
 0x449   : > { %v1783_v0 = vsel %vm1777_vm7, %v1779_v5, %v9234_v30  ;;  %v1795_v59 = vadd.f32 %v1779_v5, %v1766_v56  ;;  %v9246_v56 = vld [vmem:[#allocation38_spill] sm:$0xff] }
 0x44a   : > { %v1794_v42 = vadd.f32 %v1778_v53, %v1765_v11  ;;  %v1797_v1 = vadd.f32 %v1783_v0, %v1768_v35  ;;  %v1781_v54 = vsel %vm1777_vm7, %v1778_v53, %v9235_v41  ;;  %v9248_v0 = vld [vmem:[#allocation58_spill] sm:$0xff] }
 0x44b   : > { %v1810_v9 = vrot.slane %v1795_v59, 6  ;;  %v1796_v62 = vadd.f32 %v1781_v54, %v1767_v7 }
 0x44c   : > { %v1807_v55 = vrot.slane %v1794_v42, 6  ;;  %v1811_v17 = vrot.slane %v1797_v1, 6 }
 0x44d   : > { %v1808_v20 = vrot.slane %v1796_v62, 6 }
 0x44e   : > { %v1812_v28 = vsel %vm1806_vm9, %v1810_v9, %v1811_v17  ;;  %v1816_v49 = vsel %vm1806_vm9, %v1811_v17, %v1815_v48  ;;  %v9249_v9 = vld [vmem:[#allocation59_spill] sm:$0xff] }
 0x44f   : > { %1819 = vrot.lane.b32.xlu0 %v1812_v28, %s5604_s29  ;;  %v1809_v13 = vsel %vm1806_vm9, %v1807_v55, %v1808_v20  ;;  %v1814_v12 = vsel %vm1806_vm9, %v1808_v20, %v1813_v8  ;;  %v9250_v20 = vld [vmem:[#allocation60_spill] sm:$0xff] }
 0x450   : > { %1817 = vrot.lane.b32.xlu1 %v1809_v13, %s5604_s29 }
 0x453   : > { %1823 = vrot.lane.b32.xlu0 %v1816_v49, %s5604_s29 }
 0x454   : > { %1821 = vrot.lane.b32.xlu1 %v1814_v12, %s5604_s29  ;;  %v9251_v12 = vld [vmem:[#allocation61_spill] sm:$0xff] }
 0x4c1   : > { %v1820_v16 = vpop.permute.xlu0 %1819 }
 0x4c2   : > { %v1818_v38 = vpop.permute.xlu1 %1817 }
 0x4c3   : > { %v1826_v34 = vsel %vm1825_vm10, %v1818_v38, %v1820_v16  ;;  %1832 = vst.msk [vmem:[#allocation2 + $0x10] sm:$0xff] %vm702_vm0, %v1818_v38 }
 0x4c4   : > { %1833 = vst.msk [vmem:[#allocation2 + $0x18] sm:$0xff] %vm704_vm1, %v1826_v34 }
 0x4c5   : > { %v1824_v44 = vpop.permute.xlu0 %1823 }
 0x4c6   : > { %v1822_v4 = vpop.permute.xlu1 %1821 }
 0x4c7   : > { %v1827_v40 = vsel %vm1825_vm10, %v1822_v4, %v1824_v44  ;;  %1834 = vst.msk [vmem:[#allocation2 + $0x20] sm:$0xff] %vm702_vm0, %v1822_v4  ;;  %v9252_v4 = vld [vmem:[#allocation62_spill] sm:$0xff] }
 0x4c8   : > { %1835 = vst.msk [vmem:[#allocation2 + $0x28] sm:$0xff] %vm704_vm1, %v1827_v40 }
 0x4ca   : > { %v7348_v58 = vld [vmem:[#allocation2 + $0x10] sm:$0xff] }
 0x4cb   : > { %v7350_v61 = vld [vmem:[#allocation2 + $0x10] sm:$0xf8]  ;;  %v2127_v39 = vmul.f32 %v9239_v26, %v7348_v58  ;;  %v2314_v22 = vmul.f32 %v9241_v25, %v7348_v58  ;;  %v2080_v23 = vmul.f32 %v9242_v50, %v7348_v58  ;;  %v1871_v21 = vmul.f32 %v9243_v10, %v7348_v58  ;;  %v7396_v60 = vld [vmem:[#allocation2 + $0x18] sm:$0xf8] }
 0x4cc   : > { %v2436_v46 = vmul.f32 %v9238_v27, %v7350_v61  ;;  %v2483_v57 = vmul.f32 %v9240_v15, %v7350_v61  ;;  %v2577_v24 = vmul.f32 %v9244_v18, %v7350_v61  ;;  %v2280_v19 = vmul.f32 %v9245_v37, %v7348_v58  ;;  %v7426_v30 = vld [vmem:[#allocation2 + $0x18] sm:$0xff]  ;;  %v7454_v48 = vld [vmem:[#allocation2 + $0x10] sm:$0xc0] }
 0x4cd   : > { %2141 = vrot.lane.b32.xlu1 %v2127_v39, %s5596_s3  ;;  %v2437_v45 = vmul.f32 %v9238_v27, %v7396_v60  ;;  %v2530_v5 = vmul.f32 %v9246_v56, %v7350_v61  ;;  %v2484_v35 = vmul.f32 %v9240_v15, %v7396_v60  ;;  %v2174_v59 = vmul.f32 %v9248_v0, %v7348_v58 }
 0x4ce   : > { %2448 = vrot.lane.b32.xlu0 %v2436_v46, %s5602_s14  ;;  %v7358_v43 = vld [vmem:[#allocation2 + $0x20] sm:$0xff]  ;;  %v2081_v42 = vmul.f32 %v9242_v50, %v7426_v30  ;;  %v2348_v62 = vmul.f32 %v9249_v9, %v7348_v58  ;;  %v2281_v55 = vmul.f32 %v9245_v37, %v7426_v30  ;;  %v2642_v33 = vmul.f32 %v9250_v20, %v7454_v48 }
 0x4cf   : > { %v7360_v31 = vld [vmem:[#allocation2 + $0x20] sm:$0x1f]  ;;  %v2438_v14 = vmul.f32 %v9238_v27, %v7358_v43  ;;  %v2485_v2 = vmul.f32 %v9240_v15, %v7358_v43  ;;  %v2316_v52 = vmul.f32 %v7358_v43, %v9241_v25  ;;  %v2579_v36 = vmul.f32 %v9244_v18, %v7358_v43  ;;  %v7404_v32 = vld [vmem:[#allocation2 + $0x28] sm:$0xff] }
 0x4d0   : > { %v2129_v3 = vmul.f32 %v9239_v26, %v7360_v31  ;;  %v2082_v63 = vmul.f32 %v9242_v50, %v7360_v31  ;;  %v2282_v29 = vmul.f32 %v7358_v43, %v9245_v37  ;;  %v2439_v47 = vmul.f32 %v9238_v27, %v7404_v32  ;;  %v7418_v11 = vld [vmem:[#allocation2 + $0x20] sm:$0x3]  ;;  %v7434_v1 = vld [vmem:[#allocation2 + $0x28] sm:$0x1f] }
 0x4d1   : > { %v2532_v6 = vmul.f32 %v9246_v56, %v7358_v43  ;;  %v1873_v53 = vmul.f32 %v9243_v10, %v7418_v11  ;;  %v2486_v7 = vmul.f32 %v9240_v15, %v7404_v32  ;;  %v2176_v41 = vmul.f32 %v9248_v0, %v7360_v31  ;;  %v7468_v13 = vld [vmem:[#allocation2 + $0x28] sm:$0x3] }
 0x4d2   : > { %2452 = vrot.lane.b32.xlu0 %v2438_v14, %s5602_s14  ;;  %2145 = vrot.lane.b32.xlu1 %v2129_v3, %s5596_s3  ;;  %v2083_v54 = vmul.f32 %v9242_v50, %v7434_v1  ;;  %v2350_v17 = vmul.f32 %v7358_v43, %v9249_v9  ;;  %v2283_v51 = vmul.f32 %v7404_v32, %v9245_v37  ;;  %v9253_v14 = vld [vmem:[#allocation63_spill] sm:$0xff] }
 0x4d3   : > { %v2531_v8 = vmul.f32 %v9246_v56, %v7396_v60  ;;  %v2644_v28 = vmul.f32 %v9250_v20, %v7358_v43  ;;  %v2533_v49 = vmul.f32 %v9246_v56, %v7404_v32  ;;  %v1918_v16 = vmul.f32 %v9251_v12, %v7348_v58 }
 0x4d4   : > { %v1874_v38 = vmul.f32 %v9243_v10, %v7468_v13  ;;  %v1920_v34 = vmul.f32 %v9251_v12, %v7418_v11  ;;  %v2175_v44 = vmul.f32 %v9248_v0, %v7426_v30  ;;  %v2221_v40 = vmul.f32 %v9252_v4, %v7348_v58 }
 0x4d5   : > { %v2177_v27 = vmul.f32 %v9248_v0, %v7434_v1  ;;  %v2223_v46 = vmul.f32 %v9252_v4, %v7360_v31  ;;  %v2349_v39 = vmul.f32 %v9249_v9, %v7426_v30  ;;  %v2382_v3 = vmul.f32 %v9253_v14, %v7348_v58 }
 0x4d6   : > { %2495 = vrot.lane.b32.xlu0 %v2483_v57, %s5596_s3  ;;  %2322 = vrot.lane.b32.xlu1 %v2314_v22, %s5596_s3  ;;  %v2351_v15 = vmul.f32 %v7404_v32, %v9249_v9  ;;  %v7500_v57 = vld [vmem:[#allocation2 + $0x18] sm:$0xc0]  ;;  %v2384_v22 = vmul.f32 %v7358_v43, %v9253_v14  ;;  %v1921_v37 = vmul.f32 %v9251_v12, %v7468_v13 }
 0x4da   : > { %2499 = vrot.lane.b32.xlu0 %v2485_v2, %s5596_s3  ;;  %2326 = vrot.lane.b32.xlu1 %v2316_v52, %s5596_s3  ;;  %v2643_v2 = vmul.f32 %v9250_v20, %v7500_v57  ;;  %v9254_v52 = vld [vmem:[#allocation64_spill] sm:$0xff] }
 0x4db   : > { %v2689_v50 = vmul.f32 %v9254_v52, %v7454_v48  ;;  %v2690_v9 = vmul.f32 %v9254_v52, %v7500_v57 }
 0x4de   : > { %2094 = vrot.lane.b32.xlu0 %v2080_v23, %s5602_s14  ;;  %1885 = vrot.lane.b32.xlu1 %v1871_v21, %s5602_s14  ;;  %v2645_v23 = vmul.f32 %v9250_v20, %v7404_v32  ;;  %v2691_v21 = vmul.f32 %v9254_v52, %v7358_v43  ;;  %v2692_v20 = vmul.f32 %v9254_v52, %v7404_v32 }
 0x4e2   : > { %2589 = vrot.lane.b32.xlu1 %v2577_v24, %s5605_s28  ;;  %2098 = vrot.lane.b32.xlu0 %v2082_v63, %s5602_s14  ;;  %v1919_v24 = vmul.f32 %v9251_v12, %v7426_v30  ;;  %v9255_v63 = vld [vmem:[#allocation65_spill] sm:$0xff] }
 0x4e6   : > { %2593 = vrot.lane.b32.xlu1 %v2579_v36, %s5605_s28  ;;  %2288 = vrot.lane.b32.xlu0 %v2280_v19, %s5602_s14  ;;  %v1966_v36 = vmul.f32 %v9255_v63, %v7348_v58  ;;  %v1968_v19 = vmul.f32 %v9255_v63, %v7418_v11 }
 0x4ea   : > { %2450 = vrot.lane.b32.xlu1 %v2437_v45, %s5602_s14  ;;  %2292 = vrot.lane.b32.xlu0 %v2282_v29, %s5602_s14  ;;  %v2222_v45 = vmul.f32 %v9252_v4, %v7426_v30  ;;  %v9256_v29 = vld [vmem:[#allocation66_spill] sm:$0xff] }
 0x4eb   : > { %v2736_v56 = vmul.f32 %v9256_v29, %v7454_v48 }
 0x4ee   : > { %2542 = vrot.lane.b32.xlu0 %v2530_v5, %s9247_s27  ;;  %2454 = vrot.lane.b32.xlu1 %v2439_v47, %s5602_s14  ;;  %v2224_v5 = vmul.f32 %v9252_v4, %v7434_v1  ;;  %v2738_v47 = vmul.f32 %v9256_v29, %v7358_v43 }
 0x4f2   : > { %2546 = vrot.lane.b32.xlu0 %v2532_v6, %s9247_s27  ;;  %2497 = vrot.lane.b32.xlu1 %v2484_v35, %s5596_s3  ;;  %v2383_v6 = vmul.f32 %v9253_v14, %v7426_v30 }
 0x4f6   : > { %1889 = vrot.lane.b32.xlu0 %v1873_v53, %s5602_s14  ;;  %2501 = vrot.lane.b32.xlu1 %v2486_v7, %s5596_s3  ;;  %v9257_v7 = vld [vmem:[#allocation67_spill] sm:$0xff] }
 0x4f7   : > { %v2014_v0 = vmul.f32 %v9257_v7, %v7348_v58 }
 0x4fa   : > { %2188 = vrot.lane.b32.xlu0 %v2174_v59, %s9247_s27  ;;  %2096 = vrot.lane.b32.xlu1 %v2081_v42, %s5602_s14  ;;  %v2385_v59 = vmul.f32 %v7404_v32, %v9253_v14  ;;  %v2739_v14 = vmul.f32 %v9256_v29, %v7404_v32 }
 0x4fe   : > { %2192 = vrot.lane.b32.xlu0 %v2176_v41, %s9247_s27  ;;  %2100 = vrot.lane.b32.xlu1 %v2083_v54, %s5602_s14  ;;  %v2016_v54 = vmul.f32 %v9257_v7, %v7418_v11 }
 0x502   : > { %2356 = vrot.lane.b32.xlu0 %v2348_v62, %s9247_s27  ;;  %2290 = vrot.lane.b32.xlu1 %v2281_v55, %s5602_s14 }
 0x506   : > { %2360 = vrot.lane.b32.xlu0 %v2350_v17, %s9247_s27  ;;  %2294 = vrot.lane.b32.xlu1 %v2283_v51, %s5602_s14  ;;  %v9260_v17 = vld [vmem:[#allocation70_spill] sm:$0xff] }
 0x507   : > { %v2783_v51 = vmul.f32 %v9260_v17, %v7454_v48 }
 0x50a   : > { %2654 = vrot.lane.b32.xlu0 %v2642_v33, %s5602_s14  ;;  %2544 = vrot.lane.b32.xlu1 %v2531_v8, %s9247_s27 }
 0x50e   : > { %2658 = vrot.lane.b32.xlu0 %v2644_v28, %s5602_s14  ;;  %2548 = vrot.lane.b32.xlu1 %v2533_v49, %s9247_s27  ;;  %v2128_v28 = vmul.f32 %v9239_v26, %v7426_v30  ;;  %v1967_v49 = vmul.f32 %v9255_v63, %v7426_v30 }
 0x512   : > { %1932 = vrot.lane.b32.xlu0 %v1918_v16, %s5596_s3  ;;  %1891 = vrot.lane.b32.xlu1 %v1874_v38, %s5602_s14  ;;  %v2130_v38 = vmul.f32 %v9239_v26, %v7434_v1 }
 0x516   : > { %1936 = vrot.lane.b32.xlu0 %v1920_v34, %s5596_s3  ;;  %2190 = vrot.lane.b32.xlu1 %v2175_v44, %s9247_s27  ;;  %v1969_v34 = vmul.f32 %v9255_v63, %v7468_v13  ;;  %v2784_v63 = vmul.f32 %v9260_v17, %v7500_v57 }
 0x51a   : > { %2235 = vrot.lane.b32.xlu0 %v2221_v40, %s5605_s28  ;;  %2194 = vrot.lane.b32.xlu1 %v2177_v27, %s9247_s27  ;;  %v2315_v40 = vmul.f32 %v9241_v25, %v7426_v30  ;;  %v2737_v27 = vmul.f32 %v9256_v29, %v7500_v57 }
 0x51e   : > { %2239 = vrot.lane.b32.xlu0 %v2223_v46, %s5605_s28  ;;  %2358 = vrot.lane.b32.xlu1 %v2349_v39, %s9247_s27  ;;  %v2317_v39 = vmul.f32 %v7404_v32, %v9241_v25 }
 0x522   : > { %2390 = vrot.lane.b32.xlu0 %v2382_v3, %s5605_s28  ;;  %2362 = vrot.lane.b32.xlu1 %v2351_v15, %s9247_s27 }
 0x526   : > { %2394 = vrot.lane.b32.xlu0 %v2384_v22, %s5605_s28  ;;  %2656 = vrot.lane.b32.xlu1 %v2643_v2, %s5602_s14  ;;  %v1872_v22 = vmul.f32 %v9243_v10, %v7426_v30  ;;  %v2015_v2 = vmul.f32 %v9257_v7, %v7426_v30 }
 0x52a   : > { %2701 = vrot.lane.b32.xlu0 %v2689_v50, %s5596_s3  ;;  %2660 = vrot.lane.b32.xlu1 %v2645_v23, %s5602_s14  ;;  %v2578_v50 = vmul.f32 %v9244_v18, %v7396_v60  ;;  %v2017_v23 = vmul.f32 %v9257_v7, %v7468_v13 }
 0x52e   : > { %2705 = vrot.lane.b32.xlu0 %v2691_v21, %s5596_s3  ;;  %1934 = vrot.lane.b32.xlu1 %v1919_v24, %s5596_s3  ;;  %v2580_v24 = vmul.f32 %v9244_v18, %v7404_v32 }
 0x532   : > { %1980 = vrot.lane.b32.xlu0 %v1966_v36, %s9247_s27  ;;  %1938 = vrot.lane.b32.xlu1 %v1921_v37, %s5596_s3 }
 0x536   : > { %1984 = vrot.lane.b32.xlu0 %v1968_v19, %s9247_s27  ;;  %2237 = vrot.lane.b32.xlu1 %v2222_v45, %s5605_s28  ;;  %v2785_v19 = vmul.f32 %v9260_v17, %v7358_v43  ;;  %v2786_v45 = vmul.f32 %v9260_v17, %v7404_v32 }
 0x53a   : > { %2748 = vrot.lane.b32.xlu0 %v2736_v56, %s9247_s27  ;;  %2241 = vrot.lane.b32.xlu1 %v2224_v5, %s5605_s28  ;;  %v7660_v56 = vld [vmem:[#allocation2 + $0x30] sm:$0x3f] }
 0x53b   : > { %v2787_v5 = vmul.f32 %v7660_v56, %v9260_v17 }
 0x53e   : > { %2752 = vrot.lane.b32.xlu0 %v2738_v47, %s9247_s27  ;;  %2392 = vrot.lane.b32.xlu1 %v2383_v6, %s5605_s28  ;;  %v7664_v47 = vld [vmem:[#allocation2 + $0x38] sm:$0x3f] }
 0x53f   : > { %v7548_v53 = vpop.permute.xlu1 %2141  ;;  %v2788_v6 = vmul.f32 %v7664_v47, %v9260_v17 }
 0x540   : > { %v7546_v35 = vpop.permute.xlu0 %2448 }
 0x542   : > { %2028 = vrot.lane.b32.xlu0 %v2014_v0, %s5605_s28  ;;  %2396 = vrot.lane.b32.xlu1 %v2385_v59, %s5605_s28  ;;  %v2925_v59 = vld [vmem:[#allocation12] sm:$0xff] }
 0x544   : > { %v7556_v42 = vpop.permute.xlu0 %2452  ;;  %v7558_v41 = vpop.permute.xlu1 %2145 }
 0x545   : > { %9258 = vst [vmem:[#allocation40_spill] sm:$0xff] %v7558_v41  ;;  %v5300_v41 = vld [vmem:[#allocation2 + $0x8] sm:$0xfc] }
 0x546   : > { %2032 = vrot.lane.b32.xlu0 %v2016_v54, %s5605_s28  ;;  %2703 = vrot.lane.b32.xlu1 %v2690_v9, %s5596_s3  ;;  %v2926_v54 = vld [vmem:[#allocation12 + $0x8] sm:$0xff]  ;;  %v2927_v9 = vld [vmem:[#allocation12 + $0x10] sm:$0xff] }
 0x548   : > { %v7566_v62 = vpop.permute.xlu0 %2495  ;;  %v7568_v55 = vpop.permute.xlu1 %2322 }
 0x549   : > { %9259 = vst [vmem:[#allocation42_spill] sm:$0xff] %v7568_v55  ;;  %v9294_v55 = vld [vmem:[#allocation71_spill] sm:$0xff] }
 0x54a   : > { %2795 = vrot.lane.b32.xlu0 %v2783_v51, %s5605_s28  ;;  %2707 = vrot.lane.b32.xlu1 %v2692_v20, %s5596_s3  ;;  %v5006_v51 = vpack.c.bf16 %v2926_v54, %v2925_v59  ;;  %v2928_v20 = vld [vmem:[#allocation12 + $0x18] sm:$0xff] }
 0x54c   : > { %v7576_v33 = vpop.permute.xlu0 %2499  ;;  %v7578_v8 = vpop.permute.xlu1 %2326  ;;  %5007 = vmatprep.subr.bf16.mxu0 %v5006_v51 }
 0x54d   : > { %9261 = vst [vmem:[#allocation41_spill] sm:$0xff] %v7578_v8  ;;  %5009 = vmatpush3.bf16.msra.mxu0 %v5006_v51  ;;  %v2938_v51 = vld [vmem:[#allocation12 + $0x68] sm:$0xff]  ;;  %v5296_v8 = vld [vmem:[#allocation2 + $0x30] sm:$0x7] }
 0x54e   : > { %2143 = vrot.lane.b32.xlu0 %v2128_v28, %s5596_s3  ;;  %1982 = vrot.lane.b32.xlu1 %v1967_v49, %s9247_s27  ;;  %v5010_v28 = vpack.c.bf16 %v2928_v20, %v2927_v9  ;;  %v2929_v49 = vld [vmem:[#allocation12 + $0x20] sm:$0xff] }
 0x54f   : > { %v2937_v9 = vld [vmem:[#allocation12 + $0x60] sm:$0xff] }
 0x550   : > { %v7586_v12 = vpop.permute.xlu0 %2094  ;;  %v7588_v16 = vpop.permute.xlu1 %1885  ;;  %5011 = vmatprep.subr.bf16.mxu0 %v5010_v28 }
 0x551   : > { %9262 = vst [vmem:[#allocation43_spill] sm:$0xff] %v7588_v16  ;;  %5013 = vmatpush3.bf16.msra.mxu0 %v5010_v28 }
 0x552   : > { %2147 = vrot.lane.b32.xlu0 %v2130_v38, %s5596_s3  ;;  %1986 = vrot.lane.b32.xlu1 %v1969_v34, %s9247_s27  ;;  %v2930_v38 = vld [vmem:[#allocation12 + $0x28] sm:$0xff] }
 0x553   : > { %v5014_v17 = vpack.c.bf16 %v2930_v38, %v2929_v49  ;;  %v5030_v49 = vpack.c.bf16 %v2938_v51, %v2937_v9 }
 0x554   : > { %v7596_v44 = vpop.permute.xlu0 %2098  ;;  %v7598_v4 = vpop.permute.xlu1 %2589 }
 0x555   : > { %9263 = vst [vmem:[#allocation44_spill] sm:$0xff] %v7598_v4  ;;  %5015 = vmatprep.subr.bf16.mxu0 %v5014_v17  ;;  %v9292_v4 = vld [vmem:[#allocation88_spill] sm:$0xff] }
 0x556   : > { %2324 = vrot.lane.b32.xlu0 %v2315_v40, %s5596_s3  ;;  %2750 = vrot.lane.b32.xlu1 %v2737_v27, %s9247_s27  ;;  %v2931_v27 = vld [vmem:[#allocation12 + $0x30] sm:$0xff] }
 0x557   : > { %5017 = vmatpush3.bf16.msra.mxu0 %v5014_v17 }
 0x558   : > { %v7606_v26 = vpop.permute.xlu0 %2288  ;;  %v7608_v46 = vpop.permute.xlu1 %2593 }
 0x559   : > { %9264 = vst [vmem:[#allocation46_spill] sm:$0xff] %v7608_v46 }
 0x55a   : > { %2328 = vrot.lane.b32.xlu0 %v2317_v39, %s5596_s3  ;;  %2754 = vrot.lane.b32.xlu1 %v2739_v14, %s9247_s27  ;;  %v2932_v39 = vld [vmem:[#allocation12 + $0x38] sm:$0xff] }
 0x55c   : > { %v7616_v3 = vpop.permute.xlu0 %2292  ;;  %v7618_v15 = vpop.permute.xlu1 %2450 }
 0x55e   : > { %1887 = vrot.lane.b32.xlu0 %v1872_v22, %s5602_s14  ;;  %2030 = vrot.lane.b32.xlu1 %v2015_v2, %s5605_s28  ;;  %v5018_v2 = vpack.c.bf16 %v2932_v39, %v2931_v27 }
 0x560   : > { %v7626_v25 = vpop.permute.xlu0 %2542  ;;  %v7628_v52 = vpop.permute.xlu1 %2454  ;;  %5019 = vmatprep.subr.bf16.mxu0 %v5018_v2 }
 0x561   : > { %9265 = vst [vmem:[#allocation45_spill] sm:$0xff] %v7626_v25  ;;  %5021 = vmatpush3.bf16.msra.mxu0 %v5018_v2  ;;  %v9322_v25 = vld [vmem:[#allocation105_spill] sm:$0xff] }
 0x562   : > { %2591 = vrot.lane.b32.xlu0 %v2578_v50, %s5605_s28  ;;  %2034 = vrot.lane.b32.xlu1 %v2017_v23, %s5605_s28  ;;  %v2933_v50 = vld [vmem:[#allocation12 + $0x40] sm:$0xff]  ;;  %v2934_v23 = vld [vmem:[#allocation12 + $0x48] sm:$0xff] }
 0x564   : > { %v7636_v10 = vpop.permute.xlu0 %2546  ;;  %v7638_v21 = vpop.permute.xlu1 %2497 }
 0x565   : > { %9266 = vst [vmem:[#allocation104_spill] sm:$0xff] %v7636_v10 }
 0x566   : > { %2595 = vrot.lane.b32.xlu0 %v2580_v24, %s5605_s28  ;;  %2797 = vrot.lane.b32.xlu1 %v2784_v63, %s5605_s28 }
 0x568   : > { %v7646_v36 = vpop.permute.xlu0 %1889  ;;  %v7648_v37 = vpop.permute.xlu1 %2501 }
 0x569   : > { %9267 = vst [vmem:[#allocation48_spill] sm:$0xff] %v7646_v36 }
 0x56a   : > { %2799 = vrot.lane.b32.xlu0 %v2785_v19, %s5605_s28  ;;  %2801 = vrot.lane.b32.xlu1 %v2786_v45, %s5605_s28  ;;  %v5022_v19 = vpack.c.bf16 %v2934_v23, %v2933_v50  ;;  %v2935_v45 = vld [vmem:[#allocation12 + $0x50] sm:$0xff] }
 0x56c   : > { %v7656_v18 = vpop.permute.xlu0 %2188  ;;  %v7658_v29 = vpop.permute.xlu1 %2096  ;;  %5023 = vmatprep.subr.bf16.mxu0 %v5022_v19 }
 0x56d   : > { %9268 = vst [vmem:[#allocation47_spill] sm:$0xff] %v7656_v18  ;;  %5025 = vmatpush3.bf16.msra.mxu0 %v5022_v19 }
 0x56e   : > { %2803 = vrot.lane.b32.xlu0 %v2787_v5, %s5605_s28  ;;  %2805 = vrot.lane.b32.xlu1 %v2788_v6, %s5605_s28  ;;  %v2936_v5 = vld [vmem:[#allocation12 + $0x58] sm:$0xff]  ;;  %s9407_s28 = sld [smem:[#allocation112_spill]] }
 0x56f   : > { %v5026_v54 = vpack.c.bf16 %v2936_v5, %v2935_v45 }
 0x570   : > { %v7670_v7 = vpop.permute.xlu0 %2192  ;;  %v7672_v0 = vpop.permute.xlu1 %2100 }
 0x571   : > { %9269 = vst [vmem:[#allocation103_spill] sm:$0xff] %v7670_v7  ;;  %5027 = vmatprep.subr.bf16.mxu0 %v5026_v54 }
 0x572   : > { %5029 = vmatpush3.bf16.msra.mxu0 %v5026_v54 }
 0x573   : > { %5031 = vmatprep.subr.bf16.mxu0 %v5030_v49 }
 0x574   : > { %v7674_v34 = vpop.permute.xlu0 %2356  ;;  %v7676_v40 = vpop.permute.xlu1 %2290 }
 0x575   : > { %9270 = vst [vmem:[#allocation50_spill] sm:$0xff] %v7674_v34  ;;  %v9297_v34 = vld [vmem:[#allocation74_spill] sm:$0xff] }
 0x576   : > { %5033 = vmatpush3.bf16.msra.mxu0 %v5030_v49  ;;  %v5295_v49 = vld [vmem:[#allocation2 + $0x38] sm:$0x7] }
 0x577   : > { %v2427_v16 = vmul.f32 %v5295_v49, %v9292_v4 }
 0x578   : > { %v7678_v14 = vpop.permute.xlu0 %2360  ;;  %v7680_v22 = vpop.permute.xlu1 %2294 }
 0x579   : > { %9271 = vst [vmem:[#allocation49_spill] sm:$0xff] %v7678_v14 }
 0x57c   : > { %v7682_v24 = vpop.permute.xlu0 %2654  ;;  %v7684_v63 = vpop.permute.xlu1 %2544 }
 0x57d   : > { %9272 = vst [vmem:[#allocation52_spill] sm:$0xff] %v7682_v24  ;;  %9273 = vst [vmem:[#allocation51_spill] sm:$0xff] %v7684_v63  ;;  %v9324_v63 = vld [vmem:[#allocation106_spill] sm:$0xff] }
 0x580   : > { %v7686_v6 = vpop.permute.xlu0 %2658  ;;  %v7688_v59 = vpop.permute.xlu1 %2548 }
 0x581   : > { %9274 = vst [vmem:[#allocation54_spill] sm:$0xff] %v7686_v6  ;;  %9275 = vst [vmem:[#allocation53_spill] sm:$0xff] %v7688_v59 }
 0x584   : > { %v7690_v20 = vpop.permute.xlu0 %1932  ;;  %v7692_v28 = vpop.permute.xlu1 %1891 }
 0x585   : > { %9276 = vst [vmem:[#allocation100_spill] sm:$0xff] %v7690_v20  ;;  %9277 = vst [vmem:[#allocation99_spill] sm:$0xff] %v7692_v28  ;;  %v5297_v20 = vld [vmem:[#allocation2 + $0x8] sm:$0xe0]  ;;  %v9313_v28 = vld [vmem:[#allocation80_spill] sm:$0xff] }
 0x588   : > { %v7694_v38 = vpop.permute.xlu0 %1936  ;;  %v7696_v17 = vpop.permute.xlu1 %2190 }
 0x589   : > { %9278 = vst [vmem:[#allocation110_spill] sm:$0xff] %v7694_v38  ;;  %9279 = vst [vmem:[#allocation111_spill] sm:$0xff] %v7696_v17  ;;  %v9295_v38 = vld [vmem:[#allocation72_spill] sm:$0xff] }
 0x58a   : > { %v2065_v14 = vmul.f32 %v5297_v20, %v9295_v38 }
 0x58c   : > { %v7698_v27 = vpop.permute.xlu0 %2235  ;;  %v7700_v39 = vpop.permute.xlu1 %2194 }
 0x58d   : > { %9280 = vst [vmem:[#allocation34_spill] sm:$0xff] %v7698_v27  ;;  %9281 = vst [vmem:[#allocation39_spill] sm:$0xff] %v7700_v39  ;;  %v9300_v39 = vld [vmem:[#allocation91_spill] sm:$0xff] }
 0x590   : > { %v7702_v2 = vpop.permute.xlu0 %2239  ;;  %v7704_v50 = vpop.permute.xlu1 %2358 }
 0x591   : > { %9282 = vst [vmem:[#allocation35_spill] sm:$0xff] %v7702_v2  ;;  %9283 = vst [vmem:[#allocation55_spill] sm:$0xff] %v7704_v50  ;;  %v9293_v2 = vld [vmem:[#allocation89_spill] sm:$0xff] }
 0x594   : > { %v7706_v23 = vpop.permute.xlu0 %2390  ;;  %v7708_v19 = vpop.permute.xlu1 %2362 }
 0x595   : > { %9284 = vst [vmem:[#allocation36_spill] sm:$0xff] %v7706_v23  ;;  %9285 = vst [vmem:[#allocation56_spill] sm:$0xff] %v7708_v19  ;;  %v2426_v23 = vmul.f32 %v5296_v8, %v9292_v4  ;;  %v2474_v8 = vadd.f32 %v9293_v2, %v2427_v16  ;;  %v9305_v16 = vld [vmem:[#allocation78_spill] sm:$0xff] }
 0x598   : > { %v7710_v45 = vpop.permute.xlu0 %2394  ;;  %v7712_v5 = vpop.permute.xlu1 %2656 }
 0x599   : > { %9286 = vst [vmem:[#allocation57_spill] sm:$0xff] %v7710_v45  ;;  %9287 = vst [vmem:[#allocation37_spill] sm:$0xff] %v7712_v5  ;;  %v2462_v45 = vsel %vm861_vm4, %v9294_v55, %v9293_v2  ;;  %v9301_v55 = vld [vmem:[#allocation73_spill] sm:$0xff]  ;;  %v9304_v5 = vld [vmem:[#allocation76_spill] sm:$0xff] }
 0x59a   : > { %v2473_v7 = vadd.f32 %v2462_v45, %v2426_v23  ;;  %v2509_v27 = vsel %vm1940_vm11, %v9301_v55, %v9300_v39  ;;  %v9306_v2 = vld [vmem:[#allocation95_spill] sm:$0xff] }
 0x59b   : > { %v1893_v23 = vsel %vm861_vm4, %v9306_v2, %v9305_v16 }
 0x59c   : > { %v7714_v9 = vpop.permute.xlu0 %2701  ;;  %v7716_v54 = vpop.permute.xlu1 %2660 }
 0x59d   : > { %9288 = vst [vmem:[#allocation38_spill] sm:$0xff] %v7714_v9  ;;  %9289 = vst [vmem:[#allocation58_spill] sm:$0xff] %v7716_v54  ;;  %v5298_v9 = vld [vmem:[#allocation2] sm:$0xe0] }
 0x59e   : > { %v2064_v19 = vmul.f32 %v5298_v9, %v9295_v38  ;;  %v9302_v9 = vld [vmem:[#allocation77_spill] sm:$0xff]  ;;  %v9303_v54 = vld [vmem:[#allocation94_spill] sm:$0xff] }
 0x59f   : > { %v2149_v24 = vsel %vm1940_vm11, %v9303_v54, %v9302_v9  ;;  %v9310_v54 = vld [vmem:[#allocation75_spill] sm:$0xff] }
 0x5a0   : > { %v7718_v51 = vpop.permute.xlu0 %2705  ;;  %v7720_v46 = vpop.permute.xlu1 %1934 }
 0x5a1   : > { %9290 = vst [vmem:[#allocation59_spill] sm:$0xff] %v7718_v51  ;;  %9291 = vst [vmem:[#allocation60_spill] sm:$0xff] %v7720_v46  ;;  %v9296_v51 = vld [vmem:[#allocation92_spill] sm:$0xff] }
 0x5a2   : > { %v2102_v46 = vsel %vm861_vm4, %v9297_v34, %v9296_v51  ;;  %v2112_v20 = vadd.f32 %v9296_v51, %v2065_v14  ;;  %v5299_v34 = vld [vmem:[#allocation2] sm:$0xfc]  ;;  %v2520_v14 = vadd.f32 %v2509_v27, %v2473_v7  ;;  %v9314_v27 = vld [vmem:[#allocation101_spill] sm:$0xff] }
 0x5a3   : > { %v2111_v6 = vadd.f32 %v2102_v46, %v2064_v19  ;;  %v2521_v46 = vadd.f32 %v9300_v39, %v2474_v8  ;;  %v9309_v19 = vld [vmem:[#allocation93_spill] sm:$0xff] }
 0x5a4   : > { %v7732_v50 = vpop.permute.xlu0 %1980  ;;  %v7734_v49 = vpop.permute.xlu1 %1938  ;;  %v2556_v51 = vsel %vm1988_vm12, %v9310_v54, %v9309_v19  ;;  %v2159_v18 = vadd.f32 %v9302_v9, %v2112_v20  ;;  %v9315_v39 = vld [vmem:[#allocation81_spill] sm:$0xff] }
 0x5a5   : > { %9298 = vst [vmem:[#allocation61_spill] sm:$0xff] %v7732_v50  ;;  %9299 = vst [vmem:[#allocation62_spill] sm:$0xff] %v7734_v49  ;;  %v1855_v50 = vmul.f32 %v5299_v34, %v9304_v5  ;;  %v1856_v49 = vmul.f32 %v5300_v41, %v9304_v5  ;;  %v2158_v34 = vadd.f32 %v2149_v24, %v2111_v6  ;;  %v9311_v41 = vld [vmem:[#allocation97_spill] sm:$0xff]  ;;  %v9316_v24 = vld [vmem:[#allocation102_spill] sm:$0xff] }
 0x5a6   : > { %v2633_v17 = vmul.f32 %v7664_v47, %v9311_v41  ;;  %v2632_v7 = vmul.f32 %v7660_v56, %v9311_v41  ;;  %v2668_v8 = vsel %vm861_vm4, %v9315_v39, %v9314_v27  ;;  %v9317_v6 = vld [vmem:[#allocation82_spill] sm:$0xff] }
 0x5a7   : > { %v1902_v36 = vadd.f32 %v1893_v23, %v1855_v50  ;;  %v1903_v2 = vadd.f32 %v9305_v16, %v1856_v49  ;;  %v1941_v20 = vsel %vm1940_vm11, %v9317_v6, %v9316_v24  ;;  %v2568_v50 = vadd.f32 %v9309_v19, %v2521_v46  ;;  %v9320_v16 = vld [vmem:[#allocation79_spill] sm:$0xff]  ;;  %v9325_v46 = vld [vmem:[#allocation84_spill] sm:$0xff] }
 0x5a8   : > { %v7749_v45 = vpop.permute.xlu0 %1984  ;;  %v7751_v55 = vpop.permute.xlu1 %2237  ;;  %v2567_v49 = vadd.f32 %v2556_v51, %v2520_v14  ;;  %v2680_v39 = vadd.f32 %v9314_v27, %v2633_v17  ;;  %v2679_v10 = vadd.f32 %v2668_v8, %v2632_v7  ;;  %v2715_v14 = vsel %vm1940_vm11, %v9325_v46, %v9324_v63  ;;  %v9326_v19 = vld [vmem:[#allocation107_spill] sm:$0xff]  ;;  %v9327_v51 = vld [vmem:[#allocation85_spill] sm:$0xff] }
 0x5a9   : > { %9307 = vst [vmem:[#allocation63_spill] sm:$0xff] %v7749_v45  ;;  %9308 = vst [vmem:[#allocation64_spill] sm:$0xff] %v7751_v55  ;;  %v9312_v45 = vld [vmem:[#allocation98_spill] sm:$0xff]  ;;  %v1951_v59 = vadd.f32 %v9316_v24, %v1903_v2  ;;  %v1950_v6 = vadd.f32 %v1941_v20, %v1902_v36  ;;  %v7797_v17 = vadd.f32 %v9320_v16, %v2568_v50  ;;  %v9329_v24 = vld [vmem:[#allocation108_spill] sm:$0xff] }
 0x5aa   : > { %v2196_v55 = vsel %vm1988_vm12, %v9313_v28, %v9312_v45  ;;  %v9321_v28 = vld [vmem:[#allocation96_spill] sm:$0xff]  ;;  %v2206_v56 = vadd.f32 %v9312_v45, %v2159_v18  ;;  %v2727_v2 = vadd.f32 %v9324_v63, %v2680_v39  ;;  %v2726_v7 = vadd.f32 %v2715_v14, %v2679_v10  ;;  %v9330_v20 = vld [vmem:[#allocation86_spill] sm:$0xff]  ;;  %v9331_v46 = vld [vmem:[#allocation109_spill] sm:$0xff] }
 0x5ab   : > { %v2603_v23 = vsel %vm2036_vm13, %v9321_v28, %v9320_v16  ;;  %v2205_v54 = vadd.f32 %v2196_v55, %v2158_v34  ;;  %v1989_v28 = vsel %vm1988_vm12, %v9327_v51, %v9326_v19  ;;  %v1999_v27 = vadd.f32 %v9326_v19, %v1951_v59  ;;  %v9332_v50 = vld [vmem:[#allocation87_spill] sm:$0xff]  ;;  %v9360_v10 = vld [vmem:[#allocation100_spill] sm:$0xff] }
 0x5ac   : > { %v7772_v9 = vpop.permute.xlu0 %2748  ;;  %v7774_v47 = vpop.permute.xlu1 %2241  ;;  %v7799_v36 = vadd.f32 %v2603_v23, %v2567_v49  ;;  %v7802_v55 = vadd.f32 %v9322_v25, %v2206_v56  ;;  %v1998_v8 = vadd.f32 %v1989_v28, %v1950_v6  ;;  %v2037_v49 = vsel %vm2036_vm13, %v9332_v50, %v9331_v46 }
 0x5ad   : > { %9318 = vst [vmem:[#allocation65_spill] sm:$0xff] %v7772_v9  ;;  %9319 = vst [vmem:[#allocation66_spill] sm:$0xff] %v7774_v47  ;;  %v9323_v9 = vld [vmem:[#allocation83_spill] sm:$0xff]  ;;  %v7823_v23 = vadd.f32 %v9329_v24, %v2727_v2  ;;  %v2422_v6 = vmul.f32 %v9292_v4, %v7350_v61  ;;  %v2423_v14 = vmul.f32 %v9292_v4, %v7396_v60 }
 0x5ae   : > { %v2243_v47 = vsel %vm2036_vm13, %v9323_v9, %v9322_v25  ;;  %9328 = vst [vmem:[#allocation67_spill] sm:$0xff] %v7799_v36  ;;  %v2762_v9 = vsel %vm1988_vm12, %v9330_v20, %v9329_v24  ;;  %v7830_v39 = vadd.f32 %v2037_v49, %v1998_v8  ;;  %v2424_v19 = vmul.f32 %v9292_v4, %v7358_v43  ;;  %v9335_v8 = vld [vmem:[#allocation90_spill] sm:$0xff] }
 0x5af   : > { %v7804_v34 = vadd.f32 %v2243_v47, %v2205_v54  ;;  %9333 = vst [vmem:[#allocation70_spill] sm:$0xff] %v7823_v23  ;;  %v7825_v56 = vadd.f32 %v2762_v9, %v2726_v7  ;;  %v7828_v54 = vadd.f32 %v9331_v46, %v1999_v27  ;;  %v2425_v51 = vmul.f32 %v9292_v4, %v7404_v32 }
 0x5b0   : > { %v7792_v18 = vpop.permute.xlu0 %2752  ;;  %v7794_v45 = vpop.permute.xlu1 %2392  ;;  %v2066_v28 = vmul.f32 %v9295_v38, %v7348_v58  ;;  %v2067_v27 = vmul.f32 %v9295_v38, %v7426_v30  ;;  %v2068_v61 = vmul.f32 %v9295_v38, %v7360_v31  ;;  %v2069_v60 = vmul.f32 %v9295_v38, %v7434_v1 }
 0x5b1   : > { %9334 = vst [vmem:[#allocation88_spill] sm:$0xff] %v7825_v56  ;;  %v2268_v24 = vmul.f32 %v9335_v8, %v7348_v58  ;;  %v2460_v4 = vsel %vm861_vm4, %v7546_v35, %v7618_v15  ;;  %v2269_v20 = vmul.f32 %v9335_v8, %v7426_v30  ;;  %v2270_v9 = vmul.f32 %v7358_v43, %v9335_v8 }
 0x5b2   : > { %v2271_v46 = vmul.f32 %v7404_v32, %v9335_v8  ;;  %v2461_v31 = vsel %vm861_vm4, %v7556_v42, %v7628_v52  ;;  %v1859_v1 = vmul.f32 %v9304_v5, %v7418_v11  ;;  %v1860_v38 = vmul.f32 %v9304_v5, %v7468_v13 }
 0x5b3   : > { %v2628_v35 = vmul.f32 %v9311_v41, %v7454_v48  ;;  %v2470_v50 = vadd.f32 %v7618_v15, %v2423_v14  ;;  %v2507_v49 = vsel %vm1940_vm11, %v7566_v62, %v7638_v21  ;;  %v2629_v8 = vmul.f32 %v9311_v41, %v7500_v57 }
 0x5b4   : > { %v7814_v16 = vpop.permute.xlu0 %2028  ;;  %v7816_v25 = vpop.permute.xlu1 %2396  ;;  %v7880_v42 = vmul.f32 %v9311_v41, %v7358_v43  ;;  %v2469_v13 = vadd.f32 %v2460_v4, %v2422_v6  ;;  %v2472_v48 = vadd.f32 %v7628_v52, %v2425_v51  ;;  %v2508_v15 = vsel %vm1940_vm11, %v7576_v33, %v7648_v37 }
 0x5b5   : > { %v2103_v62 = vsel %vm861_vm4, %v7586_v12, %v7658_v29  ;;  %v2471_v57 = vadd.f32 %v2461_v31, %v2424_v19  ;;  %v2104_v43 = vsel %vm861_vm4, %v7596_v44, %v7672_v0  ;;  %v2631_v14 = vmul.f32 %v9311_v41, %v7404_v32 }
 0x5b6   : > { %v7900_v6 = vmul.f32 %v9304_v5, %v7348_v58  ;;  %v2516_v52 = vadd.f32 %v2507_v49, %v2469_v13  ;;  %v2517_v51 = vadd.f32 %v7638_v21, %v2470_v50  ;;  %v2519_v33 = vadd.f32 %v7648_v37, %v2472_v48  ;;  %v9339_v50 = vld [vmem:[#allocation104_spill] sm:$0xff] }
 0x5b7   : > { %v7906_v12 = vmul.f32 %v9304_v5, %v7426_v30  ;;  %v2518_v19 = vadd.f32 %v2508_v15, %v2471_v57  ;;  %v2113_v4 = vadd.f32 %v2103_v62, %v2066_v28  ;;  %v2114_v44 = vadd.f32 %v7658_v29, %v2067_v27  ;;  %v9336_v29 = vld [vmem:[#allocation51_spill] sm:$0xff]  ;;  %v9337_v28 = vld [vmem:[#allocation45_spill] sm:$0xff] }
 0x5b8   : > { %v7842_v2 = vpop.permute.xlu0 %2032  ;;  %v7844_v7 = vpop.permute.xlu1 %2703  ;;  %v2296_v32 = vsel %vm861_vm4, %v7606_v26, %v7676_v40  ;;  %v2115_v31 = vadd.f32 %v2104_v43, %v2068_v61  ;;  %v2116_v21 = vadd.f32 %v7672_v0, %v2069_v60  ;;  %v2297_v37 = vsel %vm861_vm4, %v7616_v3, %v7680_v22  ;;  %v9338_v26 = vld [vmem:[#allocation53_spill] sm:$0xff]  ;;  %v9340_v0 = vld [vmem:[#allocation99_spill] sm:$0xff]  ;;  %v9341_v60 = vld [vmem:[#allocation48_spill] sm:$0xff] }
 0x5b9   : > { %v2303_v5 = vadd.f32 %v7676_v40, %v2269_v20  ;;  %v2554_v27 = vsel %vm1988_vm12, %v9337_v28, %v9336_v29  ;;  %v2555_v49 = vsel %vm1988_vm12, %v9339_v50, %v9338_v26  ;;  %v2302_v13 = vadd.f32 %v2296_v32, %v2268_v24  ;;  %v9342_v3 = vld [vmem:[#allocation111_spill] sm:$0xff]  ;;  %v9348_v50 = vld [vmem:[#allocation54_spill] sm:$0xff] }
 0x5ba   : > { %v1895_v48 = vsel %vm861_vm4, %v9341_v60, %v9340_v0  ;;  %v9343_v15 = vld [vmem:[#allocation47_spill] sm:$0xff]  ;;  %v7933_v40 = vadd.f32 %v2297_v37, %v2270_v9  ;;  %v2305_v20 = vadd.f32 %v7680_v22, %v2271_v46  ;;  %v7937_v57 = vadd.f32 %v9336_v29, %v2517_v51  ;;  %v9345_v46 = vld [vmem:[#allocation37_spill] sm:$0xff]  ;;  %v9346_v51 = vld [vmem:[#allocation52_spill] sm:$0xff] }
 0x5bb   : > { %v7941_v24 = vadd.f32 %v2554_v27, %v2516_v52  ;;  %v7943_v32 = vadd.f32 %v2555_v49, %v2518_v19  ;;  %v1907_v22 = vadd.f32 %v9340_v0, %v1860_v38  ;;  %v2666_v37 = vsel %vm861_vm4, %v9346_v51, %v9345_v46  ;;  %v9347_v29 = vld [vmem:[#allocation58_spill] sm:$0xff]  ;;  %v9349_v19 = vld [vmem:[#allocation64_spill] sm:$0xff]  ;;  %v9351_v60 = vld [vmem:[#allocation39_spill] sm:$0xff] }
 0x5bc   : > { %v7882_v11 = vpop.permute.xlu0 %2795  ;;  %v7884_v63 = vpop.permute.xlu1 %2707  ;;  %v2667_v52 = vsel %vm861_vm4, %v9348_v50, %v9347_v29  ;;  %v9350_v27 = vld [vmem:[#allocation34_spill] sm:$0xff]  ;;  %v9353_v0 = vld [vmem:[#allocation55_spill] sm:$0xff]  ;;  %v9370_v36 = vrot.slane %v7804_v34, 3 }
 0x5c0   : > { %v2144_v41 = vpop.permute.xlu0 %2143  ;;  %v7912_v58 = vpop.permute.xlu1 %1982 }
 0x5c1   : > { %v2150_v30 = vsel %vm1940_vm11, %v7548_v53, %v2144_v41  ;;  %v2197_v53 = vsel %vm1988_vm12, %v9343_v15, %v9342_v3  ;;  %v2161_v62 = vadd.f32 %v2144_v41, %v2114_v44  ;;  %v9344_v44 = vld [vmem:[#allocation40_spill] sm:$0xff]  ;;  %v1906_v41 = vadd.f32 %v1895_v48, %v1859_v1  ;;  %v9352_v1 = vld [vmem:[#allocation103_spill] sm:$0xff]  ;;  %v9354_v48 = vld [vmem:[#allocation50_spill] sm:$0xff] }
 0x5c2   : > { %v2160_v61 = vadd.f32 %v2150_v30, %v2113_v4  ;;  %v7946_v30 = vadd.f32 %v9338_v26, %v2519_v33  ;;  %v2244_v33 = vsel %vm2036_vm13, %v9350_v27, %v9349_v19  ;;  %v2198_v38 = vsel %vm1988_vm12, %v9352_v1, %v9351_v60 }
 0x5c3   : > { %v2208_v26 = vadd.f32 %v9342_v3, %v2161_v62  ;;  %v2364_v15 = vsel %vm1988_vm12, %v9354_v48, %v9353_v0  ;;  %v2675_v3 = vadd.f32 %v2666_v37, %v2628_v35  ;;  %v9357_v62 = vld [vmem:[#allocation62_spill] sm:$0xff]  ;;  %v2677_v1 = vadd.f32 %v2667_v52, %v7880_v42  ;;  %v9359_v48 = vld [vmem:[#allocation60_spill] sm:$0xff] }
 0x5c4   : > { %v2207_v43 = vadd.f32 %v2197_v53, %v2160_v61  ;;  %v2148_v28 = vpop.permute.xlu0 %2147  ;;  %v7939_v4 = vpop.permute.xlu1 %1986  ;;  %v9355_v53 = vld [vmem:[#allocation56_spill] sm:$0xff]  ;;  %v9362_v37 = vld [vmem:[#allocation42_spill] sm:$0xff] }
 0x5c5   : > { %v2151_v9 = vsel %vm1940_vm11, %v9344_v44, %v2148_v28  ;;  %v2163_v61 = vadd.f32 %v2148_v28, %v2116_v21  ;;  %v9356_v44 = vld [vmem:[#allocation49_spill] sm:$0xff]  ;;  %v2678_v21 = vadd.f32 %v9347_v29, %v2631_v14  ;;  %v9358_v28 = vld [vmem:[#allocation110_spill] sm:$0xff] }
 0x5c6   : > { %v2162_v49 = vadd.f32 %v2151_v9, %v2115_v31  ;;  %v7970_v51 = vsel %vm1988_vm12, %v9356_v44, %v9355_v53  ;;  %v7972_v50 = vadd.f32 %v2244_v33, %v2207_v43  ;;  %v2676_v31 = vadd.f32 %v9345_v46, %v2629_v8  ;;  %v9361_v33 = vld [vmem:[#allocation38_spill] sm:$0xff] }
 0x5c7   : > { %v1943_v9 = vsel %vm1940_vm11, %v9358_v28, %v9357_v62  ;;  %v1942_v44 = vsel %vm1940_vm11, %v9360_v10, %v9359_v48  ;;  %v1955_v43 = vadd.f32 %v9357_v62, %v1907_v22  ;;  %v2713_v35 = vsel %vm1940_vm11, %v9361_v33, %v7844_v7  ;;  %v9363_v52 = vld [vmem:[#allocation66_spill] sm:$0xff]  ;;  %v9364_v28 = vld [vmem:[#allocation35_spill] sm:$0xff]  ;;  %v9365_v22 = vld [vmem:[#allocation36_spill] sm:$0xff] }
 0x5c8   : > { %v2325_v27 = vpop.permute.xlu0 %2324  ;;  %v2751_v47 = vpop.permute.xlu1 %2750  ;;  %v7988_v8 = vadd.f32 %v9349_v19, %v2208_v26  ;;  %v2209_v14 = vadd.f32 %v2198_v38, %v2162_v49  ;;  %v2210_v46 = vadd.f32 %v9351_v60, %v2163_v61  ;;  %v1954_v42 = vadd.f32 %v1943_v9, %v1906_v41  ;;  %v9366_v26 = vld [vmem:[#allocation57_spill] sm:$0xff]  ;;  %v9367_v41 = vld [vmem:[#allocation59_spill] sm:$0xff] }
 0x5c9   : > { %v2330_v29 = vsel %vm1940_vm11, %v9362_v37, %v2325_v27  ;;  %v2245_v10 = vsel %vm2036_vm13, %v9364_v28, %v9363_v52  ;;  %v2398_v62 = vsel %vm2036_vm13, %v9365_v22, %v7794_v45  ;;  %v2830_v33 = vrot.slane %v7972_v50, 3  ;;  %v9368_v38 = vld [vmem:[#allocation63_spill] sm:$0xff] }
 0x5ca   : > { %v2399_v49 = vsel %vm2036_vm13, %v9366_v26, %v7816_v25  ;;  %v2723_v61 = vadd.f32 %v7844_v7, %v2676_v31  ;;  %v2714_v60 = vsel %vm1940_vm11, %v9367_v41, %v7884_v63  ;;  %v1991_v9 = vsel %vm1988_vm12, %v9368_v38, %v7939_v4  ;;  %v9369_v7 = vld [vmem:[#allocation41_spill] sm:$0xff] }
 0x5cb   : > { %v2722_v37 = vadd.f32 %v2713_v35, %v2675_v3  ;;  %v2725_v28 = vadd.f32 %v7884_v63, %v2678_v21  ;;  %v2336_v50 = vadd.f32 %v2330_v29, %v2302_v13  ;;  %v2337_v22 = vadd.f32 %v2325_v27, %v2303_v5  ;;  %v9371_v3 = vld [vmem:[#allocation61_spill] sm:$0xff] }
 0x5cc   : > { %v2329_v59 = vpop.permute.xlu0 %2328  ;;  %v2755_v19 = vpop.permute.xlu1 %2754  ;;  %v2833_v23 = vrot.slane %v7988_v8, 3  ;;  %v8012_v56 = vadd.f32 %v2245_v10, %v2209_v14  ;;  %v8015_v26 = vadd.f32 %v9363_v52, %v2210_v46  ;;  %v2724_v41 = vadd.f32 %v2714_v60, %v2677_v1  ;;  %v9372_v21 = vld [vmem:[#allocation65_spill] sm:$0xff]  ;;  %v9373_v14 = vld [vmem:[#allocation43_spill] sm:$0xff] }
 0x5cd   : > { %v2331_v31 = vsel %vm1940_vm11, %v9369_v7, %v2329_v59  ;;  %v2831_v38 = vsel %vm2828_vm14, %v9370_v36, %v2830_v33  ;;  %v1990_v63 = vsel %vm1988_vm12, %v9371_v3, %v7912_v58  ;;  %v2002_v5 = vadd.f32 %v1991_v9, %v1954_v42 }
 0x5ce   : > { %v2760_v35 = vsel %vm1988_vm12, %v9372_v21, %v2751_v47  ;;  %v2339_v8 = vadd.f32 %v2329_v59, %v2305_v20  ;;  %v2370_v29 = vadd.f32 %v2364_v15, %v2336_v50  ;;  %v2371_v34 = vadd.f32 %v9353_v0, %v2337_v22  ;;  %v9375_v22 = vld [vmem:[#allocation44_spill] sm:$0xff] }
 0x5cf   : > { %v2338_v36 = vadd.f32 %v2331_v31, %v7933_v40  ;;  %v9374_v42 = vrot.slane %v7802_v55, 3  ;;  %v2835_v60 = vrot.slane %v8012_v56, 3  ;;  %v2837_v59 = vrot.slane %v8015_v26, 3  ;;  %v2939_v26 = vld [vmem:[#allocation12 + $0x70] sm:$0xff] }
 0x5d0   : > { %v1888_v13 = vpop.permute.xlu0 %1887  ;;  %v2031_v27 = vpop.permute.xlu1 %2030  ;;  %v2003_v20 = vadd.f32 %v7939_v4, %v1955_v43  ;;  %v2769_v9 = vadd.f32 %v2760_v35, %v2722_v37  ;;  %v2373_v55 = vadd.f32 %v9355_v53, %v2339_v8  ;;  %v2845_v56 = vadd.f32 %v2831_v38, %v7830_v39 }
 0x5d1   : > { %v1894_v46 = vsel %vm861_vm4, %v9373_v14, %v1888_v13  ;;  %v1905_v1 = vadd.f32 %v1888_v13, %v7906_v12  ;;  %v2834_v10 = vsel %vm2828_vm14, %v9374_v42, %v2833_v23  ;;  %v2761_v12 = vsel %vm1988_vm12, %v7792_v18, %v2755_v19 }
 0x5d2   : > { %v1904_v52 = vadd.f32 %v1894_v46, %v7900_v6  ;;  %v2770_v6 = vadd.f32 %v2751_v47, %v2723_v61  ;;  %v2404_v31 = vadd.f32 %v2398_v62, %v2370_v29  ;;  %v2405_v4 = vadd.f32 %v7794_v45, %v2371_v34 }
 0x5d3   : > { %v1953_v0 = vadd.f32 %v9359_v48, %v1905_v1  ;;  %v2372_v43 = vadd.f32 %v7970_v51, %v2338_v36  ;;  %v2846_v18 = vadd.f32 %v2834_v10, %v7828_v54  ;;  %v2772_v37 = vadd.f32 %v2755_v19, %v2725_v28  ;;  %v9376_v19 = vld [vmem:[#allocation46_spill] sm:$0xff] }
 0x5d4   : > { %v1952_v15 = vadd.f32 %v1942_v44, %v1904_v52  ;;  %v2592_v40 = vpop.permute.xlu0 %2591  ;;  %v2035_v50 = vpop.permute.xlu1 %2034  ;;  %v2771_v44 = vadd.f32 %v2761_v12, %v2724_v41  ;;  %v2836_v48 = vsel %vm2828_vm14, %v2830_v33, %v2835_v60  ;;  %v2407_v51 = vadd.f32 %v7816_v25, %v2373_v55 }
 0x5d5   : > { %v2601_v7 = vsel %vm2036_vm13, %v9375_v22, %v2592_v40  ;;  %v2611_v47 = vadd.f32 %v2592_v40, %v7937_v57  ;;  %v2001_v53 = vadd.f32 %v7912_v58, %v1953_v0  ;;  %v2039_v39 = vsel %vm2036_vm13, %v7842_v2, %v2035_v50 }
 0x5d6   : > { %v2000_v61 = vadd.f32 %v1990_v63, %v1952_v15  ;;  %v2610_v3 = vadd.f32 %v2601_v7, %v7941_v24  ;;  %v2838_v54 = vsel %vm2828_vm14, %v2833_v23, %v2837_v59  ;;  %v2406_v28 = vadd.f32 %v2399_v49, %v2372_v43 }
 0x5d7   : > { %v2038_v58 = vsel %vm2036_vm13, %v7814_v16, %v2031_v27  ;;  %v2860_v41 = vrot.slane %v2611_v47, 3  ;;  %v2050_v25 = vadd.f32 %v2039_v39, %v2002_v5  ;;  %v2051_v38 = vadd.f32 %v2035_v50, %v2003_v20  ;;  %v9378_v5 = vld [vmem:[#allocation67_spill] sm:$0xff] }
 0x5d8   : > { %v2596_v62 = vpop.permute.xlu0 %2595  ;;  %v2798_v45 = vpop.permute.xlu1 %2797  ;;  %v2048_v13 = vadd.f32 %v2038_v58, %v2000_v61  ;;  %v2049_v23 = vadd.f32 %v2031_v27, %v2001_v53  ;;  %v2857_v21 = vrot.slane %v2610_v3, 3  ;;  %v9377_v49 = vrot.slane %v7797_v17, 3  ;;  %v9380_v3 = vld [vmem:[#allocation88_spill] sm:$0xff] }
 0x5d9   : > { %v2602_v33 = vsel %vm2036_vm13, %v9376_v19, %v2596_v62  ;;  %v2613_v57 = vadd.f32 %v2596_v62, %v7946_v30  ;;  %v2807_v2 = vsel %vm2036_vm13, %v7882_v11, %v2798_v45  ;;  %v9379_v1 = vrot.slane %v9378_v5, 3 }
 0x5da   : > { %v2612_v24 = vadd.f32 %v2602_v33, %v7943_v32  ;;  %v2816_v32 = vadd.f32 %v2807_v2, %v2769_v9  ;;  %v2849_v20 = vadd.f32 %v2835_v60, %v2050_v25  ;;  %v2817_v17 = vadd.f32 %v2798_v45, %v2770_v6 }
 0x5db   : > { %v2861_v63 = vrot.slane %v2613_v57, 3  ;;  %v2848_v40 = vadd.f32 %v2838_v54, %v2049_v23  ;;  %v2850_v50 = vadd.f32 %v2837_v59, %v2051_v38  ;;  %v2847_v7 = vadd.f32 %v2836_v48, %v2048_v13  ;;  %v2940_v59 = vld [vmem:[#allocation12 + $0x78] sm:$0xff]  ;;  %v9381_v48 = vld [vmem:[#allocation70_spill] sm:$0xff] }
 0x5dc   : > { %v2858_v35 = vrot.slane %v2612_v24, 3  ;;  %v2800_v8 = vpop.permute.xlu0 %2799  ;;  %v2802_v14 = vpop.permute.xlu1 %2801  ;;  %v2903_v43 = vrot.slane %v2816_v32, 4  ;;  %v5034_v54 = vpack.c.bf16 %v2940_v59, %v2939_v26 }
 0x5dd   : > { %v2862_v30 = vsel %vm2828_vm14, %v2860_v41, %v2861_v63  ;;  %v2866_v16 = vsel %vm2828_vm14, %v2861_v63, %v9377_v49  ;;  %v2808_v46 = vsel %vm2036_vm13, %v2800_v8, %v2802_v14  ;;  %v2819_v10 = vadd.f32 %v2802_v14, %v2772_v37  ;;  %v9382_v63 = vld [vmem:[#allocation21_spill] sm:$0xff] }
 0x5de   : > { %v2859_v11 = vsel %vm2828_vm14, %v2857_v21, %v2858_v35  ;;  %v2864_v29 = vsel %vm2828_vm14, %v2858_v35, %v9379_v1  ;;  %v2872_v27 = vadd.f32 %v2862_v30, %v2405_v4  ;;  %v2874_v34 = vadd.f32 %v2866_v16, %v2407_v51  ;;  %5035 = vmatprep.subr.bf16.mxu0 %v5034_v54 }
 0x5df   : > { %v2871_v36 = vadd.f32 %v2859_v11, %v2404_v31  ;;  %v2873_v52 = vadd.f32 %v2864_v29, %v2406_v28  ;;  %v2818_v42 = vadd.f32 %v2808_v46, %v2771_v44  ;;  %v2907_v44 = vrot.slane %v2819_v10, 4  ;;  %5037 = vmatpush3.bf16.msra.mxu0 %v5034_v54 }
 0x5e0   : > { %v2880_v12 = vrot.slane %v2872_v27, 6  ;;  %v2804_v15 = vpop.permute.xlu0 %2803  ;;  %v2883_v0 = vrot.slane %v2874_v34, 6  ;;  %v2806_v9 = vpop.permute.xlu1 %2805  ;;  %v2906_v37 = vrot.slane %v2817_v17, 4  ;;  %5071 = vmatprep.subr.bf16.mxu0 %v9382_v63  ;;  %v9385_v17 = vld [vmem:[#allocation27_spill] sm:$0xff] }
 0x5e1   : > { %v2879_v55 = vrot.slane %v2871_v36, 6  ;;  %v2881_v22 = vrot.slane %v2873_v52, 6  ;;  %v2904_v4 = vrot.slane %v2818_v42, 4  ;;  %v2809_v31 = vsel %vm2036_vm13, %v2804_v15, %v2806_v9  ;;  %v9386_v15 = vld [vmem:[#allocation28_spill] sm:$0xff] }
 0x5e2   : > { %v2884_v6 = vsel %vm1806_vm9, %v2880_v12, %v2883_v0  ;;  %v2892_v61 = vadd.f32 %v2880_v12, %v2846_v18  ;;  %v2820_v39 = vadd.f32 %v2809_v31, %v9380_v3  ;;  %v2896_v45 = vadd.f32 %v2883_v0, %v2850_v50  ;;  %v9384_v12 = vld [vmem:[#allocation24_spill] sm:$0xff]  ;;  %v9387_v0 = vld [vmem:[#allocation30_spill] sm:$0xff]  ;;  %v3237_v31 = vld [vmem:[#allocation11 + $0x18] sm:$0x1f] }
 0x5e3   : > { %v2891_v47 = vadd.f32 %v2879_v55, %v2845_v56  ;;  %v2882_v60 = vsel %vm1806_vm9, %v2879_v55, %v2881_v22  ;;  %v2895_v53 = vadd.f32 %v2881_v22, %v2849_v20  ;;  %v2821_v51 = vadd.f32 %v2806_v9, %v9381_v48  ;;  %v9383_v20 = vld [vmem:[#allocation22_spill] sm:$0xff]  ;;  %v9388_v9 = vld [vmem:[#allocation31_spill] sm:$0xff]  ;;  %v9390_v22 = vld [vmem:[#allocation69_spill] sm:$0xff] }
 0x5e4   : > { %v2893_v62 = vadd.f32 %v2882_v60, %v2847_v7  ;;  %v2905_v19 = vsel %vm1777_vm7, %v2903_v43, %v2904_v4  ;;  %v2894_v56 = vadd.f32 %v2884_v6, %v2848_v40  ;;  %v2909_v33 = vrot.slane %v2820_v39, 4  ;;  %v9389_v40 = vld [vmem:[#allocation32_spill] sm:$0xff]  ;;  %v9392_v60 = vld [vmem:[#allocation23_spill] sm:$0xff]  ;;  %v9394_v39 = vld [vmem:[#allocation26_spill] sm:$0xff] }
 0x5e5   : > { %v2908_v57 = vsel %vm1777_vm7, %v2906_v37, %v2907_v44  ;;  %v2919_v28 = vadd.f32 %v2905_v19, %v2891_v47  ;;  %v2911_v58 = vrot.slane %v2821_v51, 4  ;;  %v9391_v43 = vld [vmem:[#allocation68_spill] sm:$0xff]  ;;  %v3235_v47 = vld [vmem:[#allocation11 + $0x8] sm:$0x1f]  ;;  %v3826_v6 = vrot.slane %v3237_v31, %v9392_v60 }
 0x5e6   : > { %v2920_v18 = vadd.f32 %v2908_v57, %v2892_v61  ;;  %v2910_v24 = vsel %vm1777_vm7, %v2904_v4, %v2909_v33  ;;  %v2923_v2 = vadd.f32 %v2909_v33, %v2895_v53  ;;  %v9393_v37 = vld [vmem:[#allocation25_spill] sm:$0xff]  ;;  %v3468_v53 = vrot.slane %v3235_v47, %v9392_v60 }
 0x5e7   : > { %v2912_v41 = vsel %vm1777_vm7, %v2907_v44, %v2911_v58  ;;  %v2921_v25 = vadd.f32 %v2910_v24, %v2893_v62  ;;  %v2924_v38 = vadd.f32 %v2911_v58, %v2896_v45  ;;  %v2947_v21 = vrot.slane %v2919_v28, 2  ;;  %v3236_v44 = vld [vmem:[#allocation11 + $0x10] sm:$0x1f]  ;;  %v8126_v62 = vld [vmem:[#allocation11] sm:$0x1f]  ;;  %v9396_v51 = vld [vmem:[#allocation29_spill] sm:$0xff] }
 0x5e8   : > { %v2922_v13 = vadd.f32 %v2912_v41, %v2894_v56  ;;  %v2953_v23 = vrot.slane %v2923_v2, 2  ;;  %v2950_v14 = vrot.slane %v2920_v18, 2  ;;  %v3873_v61 = vrot.slane %v3237_v31, %v9393_v37  ;;  %v8137_v56 = vld [vmem:[#allocation11 + $0x20] sm:$0x1f] }
 0x5e9   : > { %v2948_v35 = vrot.slane %v2921_v25, 2  ;;  %v2955_v8 = vrot.slane %v2924_v38, 2  ;;  %v3670_v3 = vrot.slane %v3236_v44, %v9392_v60  ;;  %v3920_v26 = vrot.slane %v3237_v31, %v9394_v39 }
 0x5ea   : > { %v2951_v30 = vrot.slane %v2922_v13, 2  ;;  %v3515_v59 = vrot.slane %v3235_v47, %v9393_v37  ;;  %v3262_v45 = vrot.slane %v8126_v62, %v9392_v60  ;;  %v3704_v48 = vrot.slane %v3236_v44, %v9393_v37 }
 0x5eb   : > { %v2954_v49 = vsel %vm1752_vm8, %v2948_v35, %v2953_v23  ;;  %v2949_v16 = vsel %vm1752_vm8, %v2947_v21, %v2948_v35  ;;  %v3967_v54 = vrot.slane %v3237_v31, %v9396_v51  ;;  %v3562_v19 = vrot.slane %v3235_v47, %v9394_v39  ;;  %v8170_v23 = vld [vmem:[#allocation2 + $0x38] sm:$0x1]  ;;  %v8172_v21 = vld [vmem:[#allocation2 + $0x30] sm:$0x1] }
 0x5ec   : > { %v2956_v32 = vsel %vm1752_vm8, %v2951_v30, %v2955_v8  ;;  %v2952_v46 = vsel %vm1752_vm8, %v2950_v14, %v2951_v30  ;;  %v3738_v33 = vrot.slane %v3236_v44, %v9394_v39  ;;  %v4032_v57 = vrot.slane %v8137_v56, %v9392_v60 }
 0x5ed   : > { %v5264_v11 = vpack.i.bf16 %v2956_v32, %v2954_v49  ;;  %v5259_v5 = vpack.i.bf16 %v2952_v46, %v2949_v16  ;;  %v3309_v28 = vrot.slane %v8126_v62, %v9393_v37  ;;  %v3609_v58 = vrot.slane %v3235_v47, %v9396_v51 }
 0x5ee   : > { %v3772_v18 = vrot.slane %v3236_v44, %v9396_v51  ;;  %v4079_v24 = vrot.slane %v8137_v56, %v9393_v37  ;;  %v3356_v2 = vrot.slane %v8126_v62, %v9394_v39  ;;  %v4126_v41 = vrot.slane %v8137_v56, %v9394_v39 }
 0x5ef   : > { %5265 = vrot.lane.b32.xlu1 %v5264_v11, %s5601_s22  ;;  %5260 = vrot.lane.b32.xlu0 %v5259_v5, %s5601_s22  ;;  %v3403_v25 = vrot.slane %v8126_v62, %v9396_v51  ;;  %v4173_v38 = vrot.slane %v8137_v56, %v9396_v51  ;;  %v8271_v51 = vld [vmem:[#allocation2 + $0x30] sm:$0x3] }
 0x5f3   : > { %3828 = vrot.lane.b32.xlu0 %v3826_v6, %s9247_s27  ;;  %3875 = vrot.lane.b32.xlu1 %v3873_v61, %s5594_s30 }
 0x5f7   : > { %3470 = vrot.lane.b32.xlu0 %v3468_v53, %s9247_s27  ;;  %3672 = vrot.lane.b32.xlu1 %v3670_v3, %s9247_s27 }
 0x5fb   : > { %3922 = vrot.lane.b32.xlu0 %v3920_v26, %s9395_s24  ;;  %3517 = vrot.lane.b32.xlu1 %v3515_v59, %s5594_s30 }
 0x5ff   : > { %3264 = vrot.lane.b32.xlu1 %v3262_v45, %s9247_s27  ;;  %3706 = vrot.lane.b32.xlu0 %v3704_v48, %s5594_s30  ;;  %v8269_v48 = vld [vmem:[#allocation2 + $0x38] sm:$0x3] }
 0x603   : > { %3969 = vrot.lane.b32.xlu0 %v3967_v54, %s5596_s3  ;;  %3564 = vrot.lane.b32.xlu1 %v3562_v19, %s9395_s24 }
 0x607   : > { %3740 = vrot.lane.b32.xlu0 %v3738_v33, %s9395_s24  ;;  %4034 = vrot.lane.b32.xlu1 %v4032_v57, %s9247_s27  ;;  %s5606_s27 = smov [#allocation15]  }
 0x60b   : > { %3311 = vrot.lane.b32.xlu0 %v3309_v28, %s5594_s30  ;;  %3611 = vrot.lane.b32.xlu1 %v3609_v58, %s5596_s3 }
 0x60f   : > { %3774 = vrot.lane.b32.xlu0 %v3772_v18, %s5596_s3  ;;  %4081 = vrot.lane.b32.xlu1 %v4079_v24, %s5594_s30 }
 0x613   : > { %3358 = vrot.lane.b32.xlu0 %v3356_v2, %s9395_s24  ;;  %4128 = vrot.lane.b32.xlu1 %v4126_v41, %s9395_s24  ;;  %s5507_s24 = sshll.u32 %s5606_s27, 4  ;;  %s5508_s24 = int_to_ptr.vmem [resolvable:$false] %s5507_s24 }
 0x617   : > { %3405 = vrot.lane.b32.xlu0 %v3403_v25, %s5596_s3  ;;  %4175 = vrot.lane.b32.xlu1 %v4173_v38, %s5596_s3 }
 0x661   : > { %v5266_v1 = vpop.permute.xlu1 %5265  ;;  %v5261_v29 = vpop.permute.xlu0 %5260 }
 0x662   : > { %v5268_v27 = vunpack.i.h.bf16 %v5266_v1  ;;  %v5267_v34 = vunpack.i.l.bf16 %v5266_v1  ;;  %v5263_v36 = vunpack.i.h.bf16 %v5261_v29  ;;  %v5262_v52 = vunpack.i.l.bf16 %v5261_v29 }
 0x664   : > { %v2965_v42 = vsel %vm813_vm3, %v5262_v52, %v5263_v36  ;;  %v2966_v10 = vsel %vm813_vm3, %v5267_v34, %v5268_v27  ;;  %v3448_v36 = vld [vmem:[#allocation2 + $0x8] sm:$0x80] }
 0x665   : > { %4834 = vmatprep.mubr.f32.mxu0 %v2965_v42  ;;  %v8174_v35 = vpop.permute.xlu0 %3828  ;;  %v8184_v32 = vpop.permute.xlu1 %3875 }
 0x666   : > { %4835 = vmatmul.mubr.f32.vlgmr.msra.gmra.mrb[2].mxu0 %v2966_v10  ;;  %v3836_v8 = vmul.f32 %v8174_v35, %v8170_v23  ;;  %v3835_v14 = vmul.f32 %v8174_v35, %v8172_v21  ;;  %v3883_v29 = vmul.f32 %v8184_v32, %v8170_v23  ;;  %v3882_v34 = vmul.f32 %v8184_v32, %v8172_v21  ;;  %v3447_v10 = vld [vmem:[#allocation2] sm:$0x80] }
 0x667   : > { %5073 = vmatpush3.bf16.msra.mxu0 %v9382_v63  ;;  %v9397_v63 = vld [vmem:[#allocation33_spill] sm:$0xff] }
 0x668   : > { %5075 = vmatprep.subr.bf16.mxu0 %v9383_v20  ;;  %v3812_v13 = vrot.slane %v3237_v31, %v9397_v63  ;;  %3851 = vrot.lane.b32.xlu1 %v3835_v14, %s5600_s26  ;;  %v3658_v30 = vrot.slane %v3236_v44, %v9397_v63  ;;  %v3454_v49 = vrot.slane %v3235_v47, %v9397_v63  ;;  %v8237_v47 = vld [vmem:[#allocation2 + $0x8] sm:$0xc0] }
 0x669   : > { %v8191_v1 = vpop.permute.xlu0 %3470  ;;  %v8201_v52 = vpop.permute.xlu1 %3672  ;;  %v4018_v37 = vrot.slane %v8137_v56, %v9397_v63 }
 0x66a   : > { %3814 = vrot.lane.b32.xlu0 %v3812_v13, %s9398_s12 }
 0x66b   : > { %5077 = vmatpush3.bf16.msra.mxu0 %v9383_v20  ;;  %v3474_v20 = vmul.f32 %v8191_v1, %v3448_v36 }
 0x66c   : > { %5079 = vmatprep.subr.bf16.mxu0 %v9384_v12  ;;  %3456 = vrot.lane.b32.xlu1 %v3454_v49, %s9398_s12 }
 0x66e   : > { %3853 = vrot.lane.b32.xlu0 %v3836_v8, %s5600_s26 }
 0x66f   : > { %5081 = vmatpush3.bf16.msra.mxu0 %v9384_v12  ;;  %v3473_v12 = vmul.f32 %v8191_v1, %v3447_v10 }
 0x670   : > { %5083 = vmatprep.subr.bf16.mxu0 %v9385_v17  ;;  %3898 = vrot.lane.b32.xlu1 %v3882_v34, %s5601_s22 }
 0x672   : > { %3660 = vrot.lane.b32.xlu0 %v3658_v30, %s9398_s12 }
 0x673   : > { %5085 = vmatpush3.bf16.msra.mxu0 %v9385_v17  ;;  %v8209_v17 = vpop.permute.xlu0 %3922 }
 0x674   : > { %5087 = vmatprep.subr.bf16.mxu0 %v9386_v15  ;;  %3485 = vrot.lane.b32.xlu1 %v3473_v12, %s5600_s26 }
 0x676   : > { %3900 = vrot.lane.b32.xlu0 %v3883_v29, %s5601_s22 }
 0x677   : > { %5089 = vmatpush3.bf16.msra.mxu0 %v9386_v15  ;;  %v8211_v15 = vpop.permute.xlu1 %3517 }
 0x678   : > { %5091 = vmatprep.subr.bf16.mxu0 %v9387_v0 }
 0x67a   : > { %3487 = vrot.lane.b32.xlu0 %v3474_v20, %s5600_s26 }
 0x67b   : > { %5093 = vmatpush3.bf16.msra.mxu0 %v9387_v0  ;;  %v3930_v0 = vmul.f32 %v8209_v17, %v8170_v23 }
 0x67c   : > { %5095 = vmatprep.subr.bf16.mxu0 %v9388_v9 }
 0x67e   : > { %3947 = vrot.lane.b32.xlu0 %v3930_v0, %s5602_s14 }
 0x67f   : > { %5097 = vmatpush3.bf16.msra.mxu0 %v9388_v9  ;;  %v3929_v9 = vmul.f32 %v8209_v17, %v8172_v21 }
 0x680   : > { %5099 = vmatprep.subr.bf16.mxu0 %v9389_v40 }
 0x681   : > { %3945 = vrot.lane.b32.xlu1 %v3929_v9, %s5602_s14 }
 0x683   : > { %5101 = vmatpush3.bf16.msra.mxu0 %v9389_v40  ;;  %v8219_v40 = vpop.permute.xlu0 %3706 }
 0x687   : > { %v8235_v31 = vpop.permute.xlu0 %3969 }
 0x688   : > { %v3976_v44 = vmul.f32 %v8235_v31, %v8172_v21  ;;  %v3977_v61 = vmul.f32 %v8235_v31, %v8170_v23 }
 0x68b   : > { %v8245_v6 = vpop.permute.xlu0 %3740 }
 0x68f   : > { %v8259_v26 = vpop.permute.xlu0 %3311 }
 0x693   : > { %v8273_v54 = vpop.permute.xlu0 %3774 }
 0x697   : > { %v8287_v58 = vpop.permute.xlu0 %3358 }
 0x698   : > { %v3362_v18 = vmul.f32 %v8287_v58, %v8237_v47 }
 0x69b   : > { %v8303_v38 = vpop.permute.xlu0 %3405 }
 0x739   : > { %v4836_v50 = vpop.f32.mrb[2].mxu0 }
 0x73a   : > { %v3035_v55 = vpop.f32.mrb[3].mxu0  ;;  %v3045_v4 = vmul.f32 %v4836_v50, %v9391_v43  ;;  %v3520_v50 = vmul.f32 %v8211_v15, %v3447_v10 }
 0x73b   : > { %v8112_v7 = vmul.f32 %v3035_v55, %v9390_v22  ;;  %v3248_v55 = vrot.slane %v8126_v62, %v9397_v63  ;;  %v8226_v22 = vpop.permute.xlu1 %3264  ;;  %v3315_v62 = vmul.f32 %v8259_v26, %v8237_v47  ;;  %v3409_v63 = vmul.f32 %v8303_v38, %v8237_v47 }
 0x73c   : > { %3532 = vrot.lane.b32.xlu0 %v3520_v50, %s5601_s22  ;;  %v3268_v60 = vmul.f32 %v8226_v22, %v8237_v47 }
 0x73d   : > { %4869 = vmatprep.mubr.f32.mxu1 %v8112_v7  ;;  %3250 = vrot.lane.b32.xlu1 %v3248_v55, %s9398_s12 }
 0x73e   : > { %4870 = vmatmul.mubr.f32.vlgmr.msra.gmra.mrb[2].mxu1 %v3045_v4 }
 0x73f   : > { %v8253_v53 = vpop.permute.xlu1 %3564 }
 0x740   : > { %v3568_v3 = vmul.f32 %v8253_v53, %v3448_v36  ;;  %v3567_v39 = vmul.f32 %v8253_v53, %v3447_v10 }
 0x743   : > { %v8261_v59 = vpop.permute.xlu1 %4034 }
 0x744   : > { %v4042_v19 = vmul.f32 %v8261_v59, %v8269_v48  ;;  %v4041_v56 = vmul.f32 %v8261_v59, %v8271_v51 }
 0x747   : > { %v8281_v33 = vpop.permute.xlu1 %3611 }
 0x748   : > { %v3615_v57 = vmul.f32 %v8281_v33, %v3448_v36  ;;  %v3614_v28 = vmul.f32 %v8281_v33, %v3447_v10 }
 0x74b   : > { %v8295_v2 = vpop.permute.xlu1 %4081 }
 0x74c   : > { %v4089_v41 = vmul.f32 %v8295_v2, %v8269_v48  ;;  %v4088_v25 = vmul.f32 %v8295_v2, %v8271_v51 }
 0x74f   : > { %v8311_v8 = vpop.permute.xlu1 %4128 }
 0x750   : > { %v4136_v14 = vmul.f32 %v8311_v8, %v8269_v48  ;;  %v4135_v30 = vmul.f32 %v8311_v8, %v8271_v51 }
 0x753   : > { %v8321_v49 = vpop.permute.xlu1 %4175 }
 0x811   : > { %v4871_v16 = vpop.f32.mrb[2].mxu1 }
 0x812   : > { %v8186_v46 = vsub.f32 %v3045_v4, %v4871_v16  ;;  %v3112_v11 = vpop.f32.mrb[3].mxu1  ;;  %v3521_v4 = vmul.f32 %v8211_v15, %v3448_v36  ;;  %v8323_v16 = vpop.permute.xlu0 %3814 }
 0x813   : > { %v8189_v5 = vsub.f32 %v8112_v7, %v3112_v11  ;;  %v8228_v7 = vld [vmem:[#allocation2] sm:$0xc0]  ;;  %v8325_v11 = vpop.permute.xlu1 %3851 }
 0x814   : > { %v3124_v42 = vmul.f32 %v8186_v46, %v8186_v46  ;;  %v3267_v43 = vmul.f32 %v8226_v22, %v8228_v7  ;;  %3534 = vrot.lane.b32.xlu1 %v3521_v4, %s5601_s22  ;;  %v3314_v45 = vmul.f32 %v8259_v26, %v8228_v7  ;;  %v3361_v24 = vmul.f32 %v8287_v58, %v8228_v7 }
 0x815   : > { %v3123_v27 = vmul.f32 %v8189_v5, %v8189_v5  ;;  %v3408_v13 = vmul.f32 %v8303_v38, %v8228_v7 }
 0x816   : > { %3279 = vrot.lane.b32.xlu0 %v3267_v43, %s5600_s26  ;;  %v8327_v29 = vpop.permute.xlu0 %3853 }
 0x817   : > { %4904 = vmatprep.mubr.f32.mxu0 %v3123_v27  ;;  %v8329_v27 = vpop.permute.xlu1 %3456 }
 0x818   : > { %4905 = vmatmul.mubr.f32.vlgmr.msra.gmra.mrb[4].mxu0 %v3124_v42  ;;  %3281 = vrot.lane.b32.xlu1 %v3268_v60, %s5600_s26 }
 0x81a   : > { %3992 = vrot.lane.b32.xlu0 %v3976_v44, %s5603_s15  ;;  %v8331_v34 = vpop.permute.xlu0 %3660 }
 0x81b   : > { %v8333_v36 = vpop.permute.xlu1 %3898 }
 0x81c   : > { %3994 = vrot.lane.b32.xlu1 %v3977_v61, %s5603_s15 }
 0x81e   : > { %4020 = vrot.lane.b32.xlu0 %v4018_v37, %s9398_s12  ;;  %v8335_v42 = vpop.permute.xlu0 %3900  ;;  %s9408_s12 = sld [smem:[#allocation113_spill]] }
 0x81f   : > { %v8337_v10 = vpop.permute.xlu1 %3485 }
 0x820   : > { %3579 = vrot.lane.b32.xlu1 %v3567_v39, %s5602_s14  ;;  %9399 = vst [vmem:[#allocation89_spill] sm:$0xff] %v8337_v10 }
 0x822   : > { %3581 = vrot.lane.b32.xlu0 %v3568_v3, %s5602_s14  ;;  %v8339_v20 = vpop.permute.xlu0 %3487 }
 0x823   : > { %9400 = vst [vmem:[#allocation71_spill] sm:$0xff] %v8339_v20  ;;  %v8341_v12 = vpop.permute.xlu1 %3945 }
 0x824   : > { %3326 = vrot.lane.b32.xlu1 %v3314_v45, %s5601_s22 }
 0x826   : > { %3328 = vrot.lane.b32.xlu0 %v3315_v62, %s5601_s22  ;;  %v8343_v0 = vpop.permute.xlu0 %3947 }
 0x827   : > { %v8345_v9 = vpop.permute.xlu1 %3250 }
 0x828   : > { %4057 = vrot.lane.b32.xlu1 %v4041_v56, %s5600_s26  ;;  %v3254_v56 = vmul.f32 %v8345_v9, %v8237_v47 }
 0x82a   : > { %4059 = vrot.lane.b32.xlu0 %v4042_v19, %s5600_s26  ;;  %v8347_v50 = vpop.permute.xlu0 %3532 }
 0x82b   : > { %9401 = vst [vmem:[#allocation72_spill] sm:$0xff] %v8347_v50 }
 0x82c   : > { %3626 = vrot.lane.b32.xlu1 %v3614_v28, %s5603_s15  ;;  %v3253_v28 = vmul.f32 %v8345_v9, %v8228_v7 }
 0x82e   : > { %3628 = vrot.lane.b32.xlu0 %v3615_v57, %s5603_s15 }
 0x830   : > { %3373 = vrot.lane.b32.xlu1 %v3361_v24, %s5602_s14 }
 0x832   : > { %3375 = vrot.lane.b32.xlu0 %v3362_v18, %s5602_s14 }
 0x834   : > { %4104 = vrot.lane.b32.xlu1 %v4088_v25, %s5601_s22 }
 0x836   : > { %4106 = vrot.lane.b32.xlu0 %v4089_v41, %s5601_s22 }
 0x838   : > { %3420 = vrot.lane.b32.xlu1 %v3408_v13, %s5603_s15 }
 0x83a   : > { %3422 = vrot.lane.b32.xlu0 %v3409_v63, %s5603_s15 }
 0x83c   : > { %4151 = vrot.lane.b32.xlu1 %v4135_v30, %s5602_s14 }
 0x83e   : > { %4153 = vrot.lane.b32.xlu0 %v4136_v14, %s5602_s14 }
 0x886   : > { %v8349_v55 = vpop.permute.xlu1 %3534 }
 0x887   : > { %9402 = vst [vmem:[#allocation92_spill] sm:$0xff] %v8349_v55 }
 0x888   : > { %v3280_v43 = vpop.permute.xlu0 %3279 }
 0x88a   : > { %v3282_v4 = vpop.permute.xlu1 %3281 }
 0x88b   : > { %v3291_v18 = vsel %vm765_vm2, %v3280_v43, %v3282_v4  ;;  %v3301_v25 = vadd.f32 %v3282_v4, %v3254_v56 }
 0x88c   : > { %v8351_v44 = vpop.permute.xlu0 %3992  ;;  %v3300_v14 = vadd.f32 %v3291_v18, %v3253_v28 }
 0x88e   : > { %v8353_v60 = vpop.permute.xlu1 %3994 }
 0x890   : > { %v8355_v37 = vpop.permute.xlu0 %4020 }
 0x891   : > { %v4028_v63 = vmul.f32 %v8355_v37, %v8269_v48  ;;  %v4027_v47 = vmul.f32 %v8355_v37, %v8271_v51 }
 0x892   : > { %v8357_v61 = vpop.permute.xlu1 %3579 }
 0x893   : > { %9403 = vst [vmem:[#allocation74_spill] sm:$0xff] %v8357_v61 }
 0x894   : > { %v8359_v3 = vpop.permute.xlu0 %3581 }
 0x895   : > { %9404 = vst [vmem:[#allocation91_spill] sm:$0xff] %v8359_v3 }
 0x896   : > { %v3327_v39 = vpop.permute.xlu1 %3326 }
 0x898   : > { %v3329_v62 = vpop.permute.xlu0 %3328 }
 0x899   : > { %v3338_v30 = vsel %vm813_vm3, %v3327_v39, %v3329_v62  ;;  %v3348_v43 = vadd.f32 %v3329_v62, %v3301_v25 }
 0x89a   : > { %v4058_v45 = vpop.permute.xlu1 %4057  ;;  %v3347_v4 = vadd.f32 %v3338_v30, %v3300_v14 }
 0x89c   : > { %v4060_v19 = vpop.permute.xlu0 %4059 }
 0x89d   : > { %v4063_v57 = vsel %vm765_vm2, %v4058_v45, %v4060_v19  ;;  %v4075_v61 = vadd.f32 %v4060_v19, %v4028_v63 }
 0x89e   : > { %v3627_v24 = vpop.permute.xlu1 %3626  ;;  %v4074_v56 = vadd.f32 %v4063_v57, %v4027_v47 }
 0x8a0   : > { %v8367_v41 = vpop.permute.xlu0 %3628 }
 0x8a1   : > { %9405 = vst [vmem:[#allocation73_spill] sm:$0xff] %v8367_v41  ;;  %v8373_v13 = vsel %vm909_vm5, %v3627_v24, %v8367_v41 }
 0x8a2   : > { %9406 = vst [vmem:[#allocation77_spill] sm:$0xff] %v8373_v13  ;;  %v3374_v7 = vpop.permute.xlu1 %3373 }
 0x8a4   : > { %v3376_v45 = vpop.permute.xlu0 %3375 }
 0x8a5   : > { %v3385_v3 = vsel %vm861_vm4, %v3374_v7, %v3376_v45  ;;  %v3395_v10 = vadd.f32 %v3376_v45, %v3348_v43 }
 0x8a6   : > { %v4105_v50 = vpop.permute.xlu1 %4104  ;;  %v3394_v28 = vadd.f32 %v3385_v3, %v3347_v4 }
 0x8a8   : > { %v4107_v55 = vpop.permute.xlu0 %4106 }
 0x8a9   : > { %v4110_v24 = vsel %vm813_vm3, %v4105_v50, %v4107_v55  ;;  %v8380_v13 = vadd.f32 %v4107_v55, %v4075_v61  ;;  %v4615_v55 = vld [vmem:[%s9407_s28] ss:$0 sm:$0xff]  ;;  %s4449_s28 = scalar_lea.sflag [#allocation5], %s5945_s13 }
 0x8aa   : > { %v8382_v18 = vadd.f32 %v4110_v24, %v4074_v56  ;;  %v3421_v41 = vpop.permute.xlu1 %3420 }
 0x8ac   : > { %v3423_v39 = vpop.permute.xlu0 %3422 }
 0x8ad   : > { %v3432_v20 = vsel %vm909_vm5, %v3421_v41, %v3423_v39  ;;  %v8385_v62 = vadd.f32 %v3423_v39, %v3395_v10  ;;  %v4616_v10 = vld [vmem:[%s9408_s12] ss:$0 sm:$0xff]  ;;  %s5509_s12 = scalar_lea.vmem %s5508_s24, 512 }
 0x8ae   : > { %v8387_v19 = vadd.f32 %v3432_v20, %v3394_v28  ;;  %v8399_v45 = vpop.permute.xlu1 %4151 }
 0x8b0   : > { %v8401_v43 = vpop.permute.xlu0 %4153 }
 0x8eb   : > { %v4906_v25 = vpop.f32.mrb[4].mxu0 }
 0x8ec   : > { %v3197_v57 = vadd.f32 1e-06, %v4906_v25  ;;  %v3191_v63 = vpop.f32.mrb[5].mxu0 }
 0x8ed   : > { %v3192_v14 = vadd.f32 1e-06, %v3191_v63 }
 0x8ee   : > { %5283 = vrsqrt.f32 %v3197_v57 }
 0x8ef   : > { %5285 = vrsqrt.f32 %v3192_v14 }
 0x8f8   : > { %v5284_v50 = vpop.eup %5283 }
 0x8f9   : > { %v5286_v61 = vpop.eup %5285  ;;  %v3203_v3 = vmul.f32 %v5284_v50, %v8186_v46 }
 0x8fa   : > { %v3202_v41 = vmul.f32 %v5286_v61, %v8189_v5 }
 0x8fb   : > { %v3212_v20 = vmul.f32 %v4615_v55, %v3203_v3 }
 0x8fc   : > { %v3211_v47 = vmul.f32 %v4615_v55, %v3202_v41 }
 0x8fd   : > { %v3221_v30 = vadd.f32 %v4616_v10, %v3212_v20 }
 0x8fe   : > { %v3220_v7 = vadd.f32 %v4616_v10, %v3211_v47 }
 0x8ff   : > { %3226 = vrot.lane.b32.xlu1 %v3221_v30, %s5594_s30 }
 0x900   : > { %3224 = vrot.lane.b32.xlu0 %v3220_v7, %s5594_s30  ;;  %s9417_s30 = sshll.u32 %s5945_s13, 4 }
 0x971   : > { %v3227_v4 = vpop.permute.xlu1 %3226 }
 0x972   : > { %3232 = vst.msk [vmem:[#allocation2 + $0x20] sm:$0xff] %vm702_vm0, %v3227_v4  ;;  %v3225_v46 = vpop.permute.xlu0 %3224 }
 0x973   : > { %3233 = vst.msk [vmem:[#allocation2 + $0x28] sm:$0xff] %vm704_vm1, %v3227_v4  ;;  %3231 = vst.msk [vmem:[#allocation2 + $0x18] sm:$0xff] %vm704_vm1, %v3225_v46 }
 0x974   : > { %3230 = vst.msk [vmem:[#allocation2 + $0x10] sm:$0xff] %vm702_vm0, %v3225_v46 }
 0x979   : > { %v8407_v5 = vld [vmem:[#allocation2 + $0x20] sm:$0xff] }
 0x97a   : > { %v8409_v56 = vld [vmem:[#allocation2 + $0x28] sm:$0xff]  ;;  %v3833_v24 = vmul.f32 %v8174_v35, %v8407_v5  ;;  %v3880_v39 = vmul.f32 %v8184_v32, %v8407_v5  ;;  %v8421_v57 = vld [vmem:[#allocation2 + $0x20] sm:$0x7f]  ;;  %v3677_v55 = vmul.f32 %v8407_v5, %v8201_v52  ;;  %v3927_v3 = vmul.f32 %v8209_v17, %v8407_v5 }
 0x97b   : > { %v3834_v28 = vmul.f32 %v8174_v35, %v8409_v56  ;;  %v3881_v25 = vmul.f32 %v8184_v32, %v8409_v56  ;;  %v8423_v63 = vld [vmem:[#allocation2 + $0x28] sm:$0x7f]  ;;  %v3477_v14 = vmul.f32 %v8191_v1, %v8421_v57  ;;  %v3678_v61 = vmul.f32 %v8409_v56, %v8201_v52  ;;  %v8461_v46 = vld [vmem:[#allocation2 + $0x20] sm:$0x3f] }
 0x97c   : > { %3847 = vrot.lane.b32.xlu1 %v3833_v24, %s5600_s26  ;;  %v3478_v50 = vmul.f32 %v8191_v1, %v8423_v63  ;;  %v3928_v41 = vmul.f32 %v8209_v17, %v8409_v56  ;;  %v3525_v10 = vmul.f32 %v8211_v15, %v8423_v63  ;;  %v3524_v20 = vmul.f32 %v8211_v15, %v8421_v57  ;;  %v8463_v24 = vld [vmem:[#allocation2 + $0x28] sm:$0x3f] }
 0x97d   : > { %3849 = vrot.lane.b32.xlu0 %v3834_v28, %s5600_s26  ;;  %v3712_v47 = vmul.f32 %v8409_v56, %v8219_v40  ;;  %v3711_v30 = vmul.f32 %v8407_v5, %v8219_v40  ;;  %v3975_v7 = vmul.f32 %v8235_v31, %v8409_v56  ;;  %v3974_v4 = vmul.f32 %v8235_v31, %v8407_v5 }
 0x97e   : > { %v3271_v28 = vmul.f32 %v8226_v22, %v8461_v46 }
 0x980   : > { %3894 = vrot.lane.b32.xlu1 %v3880_v39, %s5601_s22  ;;  %v3272_v39 = vmul.f32 %v8226_v22, %v8463_v24 }
 0x981   : > { %3896 = vrot.lane.b32.xlu0 %v3881_v25, %s5601_s22  ;;  %v3571_v25 = vmul.f32 %v8253_v53, %v8421_v57 }
 0x984   : > { %3493 = vrot.lane.b32.xlu1 %v3477_v14, %s5600_s26  ;;  %v3572_v14 = vmul.f32 %v8253_v53, %v8423_v63 }
 0x985   : > { %3495 = vrot.lane.b32.xlu0 %v3478_v50, %s5600_s26  ;;  %v3745_v50 = vmul.f32 %v8407_v5, %v8245_v6 }
 0x988   : > { %3687 = vrot.lane.b32.xlu1 %v3677_v55, %s5600_s26  ;;  %v3746_v55 = vmul.f32 %v8409_v56, %v8245_v6 }
 0x989   : > { %3689 = vrot.lane.b32.xlu0 %v3678_v61, %s5600_s26  ;;  %v4039_v61 = vmul.f32 %v8261_v59, %v8407_v5 }
 0x98c   : > { %3941 = vrot.lane.b32.xlu1 %v3927_v3, %s5602_s14  ;;  %v4040_v3 = vmul.f32 %v8261_v59, %v8409_v56 }
 0x98d   : > { %3943 = vrot.lane.b32.xlu0 %v3928_v41, %s5602_s14  ;;  %v3318_v41 = vmul.f32 %v8259_v26, %v8461_v46 }
 0x990   : > { %3542 = vrot.lane.b32.xlu1 %v3525_v10, %s5601_s22  ;;  %v3319_v10 = vmul.f32 %v8259_v26, %v8463_v24 }
 0x991   : > { %3540 = vrot.lane.b32.xlu0 %v3524_v20, %s5601_s22  ;;  %v3618_v20 = vmul.f32 %v8281_v33, %v8421_v57 }
 0x994   : > { %3723 = vrot.lane.b32.xlu1 %v3712_v47, %s5601_s22  ;;  %v3619_v47 = vmul.f32 %v8281_v33, %v8423_v63 }
 0x995   : > { %3721 = vrot.lane.b32.xlu0 %v3711_v30, %s5601_s22  ;;  %v3779_v30 = vmul.f32 %v8407_v5, %v8273_v54 }
 0x998   : > { %3990 = vrot.lane.b32.xlu1 %v3975_v7, %s5603_s15  ;;  %v3780_v7 = vmul.f32 %v8409_v56, %v8273_v54 }
 0x999   : > { %3988 = vrot.lane.b32.xlu0 %v3974_v4, %s5603_s15  ;;  %v4086_v4 = vmul.f32 %v8295_v2, %v8407_v5 }
 0x99c   : > { %3287 = vrot.lane.b32.xlu1 %v3271_v28, %s5600_s26  ;;  %v4087_v28 = vmul.f32 %v8295_v2, %v8409_v56 }
 0x99d   : > { %3289 = vrot.lane.b32.xlu0 %v3272_v39, %s5600_s26  ;;  %v3365_v39 = vmul.f32 %v8287_v58, %v8461_v46 }
 0x9a0   : > { %3587 = vrot.lane.b32.xlu1 %v3571_v25, %s5602_s14  ;;  %v3366_v25 = vmul.f32 %v8287_v58, %v8463_v24 }
 0x9a1   : > { %3589 = vrot.lane.b32.xlu0 %v3572_v14, %s5602_s14  ;;  %v4133_v14 = vmul.f32 %v8311_v8, %v8407_v5 }
 0x9a4   : > { %3755 = vrot.lane.b32.xlu1 %v3745_v50, %s5602_s14  ;;  %v4134_v50 = vmul.f32 %v8311_v8, %v8409_v56 }
 0x9a5   : > { %3757 = vrot.lane.b32.xlu0 %v3746_v55, %s5602_s14  ;;  %v3412_v55 = vmul.f32 %v8303_v38, %v8461_v46 }
 0x9a8   : > { %4053 = vrot.lane.b32.xlu1 %v4039_v61, %s5600_s26  ;;  %v3413_v61 = vmul.f32 %v8303_v38, %v8463_v24 }
 0x9a9   : > { %4055 = vrot.lane.b32.xlu0 %v4040_v3, %s5600_s26  ;;  %v4180_v3 = vmul.f32 %v8321_v49, %v8407_v5 }
 0x9ac   : > { %3334 = vrot.lane.b32.xlu1 %v3318_v41, %s5601_s22  ;;  %v4181_v41 = vmul.f32 %v8321_v49, %v8409_v56 }
 0x9ad   : > { %3336 = vrot.lane.b32.xlu0 %v3319_v10, %s5601_s22  ;;  %v8537_v10 = vld [vmem:[#allocation2 + $0x18] sm:$0xfe] }
 0x9b0   : > { %3634 = vrot.lane.b32.xlu1 %v3618_v20, %s5603_s15  ;;  %v8539_v20 = vld [vmem:[#allocation2 + $0x10] sm:$0xfe] }
 0x9b1   : > { %3636 = vrot.lane.b32.xlu0 %v3619_v47, %s5603_s15  ;;  %v3832_v47 = vmul.f32 %v8174_v35, %v8537_v10 }
 0x9b4   : > { %3789 = vrot.lane.b32.xlu1 %v3779_v30, %s5603_s15  ;;  %v3831_v30 = vmul.f32 %v8174_v35, %v8539_v20 }
 0x9b5   : > { %3791 = vrot.lane.b32.xlu0 %v3780_v7, %s5603_s15  ;;  %v3879_v7 = vmul.f32 %v8184_v32, %v8537_v10 }
 0x9b8   : > { %4100 = vrot.lane.b32.xlu1 %v4086_v4, %s5601_s22  ;;  %v3878_v4 = vmul.f32 %v8184_v32, %v8539_v20 }
 0x9b9   : > { %4102 = vrot.lane.b32.xlu0 %v4087_v28, %s5601_s22  ;;  %v8553_v28 = vld [vmem:[#allocation2 + $0x10] sm:$0xff] }
 0x9bc   : > { %3381 = vrot.lane.b32.xlu1 %v3365_v39, %s5602_s14  ;;  %v8555_v39 = vld [vmem:[#allocation2 + $0x18] sm:$0xff] }
 0x9bd   : > { %3383 = vrot.lane.b32.xlu0 %v3366_v25, %s5602_s14  ;;  %v3476_v35 = vmul.f32 %v8191_v1, %v8555_v39  ;;  %v3475_v25 = vmul.f32 %v8191_v1, %v8553_v28  ;;  %v3676_v32 = vmul.f32 %v8201_v52, %v8555_v39  ;;  %v3925_v1 = vmul.f32 %v8209_v17, %v8539_v20 }
 0x9c0   : > { %4147 = vrot.lane.b32.xlu1 %v4133_v14, %s5602_s14  ;;  %v3675_v14 = vmul.f32 %v8201_v52, %v8553_v28  ;;  %v3523_v52 = vmul.f32 %v8211_v15, %v8555_v39 }
 0x9c1   : > { %4149 = vrot.lane.b32.xlu0 %v4134_v50, %s5602_s14  ;;  %v3926_v50 = vmul.f32 %v8209_v17, %v8537_v10  ;;  %v3710_v17 = vmul.f32 %v8219_v40, %v8555_v39 }
 0x9c4   : > { %3428 = vrot.lane.b32.xlu1 %v3412_v55, %s5603_s15  ;;  %v3522_v55 = vmul.f32 %v8211_v15, %v8553_v28  ;;  %v3269_v15 = vmul.f32 %v8226_v22, %v8553_v28 }
 0x9c5   : > { %3430 = vrot.lane.b32.xlu0 %v3413_v61, %s5603_s15  ;;  %v3709_v61 = vmul.f32 %v8219_v40, %v8553_v28  ;;  %v3972_v40 = vmul.f32 %v8235_v31, %v8539_v20 }
 0x9c8   : > { %4194 = vrot.lane.b32.xlu1 %v4180_v3, %s5603_s15  ;;  %v3270_v3 = vmul.f32 %v8226_v22, %v8555_v39  ;;  %v3819_v22 = vmul.f32 %v8323_v16, %v8407_v5 }
 0x9c9   : > { %4196 = vrot.lane.b32.xlu0 %v4181_v41, %s5603_s15  ;;  %v3973_v41 = vmul.f32 %v8235_v31, %v8537_v10 }
 0x9cc   : > { %3843 = vrot.lane.b32.xlu1 %v3831_v30, %s5600_s26 }
 0x9cd   : > { %3845 = vrot.lane.b32.xlu0 %v3832_v47, %s5600_s26  ;;  %v3820_v47 = vmul.f32 %v8323_v16, %v8409_v56 }
 0x9d0   : > { %3890 = vrot.lane.b32.xlu1 %v3878_v4, %s5601_s22  ;;  %v3569_v4 = vmul.f32 %v8253_v53, %v8553_v28 }
 0x9d1   : > { %3892 = vrot.lane.b32.xlu0 %v3879_v7, %s5601_s22 }
 0x9d4   : > { %3489 = vrot.lane.b32.xlu1 %v3475_v25, %s5600_s26 }
 0x9d5   : > { %3491 = vrot.lane.b32.xlu0 %v3476_v35, %s5600_s26  ;;  %v3570_v35 = vmul.f32 %v8253_v53, %v8555_v39  ;;  %v8617_v53 = vld [vmem:[#allocation2 + $0x10] sm:$0xfc] }
 0x9d8   : > { %3683 = vrot.lane.b32.xlu1 %v3675_v14, %s5600_s26 }
 0x9d9   : > { %3685 = vrot.lane.b32.xlu0 %v3676_v32, %s5600_s26 }
 0x9dc   : > { %3937 = vrot.lane.b32.xlu1 %v3925_v1, %s5602_s14  ;;  %v3743_v1 = vmul.f32 %v8245_v6, %v8553_v28 }
 0x9dd   : > { %3939 = vrot.lane.b32.xlu0 %v3926_v50, %s5602_s14 }
 0x9e0   : > { %3538 = vrot.lane.b32.xlu1 %v3523_v52, %s5601_s22 }
 0x9e1   : > { %3536 = vrot.lane.b32.xlu0 %v3522_v55, %s5601_s22  ;;  %v3744_v55 = vmul.f32 %v8245_v6, %v8555_v39 }
 0x9e4   : > { %3719 = vrot.lane.b32.xlu1 %v3710_v17, %s5601_s22  ;;  %v8619_v17 = vld [vmem:[#allocation2 + $0x18] sm:$0xfc] }
 0x9e5   : > { %3717 = vrot.lane.b32.xlu0 %v3709_v61, %s5601_s22 }
 0x9e8   : > { %3285 = vrot.lane.b32.xlu1 %v3270_v3, %s5600_s26 }
 0x9e9   : > { %3283 = vrot.lane.b32.xlu0 %v3269_v15, %s5600_s26  ;;  %v3464_v15 = vmul.f32 %v8329_v27, %v8423_v63  ;;  %v3666_v63 = vmul.f32 %v8409_v56, %v8331_v34 }
 0x9ec   : > { %3986 = vrot.lane.b32.xlu1 %v3973_v41, %s5603_s15 }
 0x9ed   : > { %3984 = vrot.lane.b32.xlu0 %v3972_v40, %s5603_s15  ;;  %v3463_v40 = vmul.f32 %v8329_v27, %v8421_v57  ;;  %v3665_v57 = vmul.f32 %v8407_v5, %v8331_v34 }
 0x9ee   : > { %v3848_v30 = vpop.permute.xlu1 %3847 }
 0x9ef   : > { %v3850_v7 = vpop.permute.xlu0 %3849 }
 0x9f0   : > { %v3856_v31 = vsel %vm765_vm2, %v3848_v30, %v3850_v7  ;;  %v3867_v25 = vadd.f32 %v3850_v7, %v3820_v47  ;;  %3583 = vrot.lane.b32.xlu1 %v3569_v4, %s5602_s14  ;;  %v4037_v47 = vmul.f32 %v8261_v59, %v8617_v53  ;;  %v4038_v30 = vmul.f32 %v8261_v59, %v8619_v17 }
 0x9f1   : > { %v3866_v32 = vadd.f32 %v3856_v31, %v3819_v22  ;;  %3585 = vrot.lane.b32.xlu0 %v3570_v35, %s5602_s14  ;;  %v3317_v59 = vmul.f32 %v8259_v26, %v8555_v39 }
 0x9f2   : > { %v3895_v14 = vpop.permute.xlu1 %3894 }
 0x9f3   : > { %v3897_v50 = vpop.permute.xlu0 %3896 }
 0x9f4   : > { %v3903_v52 = vsel %vm813_vm3, %v3895_v14, %v3897_v50  ;;  %v3914_v61 = vadd.f32 %v3897_v50, %v3867_v25  ;;  %3751 = vrot.lane.b32.xlu1 %v3743_v1, %s5602_s14  ;;  %v3316_v25 = vmul.f32 %v8259_v26, %v8553_v28 }
 0x9f5   : > { %v3913_v3 = vadd.f32 %v3903_v52, %v3866_v32  ;;  %3753 = vrot.lane.b32.xlu0 %v3744_v55, %s5602_s14  ;;  %v3616_v52 = vmul.f32 %v8281_v33, %v8553_v28 }
 0x9f6   : > { %v3494_v41 = vpop.permute.xlu1 %3493 }
 0x9f7   : > { %v3496_v6 = vpop.permute.xlu0 %3495 }
 0x9f8   : > { %v3499_v22 = vsel %vm765_vm2, %v3494_v41, %v3496_v6  ;;  %v3511_v7 = vadd.f32 %v3496_v6, %v3464_v15  ;;  %4049 = vrot.lane.b32.xlu1 %v4037_v47, %s5600_s26  ;;  %v3617_v15 = vmul.f32 %v8281_v33, %v8555_v39 }
 0x9f9   : > { %v3510_v4 = vadd.f32 %v3499_v22, %v3463_v40  ;;  %4051 = vrot.lane.b32.xlu0 %v4038_v30, %s5600_s26  ;;  %v3777_v30 = vmul.f32 %v8273_v54, %v8553_v28  ;;  %v3778_v22 = vmul.f32 %v8273_v54, %v8555_v39  ;;  %s491_s26 = scalar_lea.vmem [#allocation15], %s9417_s30 }
 0x9fa   : > { %v3688_v35 = vpop.permute.xlu1 %3687 }
 0x9fb   : > { %v3690_v31 = vpop.permute.xlu0 %3689 }
 0x9fc   : > { %v3692_v32 = vsel %vm765_vm2, %v3688_v35, %v3690_v31  ;;  %v3700_v14 = vadd.f32 %v3690_v31, %v3666_v63  ;;  %3330 = vrot.lane.b32.xlu1 %v3316_v25, %s5601_s22  ;;  %v4085_v31 = vmul.f32 %v8295_v2, %v8619_v17 }
 0x9fd   : > { %v3699_v50 = vadd.f32 %v3692_v32, %v3665_v57  ;;  %3332 = vrot.lane.b32.xlu0 %v3317_v59, %s5601_s22  ;;  %v4084_v57 = vmul.f32 %v8295_v2, %v8617_v53  ;;  %v3363_v32 = vmul.f32 %v8287_v58, %v8553_v28 }
 0x9fe   : > { %v3942_v1 = vpop.permute.xlu1 %3941 }
 0x9ff   : > { %v3944_v55 = vpop.permute.xlu0 %3943 }
 0xa00   : > { %v3950_v41 = vsel %vm861_vm4, %v3942_v1, %v3944_v55  ;;  %v3961_v40 = vadd.f32 %v3944_v55, %v3914_v61  ;;  %3630 = vrot.lane.b32.xlu1 %v3616_v52, %s5603_s15  ;;  %v3364_v1 = vmul.f32 %v8287_v58, %v8555_v39  ;;  %v4131_v58 = vmul.f32 %v8311_v8, %v8617_v53 }
 0xa01   : > { %v3960_v26 = vadd.f32 %v3950_v41, %v3913_v3  ;;  %3632 = vrot.lane.b32.xlu0 %v3617_v15, %s5603_s15  ;;  %v3257_v15 = vmul.f32 %v8345_v9, %v8461_v46 }
 0xa02   : > { %v3543_v6 = vpop.permute.xlu1 %3542 }
 0xa03   : > { %v3541_v47 = vpop.permute.xlu0 %3540  ;;  %v3558_v63 = vadd.f32 %v3543_v6, %v3511_v7 }
 0xa04   : > { %v3546_v35 = vsel %vm813_vm3, %v3541_v47, %v3543_v6  ;;  %3785 = vrot.lane.b32.xlu1 %v3777_v30, %s5603_s15 }
 0xa05   : > { %v3557_v33 = vadd.f32 %v3546_v35, %v3510_v4  ;;  %3787 = vrot.lane.b32.xlu0 %v3778_v22, %s5603_s15  ;;  %v3410_v22 = vmul.f32 %v8303_v38, %v8553_v28  ;;  %v3411_v35 = vmul.f32 %v8303_v38, %v8555_v39  ;;  %v4178_v38 = vmul.f32 %v8321_v49, %v8617_v53 }
 0xa06   : > { %v3724_v61 = vpop.permute.xlu1 %3723 }
 0xa07   : > { %v3722_v3 = vpop.permute.xlu0 %3721  ;;  %v3734_v25 = vadd.f32 %v3724_v61, %v3700_v14 }
 0xa08   : > { %v3726_v59 = vsel %vm813_vm3, %v3722_v3, %v3724_v61  ;;  %4096 = vrot.lane.b32.xlu1 %v4084_v57, %s5601_s22  ;;  %v3857_v57 = vsel %vm765_vm2, %v8325_v11, %v8327_v29  ;;  %v3904_v11 = vsel %vm813_vm3, %v8333_v36, %v8335_v42  ;;  %v4183_v36 = vmul.f32 %v8321_v49, %v8269_v48 }
 0xa09   : > { %v3733_v54 = vadd.f32 %v3726_v59, %v3699_v50  ;;  %4098 = vrot.lane.b32.xlu0 %v4085_v31, %s5601_s22  ;;  %v3258_v50 = vmul.f32 %v8345_v9, %v8463_v24  ;;  %v3822_v24 = vmul.f32 %v8323_v16, %v8170_v23  ;;  %s4462_s22 = sshll.u32 %s491_s26, 4  ;;  %s8899_s22 = int_to_ptr.vmem [resolvable:$true] %s4462_s22 }
 0xa0a   : > { %v3991_v7 = vpop.permute.xlu1 %3990  ;;  %p5510_p13 = scmp.lt.s32.totalorder %s8899_s22, %s5508_s24 }
 0xa0b   : > { %v3989_v4 = vpop.permute.xlu0 %3988  ;;  %v8670_v55 = vadd.f32 %v3991_v7, %v3961_v40  ;;  %v4132_v40 = vmul.f32 %v8311_v8, %v8619_v17  ;;  %v3821_v8 = vmul.f32 %v8323_v16, %v8172_v21  ;;  %v3869_v23 = vadd.f32 %v8327_v29, %v3822_v24 }
 0xa0c   : > { %v3997_v2 = vsel %vm909_vm5, %v3989_v4, %v3991_v7  ;;  %3377 = vrot.lane.b32.xlu1 %v3363_v32, %s5602_s14  ;;  %v4179_v21 = vmul.f32 %v8321_v49, %v8619_v17  ;;  %v4026_v29 = vmul.f32 %v8355_v37, %v8409_v56  ;;  %v3951_v56 = vsel %vm861_vm4, %v8341_v12, %v8343_v0 }
 0xa0d   : > { %v8673_v14 = vadd.f32 %v3997_v2, %v3960_v26  ;;  %3379 = vrot.lane.b32.xlu0 %v3364_v1, %s5602_s14  ;;  %v3916_v1 = vadd.f32 %v8335_v42, %v3869_v23 }
 0xa0e   : > { %v3288_v52 = vpop.permute.xlu1 %3287 }
 0xa0f   : > { %v3290_v41 = vpop.permute.xlu0 %3289  ;;  %v3963_v48 = vadd.f32 %v8343_v0, %v3916_v1 }
 0xa10   : > { %v3293_v26 = vsel %vm765_vm2, %v3288_v52, %v3290_v41  ;;  %v3305_v6 = vadd.f32 %v3290_v41, %v3258_v50  ;;  %4143 = vrot.lane.b32.xlu1 %v4131_v58, %s5602_s14  ;;  %v4025_v50 = vmul.f32 %v8355_v37, %v8407_v5  ;;  %v4319_v5 = vld [vmem:[#allocation14] sm:$0xff]  ;;  %v4320_v58 = vld [vmem:[#allocation14 + $0x8] sm:$0xff] }
 0xa11   : > { %v3304_v47 = vadd.f32 %v3293_v26, %v3257_v15  ;;  %4145 = vrot.lane.b32.xlu0 %v4132_v40, %s5602_s14  ;;  %v4321_v40 = vld [vmem:[#allocation14 + $0x10] sm:$0xff]  ;;  %v4322_v26 = vld [vmem:[#allocation14 + $0x18] sm:$0xff]  ;;  %v4010_v0 = vadd.f32 %v8353_v60, %v3963_v48 }
 0xa12   : > { %v3588_v30 = vpop.permute.xlu1 %3587 }
 0xa13   : > { %v3590_v46 = vpop.permute.xlu0 %3589  ;;  %v4259_v1 = vrot.slane %v4010_v0, 1 }
 0xa14   : > { %v3593_v61 = vsel %vm861_vm4, %v3588_v30, %v3590_v46  ;;  %v3605_v3 = vadd.f32 %v3590_v46, %v3558_v63  ;;  %3424 = vrot.lane.b32.xlu1 %v3410_v22, %s5603_s15  ;;  %v3868_v63 = vadd.f32 %v3857_v57, %v3821_v8  ;;  %v5106_v30 = vpack.c.bf16 %v4322_v26, %v4321_v40  ;;  %v4323_v46 = vld [vmem:[#allocation14 + $0x20] sm:$0xff]  ;;  %v4324_v22 = vld [vmem:[#allocation14 + $0x28] sm:$0xff]  ;;  %v4329_v26 = vld [vmem:[#allocation14 + $0x50] sm:$0xff] }
 0xa15   : > { %v3604_v31 = vadd.f32 %v3593_v61, %v3557_v33  ;;  %3426 = vrot.lane.b32.xlu0 %v3411_v35, %s5603_s15  ;;  %v3998_v61 = vsel %vm909_vm5, %v8351_v44, %v8353_v60  ;;  %v5110_v23 = vpack.c.bf16 %v4324_v22, %v4323_v46  ;;  %v4252_v44 = vrot.slane %v8673_v14, 1  ;;  %v4331_v22 = vld [vmem:[#allocation14 + $0x60] sm:$0xff]  ;;  %v9414_v14 = vld [vmem:[#allocation74_spill] sm:$0xff] }
 0xa16   : > { %v3756_v59 = vpop.permute.xlu1 %3755 }
 0xa17   : > { %v3758_v7 = vpop.permute.xlu0 %3757 }
 0xa18   : > { %v3760_v4 = vsel %vm861_vm4, %v3756_v59, %v3758_v7  ;;  %v3768_v32 = vadd.f32 %v3758_v7, %v3734_v25  ;;  %4190 = vrot.lane.b32.xlu1 %v4178_v38, %s5603_s15  ;;  %v4182_v25 = vmul.f32 %v8321_v49, %v8271_v51  ;;  %v5102_v51 = vpack.c.bf16 %v4320_v58, %v4319_v5  ;;  %v4325_v38 = vld [vmem:[#allocation14 + $0x30] sm:$0xff] }
 0xa19   : > { %v3767_v33 = vadd.f32 %v3760_v4, %v3733_v54  ;;  %4192 = vrot.lane.b32.xlu0 %v4179_v21, %s5603_s15  ;;  %v3915_v54 = vadd.f32 %v3904_v11, %v3868_v63  ;;  %v4326_v21 = vld [vmem:[#allocation14 + $0x38] sm:$0xff] }
 0xa1a   : > { %v4054_v2 = vpop.permute.xlu1 %4053  ;;  %5103 = vmatprep.subr.bf16.mxu1 %v5102_v51 }
 0xa1b   : > { %v4056_v52 = vpop.permute.xlu0 %4055  ;;  %v3962_v35 = vadd.f32 %v3951_v56, %v3915_v54  ;;  %5105 = vmatpush3.bf16.msra.mxu1 %v5102_v51 }
 0xa1c   : > { %v4062_v15 = vsel %vm765_vm2, %v4054_v2, %v4056_v52  ;;  %v4073_v41 = vadd.f32 %v4056_v52, %v4026_v29  ;;  %4198 = vrot.lane.b32.xlu1 %v4182_v25, %s5603_s15  ;;  %5107 = vmatprep.subr.bf16.mxu1 %v5106_v30  ;;  %v4328_v52 = vld [vmem:[#allocation14 + $0x48] sm:$0xff] }
 0xa1d   : > { %v4072_v42 = vadd.f32 %v4062_v15, %v4025_v50  ;;  %4200 = vrot.lane.b32.xlu0 %v4183_v36, %s5603_s15  ;;  %v4009_v63 = vadd.f32 %v3998_v61, %v3962_v35  ;;  %v4327_v50 = vld [vmem:[#allocation14 + $0x40] sm:$0xff]  ;;  %v4332_v35 = vld [vmem:[#allocation14 + $0x68] sm:$0xff] }
 0xa1e   : > { %v3335_v49 = vpop.permute.xlu1 %3334  ;;  %v5118_v5 = vpack.c.bf16 %v4328_v52, %v4327_v50  ;;  %v5126_v0 = vpack.c.bf16 %v4332_v35, %v4331_v22 }
 0xa1f   : > { %v3337_v24 = vpop.permute.xlu0 %3336  ;;  %5109 = vmatpush3.bf16.msra.mxu1 %v5106_v30  ;;  %v4257_v25 = vrot.slane %v4009_v63, 1 }
 0xa20   : > { %v3340_v12 = vsel %vm813_vm3, %v3335_v49, %v3337_v24  ;;  %v3352_v8 = vadd.f32 %v3337_v24, %v3305_v6  ;;  %v4255_v6 = vrot.slane %v8670_v55, 1  ;;  %5111 = vmatprep.subr.bf16.mxu1 %v5110_v23 }
 0xa21   : > { %v3351_v57 = vadd.f32 %v3340_v12, %v3304_v47  ;;  %v5114_v47 = vpack.c.bf16 %v4326_v21, %v4325_v38  ;;  %v4258_v15 = vsel %vm1701_vm6, %v4252_v44, %v4257_v25 }
 0xa22   : > { %v3635_v59 = vpop.permute.xlu1 %3634 }
 0xa23   : > { %v3637_v7 = vpop.permute.xlu0 %3636  ;;  %5113 = vmatpush3.bf16.msra.mxu1 %v5110_v23 }
 0xa24   : > { %v3640_v4 = vsel %vm909_vm5, %v3635_v59, %v3637_v7  ;;  %v8735_v11 = vadd.f32 %v3637_v7, %v3605_v3  ;;  %v4260_v3 = vsel %vm1701_vm6, %v4255_v6, %v4259_v1  ;;  %5115 = vmatprep.subr.bf16.mxu1 %v5114_v47 }
 0xa25   : > { %v8738_v29 = vadd.f32 %v3640_v4, %v3604_v31 }
 0xa26   : > { %v3790_v60 = vpop.permute.xlu1 %3789  ;;  %v4231_v4 = vrot.slane %v8735_v11, 1 }
 0xa27   : > { %v3792_v2 = vpop.permute.xlu0 %3791  ;;  %5117 = vmatpush3.bf16.msra.mxu1 %v5114_v47 }
 0xa28   : > { %v3794_v36 = vsel %vm909_vm5, %v3790_v60, %v3792_v2  ;;  %v3802_v54 = vadd.f32 %v3792_v2, %v3768_v32  ;;  %v4330_v32 = vld [vmem:[#allocation14 + $0x58] sm:$0xff]  ;;  %5119 = vmatprep.subr.bf16.mxu1 %v5118_v5 }
 0xa29   : > { %v3801_v31 = vadd.f32 %v3794_v36, %v3767_v33  ;;  %v5122_v33 = vpack.c.bf16 %v4330_v32, %v4329_v26 }
 0xa2a   : > { %v8748_v56 = vadd.f32 %v4260_v3, %v3802_v54  ;;  %v4101_v40 = vpop.permute.xlu1 %4100 }
 0xa2b   : > { %v8750_v58 = vadd.f32 %v4258_v15, %v3801_v31  ;;  %v4103_v51 = vpop.permute.xlu0 %4102  ;;  %5121 = vmatpush3.bf16.msra.mxu1 %v5118_v5 }
 0xa2c   : > { %v4109_v48 = vsel %vm813_vm3, %v4101_v40, %v4103_v51  ;;  %v4120_v49 = vadd.f32 %v4103_v51, %v4073_v41  ;;  %5123 = vmatprep.subr.bf16.mxu1 %v5122_v33  ;;  %v4277_v60 = vrot.slane %v8748_v56, 2  ;;  %v3818_v40 = vmul.f32 %v8323_v16, %v8537_v10 }
 0xa2d   : > { %v4119_v24 = vadd.f32 %v4109_v48, %v4072_v42  ;;  %v4275_v50 = vrot.slane %v8750_v58, 2  ;;  %v3817_v10 = vmul.f32 %v8323_v16, %v8539_v20  ;;  %v5301_v16 = vld [vmem:[#allocation2 + $0x8] sm:$0x80]  ;;  %v3255_v56 = vmul.f32 %v8345_v9, %v8553_v28 }
 0xa2e   : > { %v3382_v30 = vpop.permute.xlu1 %3381  ;;  %v3460_v20 = vmul.f32 %v5301_v16, %v8329_v27 }
 0xa2f   : > { %v3384_v46 = vpop.permute.xlu0 %3383  ;;  %5125 = vmatpush3.bf16.msra.mxu1 %v5122_v33 }
 0xa30   : > { %v3387_v12 = vsel %vm861_vm4, %v3382_v30, %v3384_v46  ;;  %v3399_v61 = vadd.f32 %v3384_v46, %v3352_v8  ;;  %5127 = vmatprep.subr.bf16.mxu1 %v5126_v0  ;;  %v4229_v8 = vrot.slane %v8738_v29, 1 }
 0xa31   : > { %v3398_v23 = vadd.f32 %v3387_v12, %v3351_v57 }
 0xa32   : > { %v4148_v59 = vpop.permute.xlu1 %4147 }
 0xa33   : > { %v4150_v7 = vpop.permute.xlu0 %4149  ;;  %5129 = vmatpush3.bf16.msra.mxu1 %v5126_v0 }
 0xa34   : > { %v4156_v38 = vsel %vm861_vm4, %v4148_v59, %v4150_v7  ;;  %v4167_v41 = vadd.f32 %v4150_v7, %v4120_v49 }
 0xa35   : > { %v4166_v42 = vadd.f32 %v4156_v38, %v4119_v24 }
 0xa36   : > { %v3429_v21 = vpop.permute.xlu1 %3428 }
 0xa37   : > { %v3431_v63 = vpop.permute.xlu0 %3430 }
 0xa38   : > { %v3434_v47 = vsel %vm909_vm5, %v3429_v21, %v3431_v63  ;;  %v3446_v1 = vadd.f32 %v3431_v63, %v3399_v61 }
 0xa39   : > { %v3445_v57 = vadd.f32 %v3434_v47, %v3398_v23 }
 0xa3a   : > { %v4244_v2 = vadd.f32 %v4231_v4, %v3446_v1  ;;  %v4195_v25 = vpop.permute.xlu1 %4194 }
 0xa3b   : > { %v4243_v52 = vadd.f32 %v4229_v8, %v3445_v57  ;;  %v4197_v36 = vpop.permute.xlu0 %4196 }
 0xa3c   : > { %v8766_v54 = vadd.f32 %v4277_v60, %v4244_v2  ;;  %v4203_v3 = vsel %vm909_vm5, %v4195_v25, %v4197_v36  ;;  %v8769_v31 = vadd.f32 %v4197_v36, %v4167_v41 }
 0xa3d   : > { %v8773_v15 = vadd.f32 %v4275_v50, %v4243_v52  ;;  %v8775_v5 = vadd.f32 %v4203_v3, %v4166_v42 }
 0xa3e   : > { %v3844_v51 = vpop.permute.xlu1 %3843 }
 0xa3f   : > { %v3846_v26 = vpop.permute.xlu0 %3845 }
 0xa40   : > { %v3865_v32 = vadd.f32 %v3846_v26, %v3818_v40  ;;  %v3855_v59 = vsel %vm765_vm2, %v3844_v51, %v3846_v26  ;;  %v5302_v51 = vld [vmem:[#allocation2] sm:$0x80] }
 0xa41   : > { %v3864_v38 = vadd.f32 %v3855_v59, %v3817_v10  ;;  %v3459_v26 = vmul.f32 %v5302_v51, %v8329_v27  ;;  %v9410_v59 = vld [vmem:[#allocation89_spill] sm:$0xff] }
 0xa42   : > { %v3891_v48 = vpop.permute.xlu1 %3890 }
 0xa43   : > { %v3893_v49 = vpop.permute.xlu0 %3892 }
 0xa44   : > { %v3902_v7 = vsel %vm813_vm3, %v3891_v48, %v3893_v49  ;;  %v3912_v21 = vadd.f32 %v3893_v49, %v3865_v32 }
 0xa45   : > { %v3911_v47 = vadd.f32 %v3902_v7, %v3864_v38 }
 0xa46   : > { %v3490_v24 = vpop.permute.xlu1 %3489 }
 0xa47   : > { %v3492_v33 = vpop.permute.xlu0 %3491 }
 0xa48   : > { %v3498_v16 = vsel %vm765_vm2, %v3490_v24, %v3492_v33 }
 0xa4a   : > { %v3684_v30 = vpop.permute.xlu1 %3683 }
 0xa4b   : > { %v3686_v46 = vpop.permute.xlu0 %3685 }
 0xa4e   : > { %v3938_v22 = vpop.permute.xlu1 %3937 }
 0xa4f   : > { %v3940_v35 = vpop.permute.xlu0 %3939 }
 0xa50   : > { %v3949_v63 = vsel %vm861_vm4, %v3938_v22, %v3940_v35  ;;  %v3959_v1 = vadd.f32 %v3940_v35, %v3912_v21  ;;  %v9409_v22 = vld [vmem:[#allocation71_spill] sm:$0xff] }
 0xa51   : > { %v3958_v57 = vadd.f32 %v3949_v63, %v3911_v47  ;;  %v3497_v35 = vsel %vm765_vm2, %v9410_v59, %v9409_v22  ;;  %v3507_v38 = vadd.f32 %v9409_v22, %v3460_v20  ;;  %v3461_v20 = vmul.f32 %v8329_v27, %v8553_v28 }
 0xa52   : > { %v3539_v12 = vpop.permute.xlu1 %3538  ;;  %v3506_v21 = vadd.f32 %v3497_v35, %v3459_v26 }
 0xa53   : > { %v3537_v61 = vpop.permute.xlu0 %3536  ;;  %v3508_v22 = vadd.f32 %v3498_v16, %v3461_v20 }
 0xa54   : > { %v3545_v26 = vsel %vm813_vm3, %v3537_v61, %v3539_v12 }
 0xa56   : > { %v8779_v23 = vpop.permute.xlu1 %3719 }
 0xa57   : > { %v3718_v0 = vpop.permute.xlu0 %3717 }
 0xa58   : > { %v3725_v61 = vsel %vm813_vm3, %v3718_v0, %v8779_v23 }
 0xa5a   : > { %v8785_v41 = vpop.permute.xlu1 %3285 }
 0xa5b   : > { %v8787_v42 = vpop.permute.xlu0 %3283 }
 0xa5e   : > { %v3987_v2 = vpop.permute.xlu1 %3986 }
 0xa5f   : > { %v3985_v52 = vpop.permute.xlu0 %3984  ;;  %v4006_v25 = vadd.f32 %v3987_v2, %v3959_v1  ;;  %v9411_v1 = vld [vmem:[#allocation92_spill] sm:$0xff] }
 0xa60   : > { %v3996_v36 = vsel %vm909_vm5, %v3985_v52, %v3987_v2  ;;  %v3554_v52 = vadd.f32 %v9411_v1, %v3507_v38  ;;  %v3664_v38 = vmul.f32 %v8331_v34, %v8555_v39 }
 0xa61   : > { %v4005_v3 = vadd.f32 %v3996_v36, %v3958_v57  ;;  %v4254_v40 = vrot.slane %v4006_v25, 1  ;;  %v9412_v57 = vld [vmem:[#allocation72_spill] sm:$0xff] }
 0xa62   : > { %v3584_v32 = vpop.permute.xlu1 %3583  ;;  %v3544_v2 = vsel %vm813_vm3, %v9412_v57, %v9411_v1  ;;  %v3555_v57 = vadd.f32 %v3545_v26, %v3508_v22 }
 0xa63   : > { %v4251_v48 = vrot.slane %v4005_v3, 1  ;;  %v3586_v49 = vpop.permute.xlu0 %3585  ;;  %v4256_v10 = vsel %vm1701_vm6, %v4254_v40, %v4255_v6  ;;  %v3553_v25 = vadd.f32 %v3544_v2, %v3506_v21  ;;  %v9413_v6 = vld [vmem:[#allocation91_spill] sm:$0xff]  ;;  %v3462_v3 = vmul.f32 %v8329_v27, %v8555_v39  ;;  %v9415_v2 = vld [vmem:[#allocation73_spill] sm:$0xff] }
 0xa64   : > { %v3601_v40 = vadd.f32 %v9413_v6, %v3554_v52  ;;  %v3691_v21 = vsel %vm765_vm2, %v3684_v30, %v3686_v46  ;;  %v3592_v24 = vsel %vm861_vm4, %v3584_v32, %v3586_v49  ;;  %v3663_v27 = vmul.f32 %v8331_v34, %v8553_v28 }
 0xa65   : > { %v4253_v7 = vsel %vm1701_vm6, %v4251_v48, %v4252_v44  ;;  %v3591_v44 = vsel %vm861_vm4, %v9414_v14, %v9413_v6  ;;  %v3509_v51 = vadd.f32 %v3492_v33, %v3462_v3  ;;  %v3698_v52 = vadd.f32 %v3686_v46, %v3664_v38  ;;  %v9416_v6 = vld [vmem:[#allocation77_spill] sm:$0xff] }
 0xa66   : > { %v3752_v63 = vpop.permute.xlu1 %3751  ;;  %v3600_v48 = vadd.f32 %v3591_v44, %v3553_v25  ;;  %v3648_v33 = vadd.f32 %v9415_v2, %v3601_v40  ;;  %v3697_v44 = vadd.f32 %v3691_v21, %v3663_v27  ;;  %v3602_v3 = vadd.f32 %v3592_v24, %v3555_v57 }
 0xa67   : > { %v3754_v47 = vpop.permute.xlu0 %3753  ;;  %v3556_v1 = vadd.f32 %v3539_v12, %v3509_v51  ;;  %v3732_v12 = vadd.f32 %v8779_v23, %v3698_v52 }
 0xa68   : > { %v3647_v14 = vadd.f32 %v9416_v6, %v3600_v48  ;;  %v3759_v32 = vsel %vm861_vm4, %v3752_v63, %v3754_v47  ;;  %v3731_v51 = vadd.f32 %v3725_v61, %v3697_v44  ;;  %v4226_v46 = vrot.slane %v3648_v33, 1 }
 0xa69   : > { %v3603_v25 = vadd.f32 %v3586_v49, %v3556_v1  ;;  %v3766_v26 = vadd.f32 %v3754_v47, %v3732_v12 }
 0xa6a   : > { %v8807_v36 = vpop.permute.xlu1 %4049  ;;  %v4223_v0 = vrot.slane %v3647_v14, 1  ;;  %v3765_v49 = vadd.f32 %v3759_v32, %v3731_v51 }
 0xa6b   : > { %v8809_v55 = vpop.permute.xlu0 %4051 }
 0xa6e   : > { %v3331_v59 = vpop.permute.xlu1 %3330 }
 0xa6f   : > { %v3333_v35 = vpop.permute.xlu0 %3332 }
 0xa72   : > { %v3631_v16 = vpop.permute.xlu1 %3630 }
 0xa73   : > { %v3633_v30 = vpop.permute.xlu0 %3632 }
 0xa74   : > { %v3639_v34 = vsel %vm909_vm5, %v3631_v16, %v3633_v30  ;;  %v3650_v20 = vadd.f32 %v3633_v30, %v3603_v25 }
 0xa75   : > { %v3649_v40 = vadd.f32 %v3639_v34, %v3602_v3 }
 0xa76   : > { %v4227_v22 = vrot.slane %v3650_v20, 1  ;;  %v3786_v48 = vpop.permute.xlu1 %3785 }
 0xa77   : > { %v4224_v38 = vrot.slane %v3649_v40, 1  ;;  %v3788_v21 = vpop.permute.xlu0 %3787 }
 0xa78   : > { %v4228_v1 = vsel %vm1701_vm6, %v4226_v46, %v4227_v22  ;;  %v3793_v24 = vsel %vm909_vm5, %v3786_v48, %v3788_v21  ;;  %v3800_v23 = vadd.f32 %v3788_v21, %v3766_v26  ;;  %v4232_v63 = vsel %vm1701_vm6, %v4227_v22, %v4231_v4 }
 0xa79   : > { %v4225_v27 = vsel %vm1701_vm6, %v4223_v0, %v4224_v38  ;;  %v4240_v57 = vadd.f32 %v4228_v1, %v8385_v62  ;;  %v3799_v47 = vadd.f32 %v3793_v24, %v3765_v49  ;;  %v4230_v2 = vsel %vm1701_vm6, %v4224_v38, %v4229_v8 }
 0xa7a   : > { %v4239_v33 = vadd.f32 %v4225_v27, %v8387_v19  ;;  %v4266_v52 = vadd.f32 %v4256_v10, %v3800_v23  ;;  %v4097_v25 = vpop.permute.xlu1 %4096  ;;  %v3256_v19 = vmul.f32 %v8345_v9, %v8555_v39  ;;  %v3292_v10 = vsel %vm765_vm2, %v8787_v42, %v8785_v41  ;;  %v4333_v23 = vld [vmem:[#allocation14 + $0x70] sm:$0xff]  ;;  %v4334_v27 = vld [vmem:[#allocation14 + $0x78] sm:$0xff] }
 0xa7b   : > { %v4265_v61 = vadd.f32 %v4253_v7, %v3799_v47  ;;  %v4099_v6 = vpop.permute.xlu0 %4098  ;;  %v3339_v7 = vsel %vm813_vm3, %v3331_v59, %v3333_v35  ;;  %v3302_v16 = vadd.f32 %v3292_v10, %v3255_v56  ;;  %v4061_v39 = vsel %vm765_vm2, %v8807_v36, %v8809_v55 }
 0xa7c   : > { %v4274_v14 = vrot.slane %v4266_v52, 2  ;;  %v4023_v9 = vmul.f32 %v8355_v37, %v8617_v53  ;;  %v4108_v59 = vsel %vm813_vm3, %v4097_v25, %v4099_v6  ;;  %v4157_v48 = vsel %vm861_vm4, %v8399_v45, %v8401_v43 }
 0xa7d   : > { %v4273_v44 = vrot.slane %v4265_v61, 2  ;;  %v3349_v28 = vadd.f32 %v3339_v7, %v3302_v16  ;;  %v4168_v61 = vadd.f32 %v4157_v48, %v8382_v18  ;;  %v4299_v25 = vrot.slane %v8775_v5, 4 }
 0xa7e   : > { %v4278_v11 = vsel %vm1752_vm8, %v4274_v14, %v4277_v60  ;;  %v4286_v4 = vadd.f32 %v4274_v14, %v4240_v57  ;;  %v3378_v3 = vpop.permute.xlu1 %3377  ;;  %v3303_v60 = vadd.f32 %v8785_v41, %v3256_v19  ;;  %v4070_v34 = vadd.f32 %v4061_v39, %v4023_v9 }
 0xa7f   : > { %v3380_v62 = vpop.permute.xlu0 %3379  ;;  %v4276_v29 = vsel %vm1752_vm8, %v4273_v44, %v4275_v50  ;;  %v4285_v8 = vadd.f32 %v4273_v44, %v4239_v33  ;;  %v4024_v50 = vmul.f32 %v8355_v37, %v8619_v17  ;;  %v5130_v33 = vpack.c.bf16 %v4334_v27, %v4333_v23 }
 0xa80   : > { %v3350_v12 = vadd.f32 %v3333_v35, %v3303_v60  ;;  %v3386_v42 = vsel %vm861_vm4, %v3378_v3, %v3380_v62  ;;  %v4117_v26 = vadd.f32 %v4108_v59, %v4070_v34 }
 0xa81   : > { %v4071_v41 = vadd.f32 %v8809_v55, %v4024_v50  ;;  %v3396_v20 = vadd.f32 %v3386_v42, %v3349_v28  ;;  %5131 = vmatprep.subr.bf16.mxu1 %v5130_v33 }
 0xa82   : > { %v4144_v30 = vpop.permute.xlu1 %4143  ;;  %v3397_v32 = vadd.f32 %v3380_v62, %v3350_v12  ;;  %5133 = vmatpush3.bf16.msra.mxu1 %v5130_v33 }
 0xa83   : > { %v4146_v58 = vpop.permute.xlu0 %4145  ;;  %v4118_v40 = vadd.f32 %v4099_v6, %v4071_v41 }
 0xa84   : > { %v4155_v46 = vsel %vm861_vm4, %v4144_v30, %v4146_v58 }
 0xa85   : > { %v4165_v0 = vadd.f32 %v4146_v58, %v4118_v40  ;;  %v4164_v53 = vadd.f32 %v4155_v46, %v4117_v26 }
 0xa86   : > { %v3425_v51 = vpop.permute.xlu1 %3424 }
 0xa87   : > { %v3427_v17 = vpop.permute.xlu0 %3426 }
 0xa88   : > { %v3433_v36 = vsel %vm909_vm5, %v3425_v51, %v3427_v17  ;;  %v3444_v35 = vadd.f32 %v3427_v17, %v3397_v32 }
 0xa89   : > { %v3443_v22 = vadd.f32 %v3433_v36, %v3396_v20 }
 0xa8a   : > { %v4242_v37 = vadd.f32 %v4232_v63, %v3444_v35  ;;  %v4191_v55 = vpop.permute.xlu1 %4190  ;;  %v4169_v63 = vadd.f32 %v8401_v43, %v8380_v13 }
 0xa8b   : > { %v4241_v49 = vadd.f32 %v4230_v2, %v3443_v22  ;;  %v4193_v38 = vpop.permute.xlu0 %4192  ;;  %v4301_v2 = vrot.slane %v8769_v31, 4  ;;  %v5303_v22 = vld [vmem:[%s5951_s5 + $0x8] sm:$0xff] }
 0xa8c   : > { %v4288_v21 = vadd.f32 %v4278_v11, %v4242_v37  ;;  %v4202_v1 = vsel %vm909_vm5, %v4191_v55, %v4193_v38  ;;  %v4212_v24 = vadd.f32 %v4193_v38, %v4165_v0 }
 0xa8d   : > { %v4287_v57 = vadd.f32 %v4276_v29, %v4241_v49  ;;  %v4211_v47 = vadd.f32 %v4202_v1, %v4164_v53  ;;  %v5304_v53 = vld [vmem:[%s5951_s5] sm:$0xff] }
 0xa8e   : > { %v4298_v52 = vrot.slane %v4212_v24, 4  ;;  %v4199_v6 = vpop.permute.xlu1 %4198 }
 0xa8f   : > { %v4297_v45 = vrot.slane %v4211_v47, 4  ;;  %v4201_v14 = vpop.permute.xlu0 %4200 }
 0xa90   : > { %v4302_v44 = vsel %vm1777_vm7, %v4298_v52, %v4301_v2  ;;  %v4314_v11 = vadd.f32 %v4298_v52, %v4286_v4  ;;  %v4204_v3 = vsel %vm909_vm5, %v4199_v6, %v4201_v14  ;;  %v4216_v62 = vadd.f32 %v4201_v14, %v4169_v63 }
 0xa91   : > { %v4300_v13 = vsel %vm1777_vm7, %v4297_v45, %v4299_v25  ;;  %v4313_v43 = vadd.f32 %v4297_v45, %v4285_v8  ;;  %v4316_v31 = vadd.f32 %v4302_v44, %v4288_v21  ;;  %v4215_v29 = vadd.f32 %v4204_v3, %v4168_v61 }
 0xa92   : > { %v4315_v19 = vadd.f32 %v4300_v13, %v4287_v57  ;;  %v4344_v18 = vrot.slane %v4314_v11, 6  ;;  %v4305_v10 = vrot.slane %v4216_v62, 4 }
 0xa93   : > { %v4341_v5 = vrot.slane %v4313_v43, 6  ;;  %v4345_v56 = vrot.slane %v4316_v31, 6  ;;  %v4303_v60 = vrot.slane %v4215_v29, 4 }
 0xa94   : > { %v4342_v7 = vrot.slane %v4315_v19, 6  ;;  %v4306_v16 = vsel %vm1777_vm7, %v4301_v2, %v4305_v10 }
 0xa95   : > { %v4304_v4 = vsel %vm1777_vm7, %v4299_v25, %v4303_v60  ;;  %v4318_v30 = vadd.f32 %v4306_v16, %v8766_v54  ;;  %v4346_v58 = vsel %vm1806_vm9, %v4344_v18, %v4345_v56 }
 0xa96   : > { %v4317_v50 = vadd.f32 %v4304_v4, %v8773_v15  ;;  %v4343_v8 = vsel %vm1806_vm9, %v4341_v5, %v4342_v7 }
 0xa97   : > { %v4349_v39 = vrot.slane %v4318_v30, 6  ;;  %v5269_v12 = vpack.i.bf16 %v4346_v58, %v4343_v8 }
 0xa98   : > { %v4347_v42 = vrot.slane %v4317_v50, 6 }
 0xa99   : > { %5270 = vrot.lane.b32.xlu1 %v5269_v12, %s5596_s3  ;;  %v4350_v9 = vsel %vm1806_vm9, %v4345_v56, %v4349_v39 }
 0xa9a   : > { %v4348_v28 = vsel %vm1806_vm9, %v4342_v7, %v4347_v42 }
 0xa9b   : > { %v5274_v41 = vpack.i.bf16 %v4350_v9, %v4348_v28 }
 0xa9d   : > { %5275 = vrot.lane.b32.xlu0 %v5274_v41, %s5596_s3  ;;  %s4623_s3 = sshll.u32 %s5690_s23, 8  ;;  %s5503_s23 = scalar_lea.vmem %s8899_s22, 256 }
 0xa9e   : > { %s8906_s29 = scalar_lea.hbm %s9418_s11, %s4623_s3  ;;  %p5504_p6 = scmp.ne.s32.totalorder %s8899_s22, %s5503_s23 }
 0xa9f   : > { %p5511_p0 = scmp.lt.s32.totalorder %s5509_s12, %s5503_s23 }
 0xaa0   : > { %p5505_p12 = pnand %p5504_p6, %p9419_p9 }
 0xaa1   : > { %p5512_p2 = por %p5511_p0, %p5510_p13 }
 0xaa2   : > { %p5506_p1 = pneg %p5505_p12 }
 0xaa4   : > { %p5513_p8 = pnand %p5512_p2, %p5506_p1 }
 0xb0b   : > { %v5271_v54 = vpop.permute.xlu1 %5270 }
 0xb0c   : > { %v5273_v59 = vunpack.i.h.bf16 %v5271_v54  ;;  %v5272_v32 = vunpack.i.l.bf16 %v5271_v54 }
 0xb0e   : > { %v4359_v15 = vsel %vm1940_vm11, %v5272_v32, %v5273_v59 }
 0xb0f   : > { %4939 = vmatprep.mubr.f32.mxu1 %v4359_v15  ;;  %v5276_v34 = vpop.permute.xlu0 %5275 }
 0xb10   : > { %v5278_v20 = vunpack.i.h.bf16 %v5276_v34  ;;  %v5277_v51 = vunpack.i.l.bf16 %v5276_v34 }
 0xb12   : > { %v4360_v17 = vsel %vm1940_vm11, %v5277_v51, %v5278_v20 }
 0xb13   : > { %4940 = vmatmul.mubr.f32.vlgmr.msra.gmra.mrb[4].mxu1 %v4360_v17 }
 0xbe6   : > { %v4941_v40 = vpop.f32.mrb[4].mxu1 }
 0xbe7   : > { %vm4439_vm15 = vcmp.ge.f32.partialorder %v4941_v40, 0.0  ;;  %v4441_v46 = vmul.f32 0.01, %v4941_v40  ;;  %v4429_v36 = vpop.f32.mrb[5].mxu1 }
 0xbe8   : > { %vm4438_vm0 = vcmp.ge.f32.partialorder %v4429_v36, 0.0  ;;  %v4440_v35 = vmul.f32 0.01, %v4429_v36 }
 0xbe9   : > { %v4443_v26 = vsel %vm4439_vm15, %v4941_v40, %v4441_v46 }
 0xbea   : > { %v4445_v0 = vadd.f32 %v5303_v22, %v4443_v26  ;;  %v4442_v37 = vsel %vm4438_vm0, %v4429_v36, %v4440_v35 }
 0xbeb   : > { %v4444_v49 = vadd.f32 %v5304_v53, %v4442_v37 }
 0xbec   : > { %4447 = vst [vmem:[%s491_s26 + $0x8] sm:$0xff] %v4445_v0 }
 0xbed   : > { %4446 = vst [vmem:[%s491_s26] sm:$0xff] %v4444_v49 }
 0xbee   : > { %5516 = shalt.err (!%p5513_p8)
}
 0xbef   : > { %s5517_s5 = scalar_lea.hbm %s8906_s29, 256  ;;  %s5521_s3 = scalar_lea.hbm %s9418_s11, 512 }
 0xbf0   : > { %p5518_p4 = scmp.ne.s32.totalorder %s8906_s29, %s5517_s5  ;;  %p5522_p3 = scmp.lt.u32.totalorder %s8906_s29, %s9418_s11 }
 0xbf1   : > { %p5523_p5 = scmp.lt.u32.totalorder %s5521_s3, %s5517_s5  ;;  %p5525_p6 = scmp.lt.u32.totalorder %s5517_s5, %s8906_s29 }
 0xbf2   : > { %p5519_p10 = pnand %p5518_p4, %p9419_p9 }
 0xbf3   : > { %p5524_p7 = por %p5523_p5, %p5522_p3 }
 0xbf4   : > { %p5520_p11 = pneg %p5519_p10 }
 0xbf5   : > { %p5526_p12 = por %p5525_p6, %p5524_p7 }
 0xbf7   : > { %p5527_p1 = pnand %p5526_p12, %p5520_p11 }
 0xbf9   : > { %5530 = shalt.err (!%p5527_p1)
}
 0xbfa   : > { %s5607_s23 = smov 128   ;;  %s5608_s27 = smov 8  }
 0xbfb   : > { %5160 = dma.vmem_to_hbm [thread:$0]  (%p9419_p9), %s8899_s22, 256, %s8906_s29, %s4449_s28, %s5607_s23, %s5607_s23, %s5608_s27  }
 0xbfc PF: > { %s4477_s24 = sand.u32 1, %s5569_s17   ;;  %p9420_p13 = scmp.ne.s32.totalorder %s9108_s25, 0 }
 0xbfd   : > { %p9421_p0 = scmp.ge.s32.totalorder %s5581_s20, 2  ;;  %s4478_s12 = scalar_lea.sflag [#allocation5], %s4477_s24 }
 0xbff   : > { %p5186_p2 = pnand %p9421_p0, %p9420_p13 }
 0xc01   : > { %5564 = dma.done.wait (!%p5186_p2), %s4478_s12, 256  }
 0xc02   : > { %5566 = vsyncadd (!%p5186_p2), %s4478_s12, 4294967040  ;;  %p27_p8 = scmp.ge.s32.totalorder %s5863_s16, 4   ;;  %s9422_s17 = smov %s5573_s18 }
 0xc03   : > { %s9423_s18 = smov %s5577_s19  ;;  %s9424_s19 = smov %s5874_s4 }
 0xc04   : > { %s9425_s20 = smov %s5863_s16  ;;  %29 = sbr.rel (!%p27_p8) target bundleno = 13 (0xd), region = 133 }
 0xc0b   :  { %4483 = vsyncpa [#allocation4], 1 }
 0xc0c   :  { %4485 = vsyncpa [#allocation4 + $0x1], 1 }
 0xc0d   :  { %4486 = vsyncpa [#allocation7], 1 }
 0xc0e   :  { %4487 = vsyncpa [#allocation10], 1 }
 0xc0f   :  { %4488 = vsyncpa [#allocation13], 1 }
 0xc10   :  { %4489 = vsyncpa [#allocation5], 1 }
 0xc11   :  { %4491 = vsyncpa [#allocation5 + $0x1], 1 }

</bundles_post_ra>
